<compile_context>
chip_gen: v7x
topology: tpu7x:2x2x1
jax: 0.10.0
libtpu: 0.0.40
codegen_flags: <defaults>
</compile_context>

<pallas_src>
import numpy as np
import jax
import jax.numpy as jnp
from jax import lax
from jax.experimental import pallas as pl
from jax.experimental.pallas import tpu as pltpu


# ------------------------------ fused kernel --------------------------------


def _make_fused_kernel(n, half, tb):
    ni = n * tb  # images per grid block

    def kernel(*refs):
        x_refs = refs[:n]                                   # n x (tb, 28, 28)
        (a1_ref, b1_ref, a2_ref, b2_ref,
         wc_ref, bc_ref, wa1_ref, wa2_ref, ba_ref, wb_ref, bb_ref,
         o_ref, s1_ref, s2_ref) = refs[n:]

        # ---------------- Conv2d(1, 6, 5): one K-fused Toeplitz matmul ----------
        x = jnp.concatenate([r[...] for r in x_refs], axis=0)          # (ni, 28, 28)
        lhs1 = jnp.concatenate([x[:, kj:kj + 24, :] for kj in range(5)],
                               axis=2).reshape(ni * 24, 5 * 28)        # (ni*24, 140)
        acc1 = jnp.dot(lhs1, a1_ref[...],
                       preferred_element_type=jnp.float32) + b1_ref[...]  # (ni*24, 256)

        # MaxPool2d(2,2) + ReLU: width via lane-parity halves, height via
        # stride-2 sublane reads from VMEM scratch.
        s1_ref[...] = jnp.maximum(acc1[:, :128], acc1[:, 128:]).reshape(ni, 24, 128)
        p1 = jnp.maximum(
            jnp.maximum(s1_ref[:, pl.ds(0, 12, 2), :],
                        s1_ref[:, pl.ds(1, 12, 2), :]), 0.0)           # (ni, 12, 128)

        # ---------------- Conv2d(6, 16, 5): one K-fused Toeplitz matmul ---------
        lhs2 = jnp.concatenate([p1[:, kj:kj + 8, :] for kj in range(5)],
                               axis=2).reshape(ni * 8, 5 * 128)        # (ni*8, 640)
        acc2 = jnp.dot(lhs2, a2_ref[...],
                       preferred_element_type=jnp.float32) + b2_ref[...]  # (ni*8, 256)

        s2_ref[...] = jnp.maximum(acc2[:, :128], acc2[:, 128:]).reshape(ni, 8, 128)
        p2 = jnp.maximum(
            jnp.maximum(s2_ref[:, pl.ds(0, 4, 2), :],
                        s2_ref[:, pl.ds(1, 4, 2), :]), 0.0)            # (ni, 4, 128)

        # ---------------- head: classifier (shared) + classifier2 ---------------
        feats = p2.reshape(n, tb, 4, 128)                              # (img, b, h, lanes)
        per_img = [feats[g].reshape(tb, 4 * 128) for g in range(n)]    # (tb, 512) each
        f1 = jnp.concatenate(per_img[:half], axis=1)                   # (tb, half*512)
        f2 = jnp.concatenate(per_img[half:], axis=1)

        # classifier's leading ReLU is a no-op (encoder output already >= 0).
        h1 = jnp.maximum(jnp.dot(f1, wc_ref[...],
                                 preferred_element_type=jnp.float32) + bc_ref[...], 0.0)
        h2 = jnp.maximum(jnp.dot(f2, wc_ref[...],
                                 preferred_element_type=jnp.float32) + bc_ref[...], 0.0)
        z = jnp.maximum(
            jnp.dot(h1, wa1_ref[...], preferred_element_type=jnp.float32)
            + jnp.dot(h2, wa2_ref[...], preferred_element_type=jnp.float32)
            + ba_ref[...], 0.0)                                        # (tb, 128)
        o_ref[...] = (jnp.dot(z, wb_ref[...], preferred_element_type=jnp.float32)
                      + bb_ref[...])                                   # (tb, 256)

    return kernel


# ------------------------------ JAX wrapper ----------------------------------


def _batch_blocks(b, n):
    """Pick (padded batch, batch tile).  Tiles are multiples of 8 (or the full
    batch for tiny/ragged batches); grid >= 2 when the batch is large enough so
    v7x megacore can shard the 'parallel' axis; images/block capped for VMEM."""
    cap = max(8, ((128 // max(n, 1)) // 8) * 8)     # <= 128 images per block
    if b < 16:
        return b, b                                  # single full-batch block
    bp = -(-b // 8) * 8
    tb = max(8, (min(cap, bp // 2) // 8) * 8)
    while bp % tb != 0:
        tb -= 8
    return bp, tb


def separate_baseline_multi_forward(imgs1, imgs2, prep, n=4):
    # imgs1, imgs2: lists of n//2 arrays of shape (B, 1, 28, 28) -> (B, 199)
    half = n // 2
    b = imgs1[0].shape[0]
    bp, tb = _batch_blocks(b, n)
    ni = n * tb

    xs = [im.reshape(b, 28, 28).astype(jnp.float32)
          for im in (list(imgs1) + list(imgs2))]
    if bp != b:
        xs = [jnp.pad(xi, ((0, bp - b), (0, 0), (0, 0))) for xi in xs]

    img_spec = pl.BlockSpec((tb, 28, 28), lambda i: (i, 0, 0))
    const2 = lambda i: (0, 0)

    out = pl.pallas_call(
        _make_fused_kernel(n, half, tb),
        out_shape=jax.ShapeDtypeStruct((bp, 256), jnp.float32),
        grid=(bp // tb,),
        in_specs=(
            [img_spec] * n
            + [pl.BlockSpec((140, 256), const2),        # conv1 Toeplitz
               pl.BlockSpec((1, 256), const2),          # conv1 bias
               pl.BlockSpec((640, 256), const2),        # conv2 Toeplitz
               pl.BlockSpec((1, 256), const2),          # conv2 bias
               pl.BlockSpec((half * 512, 128), const2), # classifier W (permuted)
               pl.BlockSpec((1, 128), const2),          # classifier b
               pl.BlockSpec((128, 128), const2),        # classifier2 Wa (half 1)
               pl.BlockSpec((128, 128), const2),        # classifier2 Wa (half 2)
               pl.BlockSpec((1, 128), const2),          # classifier2 ba
               pl.BlockSpec((128, 256), const2),        # classifier2 Wb
               pl.BlockSpec((1, 256), const2)]          # classifier2 bb
        ),
        out_specs=pl.BlockSpec((tb, 256), lambda i: (i, 0)),
        scratch_shapes=[pltpu.VMEM((ni, 24, 128), jnp.float32),
                        pltpu.VMEM((ni, 8, 128), jnp.float32)],
        compiler_params=pltpu.CompilerParams(
            dimension_semantics=("parallel",),
            vmem_limit_bytes=48 * 1024 * 1024),
    )(*xs, prep["conv1_A"], prep["conv1_b"], prep["conv2_A"], prep["conv2_b"],
      prep["wc"], prep["bc"], prep["wa1"], prep["wa2"], prep["ba"],
      prep["wb"], prep["bb"])

    return out[:b, :199]


# -------------------------- one-time weight prep ------------------------------


def prepare_params(params, n=4):
    """Convert PyTorch-layout parameters into MXU-friendly kernel layouts."""
    half = n // 2
    f32 = np.float32

    w1 = np.asarray(params["conv1_w"], f32)        # (6, 1, 5, 5)  OIHW
    b1 = np.asarray(params["conv1_b"], f32)
    w2 = np.asarray(params["conv2_w"], f32)        # (16, 6, 5, 5)
    b2 = np.asarray(params["conv2_b"], f32)

    # conv1 Toeplitz: rows=(kh, w_in) K=140; cols=(w_parity)*128 + w_pool*6 + c.
    a1 = np.zeros((5, 28, 2, 128), f32)
    for kh in range(5):
        for p in range(2):
            for wp in range(12):
                wo = 2 * wp + p
                for kw in range(5):
                    a1[kh, wo + kw, p, wp * 6:(wp + 1) * 6] = w1[:, 0, kh, kw]
    conv1_A = a1.reshape(140, 256)
    c1b = np.zeros((2, 128), f32)
    c1b[:, :72] = np.tile(b1, 12)
    conv1_b = c1b.reshape(1, 256)

    # conv2 Toeplitz: rows=(kh, w_in*6 + c_in) K=640; cols=(parity)*128 + w_pool*16 + c_out.
    a2 = np.zeros((5, 128, 2, 128), f32)
    for kh in range(5):
        for p in range(2):
            for wp in range(4):
                wo = 2 * wp + p
                for kw in range(5):
                    wi = wo + kw
                    for ci in range(6):
                        a2[kh, wi * 6 + ci, p, wp * 16:(wp + 1) * 16] = w2[:, ci, kh, kw]
    conv2_A = a2.reshape(640, 256)
    c2b = np.zeros((2, 128), f32)
    c2b[:, :64] = np.tile(b2, 4)
    conv2_b = c2b.reshape(1, 256)

    # classifier Linear(16*4*4*half, 100): permute torch feature order (c, img, h, w)
    # into the encoder's natural (img, h, w_pool*16 + c) layout, pad to (half*512, 128).
    wcls = np.asarray(params["cls_w"], f32)                        # (100, 512)
    wr = wcls.reshape(100, 16, half, 4, 4)                         # (o, c, i, h, w)
    wr = np.transpose(wr, (2, 3, 4, 1, 0))                         # (i, h, w, c, o)
    wc = np.zeros((half, 4, 128, 128), f32)
    wc[:, :, :64, :100] = wr.reshape(half, 4, 64, 100)
    wc = wc.reshape(half * 512, 128)
    bc = np.zeros((1, 128), f32)
    bc[0, :100] = np.asarray(params["cls_b"], f32)

    wa = np.asarray(params["cls2a_w"], f32)                        # (128, 200)
    wa1 = np.zeros((128, 128), f32); wa1[:100] = wa[:, :100].T
    wa2 = np.zeros((128, 128), f32); wa2[:100] = wa[:, 100:].T
    ba = np.asarray(params["cls2a_b"], f32).reshape(1, 128)

    wb = np.zeros((128, 256), f32)
    wb[:, :199] = np.asarray(params["cls2b_w"], f32).T             # (128, 199)
    bb = np.zeros((1, 256), f32)
    bb[0, :199] = np.asarray(params["cls2b_b"], f32)

    raw = dict(conv1_A=conv1_A, conv1_b=conv1_b, conv2_A=conv2_A, conv2_b=conv2_b,
               wc=wc, bc=bc, wa1=wa1, wa2=wa2, ba=ba, wb=wb, bb=bb)
    return {k: jnp.asarray(v, jnp.float32) for k, v in raw.items()}


def init_params(key, n=4):
    # Deterministic synthetic init; shapes mirror the PyTorch module's parameters.
    feat = 16 * 4 * 4 * n // 2
    ks = jax.random.split(key, 10)

    def nrm(k, shape, scale):
        return scale * jax.random.normal(k, shape, jnp.float32)

    return {
        "conv1_w": nrm(ks[0], (6, 1, 5, 5), 0.2),     # Conv2d(1, 6, 5)  (OIHW)
        "conv1_b": nrm(ks[1], (6,), 0.1),
        "conv2_w": nrm(ks[2], (16, 6, 5, 5), 0.1),    # Conv2d(6, 16, 5)
        "conv2_b": nrm(ks[3], (16,), 0.1),
        "cls_w":   nrm(ks[4], (100, feat), 0.05),     # Linear(512, 100)  (out, in)
        "cls_b":   nrm(ks[5], (100,), 0.05),
        "cls2a_w": nrm(ks[6], (128, 200), 0.05),      # Linear(200, 128)
        "cls2a_b": nrm(ks[7], (128,), 0.05),
        "cls2b_w": nrm(ks[8], (199, 128), 0.05),      # Linear(128, 199)
        "cls2b_b": nrm(ks[9], (199,), 0.05),
    }


# ------------------------------ pure-JAX reference ----------------------------


def _reference_forward(imgs1, imgs2, params, n=4):
    hi = lax.Precision.HIGHEST

    def enc(x):
        y = lax.conv_general_dilated(x, params["conv1_w"], (1, 1), "VALID",
                                     dimension_numbers=("NCHW", "OIHW", "NCHW"),
                                     precision=hi)
        y = y + params["conv1_b"].reshape(1, 6, 1, 1)
        y = lax.reduce_window(y, -jnp.inf, lax.max, (1, 1, 2, 2), (1, 1, 2, 2), "VALID")
        y = jnp.maximum(y, 0.0)
        y = lax.conv_general_dilated(y, params["conv2_w"], (1, 1), "VALID",
                                     dimension_numbers=("NCHW", "OIHW", "NCHW"),
                                     precision=hi)
        y = y + params["conv2_b"].reshape(1, 16, 1, 1)
        y = lax.reduce_window(y, -jnp.inf, lax.max, (1, 1, 2, 2), (1, 1, 2, 2), "VALID")
        return jnp.maximum(y, 0.0)

    feat = 16 * 4 * 4 * n // 2
    x1 = jnp.concatenate([enc(x) for x in imgs1], axis=2).reshape(-1, feat)
    x2 = jnp.concatenate([enc(x) for x in imgs2], axis=2).reshape(-1, feat)

    def cls(x):
        return jnp.dot(jnp.maximum(x, 0.0), params["cls_w"].T, precision=hi) + params["cls_b"]

    h = jnp.concatenate([cls(x1), cls(x2)], axis=1)
    z = jnp.dot(jnp.maximum(h, 0.0), params["cls2a_w"].T, precision=hi) + params["cls2a_b"]
    z = jnp.dot(jnp.maximum(z, 0.0), params["cls2b_w"].T, precision=hi) + params["cls2b_b"]
    return z


if __name__ == "__main__":
    n = 4
    B = 2
    key = jax.random.PRNGKey(0)
    kp, k1a, k1b, k2a, k2b = jax.random.split(key, 5)
    params = init_params(kp, n=n)
    prep = prepare_params(params, n=n)
    imgs1 = [jax.random.normal(k, (B, 1, 28, 28), jnp.float32) for k in (k1a, k1b)]
    imgs2 = [jax.random.normal(k, (B, 1, 28, 28), jnp.float32) for k in (k2a, k2b)]

    out = separate_baseline_multi_forward(imgs1, imgs2, prep, n=n)
    out = jax.block_until_ready(out)
    assert out.shape == (B, 199) and out.dtype == jnp.float32

    ref = jax.block_until_ready(_reference_forward(imgs1, imgs2, params, n=n))
    np.testing.assert_allclose(np.asarray(out), np.asarray(ref), rtol=2e-2, atol=2e-2)
    print("KERNEL_OK")
</pallas_src>

<mosaic_0001>
module attributes {stable_mosaic.version = 11 : i64} {
  func.func @kernel(%arg0: i32, %arg1: memref<2x28x28xf32, #tpu.memory_space<vmem>>, %arg2: memref<2x28x28xf32, #tpu.memory_space<vmem>>, %arg3: memref<2x28x28xf32, #tpu.memory_space<vmem>>, %arg4: memref<2x28x28xf32, #tpu.memory_space<vmem>>, %arg5: memref<140x256xf32, #tpu.memory_space<vmem>>, %arg6: memref<1x256xf32, #tpu.memory_space<vmem>>, %arg7: memref<640x256xf32, #tpu.memory_space<vmem>>, %arg8: memref<1x256xf32, #tpu.memory_space<vmem>>, %arg9: memref<1024x128xf32, #tpu.memory_space<vmem>>, %arg10: memref<1x128xf32, #tpu.memory_space<vmem>>, %arg11: memref<128x128xf32, #tpu.memory_space<vmem>>, %arg12: memref<128x128xf32, #tpu.memory_space<vmem>>, %arg13: memref<1x128xf32, #tpu.memory_space<vmem>>, %arg14: memref<128x256xf32, #tpu.memory_space<vmem>>, %arg15: memref<1x256xf32, #tpu.memory_space<vmem>>, %arg16: memref<2x256xf32, #tpu.memory_space<vmem>>, %arg17: memref<8x24x128xf32, #tpu.memory_space<vmem>>, %arg18: memref<8x8x128xf32, #tpu.memory_space<vmem>>) attributes {dimension_semantics = [#tpu.dimension_semantics<parallel>], iteration_bounds = array<i64: 1>, scalar_prefetch = 0 : i64, scratch_operands = 2 : i64, tpu.core_type = #tpu.core_type<tc>, window_params = [{transform_indices = @transform_0, window_bounds = array<i64: 2, 28, 28>}, {transform_indices = @transform_1, window_bounds = array<i64: 2, 28, 28>}, {transform_indices = @transform_2, window_bounds = array<i64: 2, 28, 28>}, {transform_indices = @transform_3, window_bounds = array<i64: 2, 28, 28>}, {pipeline_mode = #tpu.pipeline_mode<synchronous>, transform_indices = @transform_4, window_bounds = array<i64: 140, 256>}, {pipeline_mode = #tpu.pipeline_mode<synchronous>, transform_indices = @transform_5, window_bounds = array<i64: 1, 256>}, {pipeline_mode = #tpu.pipeline_mode<synchronous>, transform_indices = @transform_6, window_bounds = array<i64: 640, 256>}, {pipeline_mode = #tpu.pipeline_mode<synchronous>, transform_indices = @transform_7, window_bounds = array<i64: 1, 256>}, {pipeline_mode = #tpu.pipeline_mode<synchronous>, transform_indices = @transform_8, window_bounds = array<i64: 1024, 128>}, {pipeline_mode = #tpu.pipeline_mode<synchronous>, transform_indices = @transform_9, window_bounds = array<i64: 1, 128>}, {pipeline_mode = #tpu.pipeline_mode<synchronous>, transform_indices = @transform_10, window_bounds = array<i64: 128, 128>}, {pipeline_mode = #tpu.pipeline_mode<synchronous>, transform_indices = @transform_11, window_bounds = array<i64: 128, 128>}, {pipeline_mode = #tpu.pipeline_mode<synchronous>, transform_indices = @transform_12, window_bounds = array<i64: 1, 128>}, {pipeline_mode = #tpu.pipeline_mode<synchronous>, transform_indices = @transform_13, window_bounds = array<i64: 128, 256>}, {pipeline_mode = #tpu.pipeline_mode<synchronous>, transform_indices = @transform_14, window_bounds = array<i64: 1, 256>}, {transform_indices = @transform_15, window_bounds = array<i64: 2, 256>}]} {
    %c0 = arith.constant 0 : index
    %c0_0 = arith.constant 0 : index
    %c0_1 = arith.constant 0 : index
    %0 = vector.load %arg1[%c0, %c0_0, %c0_1] : memref<2x28x28xf32, #tpu.memory_space<vmem>>, vector<2x28x28xf32>
    %c0_2 = arith.constant 0 : index
    %c0_3 = arith.constant 0 : index
    %c0_4 = arith.constant 0 : index
    %1 = vector.load %arg2[%c0_2, %c0_3, %c0_4] : memref<2x28x28xf32, #tpu.memory_space<vmem>>, vector<2x28x28xf32>
    %c0_5 = arith.constant 0 : index
    %c0_6 = arith.constant 0 : index
    %c0_7 = arith.constant 0 : index
    %2 = vector.load %arg3[%c0_5, %c0_6, %c0_7] : memref<2x28x28xf32, #tpu.memory_space<vmem>>, vector<2x28x28xf32>
    %c0_8 = arith.constant 0 : index
    %c0_9 = arith.constant 0 : index
    %c0_10 = arith.constant 0 : index
    %3 = vector.load %arg4[%c0_8, %c0_9, %c0_10] : memref<2x28x28xf32, #tpu.memory_space<vmem>>, vector<2x28x28xf32>
    %4 = tpu.concatenate %0, %1, %2, %3 in 0 : vector<2x28x28xf32>, vector<2x28x28xf32>, vector<2x28x28xf32>, vector<2x28x28xf32> -> vector<8x28x28xf32>
    %5 = vector.extract_strided_slice %4 {offsets = [0, 0, 0], sizes = [8, 24, 28], strides = [1, 1, 1]} : vector<8x28x28xf32> to vector<8x24x28xf32>
    %6 = vector.extract_strided_slice %4 {offsets = [0, 1, 0], sizes = [8, 24, 28], strides = [1, 1, 1]} : vector<8x28x28xf32> to vector<8x24x28xf32>
    %7 = vector.extract_strided_slice %4 {offsets = [0, 2, 0], sizes = [8, 24, 28], strides = [1, 1, 1]} : vector<8x28x28xf32> to vector<8x24x28xf32>
    %8 = vector.extract_strided_slice %4 {offsets = [0, 3, 0], sizes = [8, 24, 28], strides = [1, 1, 1]} : vector<8x28x28xf32> to vector<8x24x28xf32>
    %9 = vector.extract_strided_slice %4 {offsets = [0, 4, 0], sizes = [8, 24, 28], strides = [1, 1, 1]} : vector<8x28x28xf32> to vector<8x24x28xf32>
    %10 = tpu.concatenate %5, %6, %7, %8, %9 in 2 : vector<8x24x28xf32>, vector<8x24x28xf32>, vector<8x24x28xf32>, vector<8x24x28xf32>, vector<8x24x28xf32> -> vector<8x24x140xf32>
    %11 = vector.shape_cast %10 : vector<8x24x140xf32> to vector<192x140xf32>
    %c0_11 = arith.constant 0 : index
    %c0_12 = arith.constant 0 : index
    %12 = vector.load %arg5[%c0_11, %c0_12] : memref<140x256xf32, #tpu.memory_space<vmem>>, vector<140x256xf32>
    %cst = arith.constant dense<0.000000e+00> : vector<192x256xf32>
    %13 = tpu.matmul %11, %12, %cst {dimension_numbers = #tpu.dot_dimension_numbers<[1], [0], [0], [1], [0, 0, 1, 1], [], []>} : vector<192x140xf32>, vector<140x256xf32>, vector<192x256xf32> -> vector<192x256xf32>
    %c0_13 = arith.constant 0 : index
    %c0_14 = arith.constant 0 : index
    %14 = vector.load %arg6[%c0_13, %c0_14] : memref<1x256xf32, #tpu.memory_space<vmem>>, vector<1x256xf32>
    %15 = vector.broadcast %14 : vector<1x256xf32> to vector<192x256xf32>
    %16 = arith.addf %13, %15 : vector<192x256xf32>
    %17 = vector.extract_strided_slice %16 {offsets = [0, 0], sizes = [192, 128], strides = [1, 1]} : vector<192x256xf32> to vector<192x128xf32>
    %18 = vector.extract_strided_slice %16 {offsets = [0, 128], sizes = [192, 128], strides = [1, 1]} : vector<192x256xf32> to vector<192x128xf32>
    %19 = arith.maximumf %17, %18 : vector<192x128xf32>
    %20 = vector.shape_cast %19 : vector<192x128xf32> to vector<8x24x128xf32>
    %c0_15 = arith.constant 0 : index
    %c0_16 = arith.constant 0 : index
    %c0_17 = arith.constant 0 : index
    %21 = vector.load %arg17[%c0_15, %c0_16, %c0_17] : memref<8x24x128xf32, #tpu.memory_space<vmem>>, vector<8x24x128xf32>
    tpu.vector_store %arg17[%c0_15, %c0_16, %c0_17], %20 {strides = array<i32>} : memref<8x24x128xf32, #tpu.memory_space<vmem>>, vector<8x24x128xf32>,
    %c0_18 = arith.constant 0 : index
    %c0_19 = arith.constant 0 : index
    %c0_20 = arith.constant 0 : index
    %22 = tpu.strided_load %arg17[%c0_18, %c0_19, %c0_20] {strides = array<i32: 1, 2, 1>} : memref<8x24x128xf32, #tpu.memory_space<vmem>>, vector<8x12x128xf32>
    %c0_21 = arith.constant 0 : index
    %c1 = arith.constant 1 : index
    %c0_22 = arith.constant 0 : index
    %23 = tpu.strided_load %arg17[%c0_21, %c1, %c0_22] {strides = array<i32: 1, 2, 1>} : memref<8x24x128xf32, #tpu.memory_space<vmem>>, vector<8x12x128xf32>
    %24 = arith.maximumf %22, %23 : vector<8x12x128xf32>
    %cst_23 = arith.constant 0.000000e+00 : f32
    %25 = vector.broadcast %cst_23 : f32 to vector<8x12x128xf32>
    %26 = arith.maximumf %24, %25 : vector<8x12x128xf32>
    %27 = vector.extract_strided_slice %26 {offsets = [0, 0, 0], sizes = [8, 8, 128], strides = [1, 1, 1]} : vector<8x12x128xf32> to vector<8x8x128xf32>
    %28 = vector.extract_strided_slice %26 {offsets = [0, 1, 0], sizes = [8, 8, 128], strides = [1, 1, 1]} : vector<8x12x128xf32> to vector<8x8x128xf32>
    %29 = vector.extract_strided_slice %26 {offsets = [0, 2, 0], sizes = [8, 8, 128], strides = [1, 1, 1]} : vector<8x12x128xf32> to vector<8x8x128xf32>
    %30 = vector.extract_strided_slice %26 {offsets = [0, 3, 0], sizes = [8, 8, 128], strides = [1, 1, 1]} : vector<8x12x128xf32> to vector<8x8x128xf32>
    %31 = vector.extract_strided_slice %26 {offsets = [0, 4, 0], sizes = [8, 8, 128], strides = [1, 1, 1]} : vector<8x12x128xf32> to vector<8x8x128xf32>
    %32 = tpu.concatenate %27, %28, %29, %30, %31 in 2 : vector<8x8x128xf32>, vector<8x8x128xf32>, vector<8x8x128xf32>, vector<8x8x128xf32>, vector<8x8x128xf32> -> vector<8x8x640xf32>
    %33 = vector.shape_cast %32 : vector<8x8x640xf32> to vector<64x640xf32>
    %c0_24 = arith.constant 0 : index
    %c0_25 = arith.constant 0 : index
    %34 = vector.load %arg7[%c0_24, %c0_25] : memref<640x256xf32, #tpu.memory_space<vmem>>, vector<640x256xf32>
    %cst_26 = arith.constant dense<0.000000e+00> : vector<64x256xf32>
    %35 = tpu.matmul %33, %34, %cst_26 {dimension_numbers = #tpu.dot_dimension_numbers<[1], [0], [0], [1], [0, 0, 1, 1], [], []>} : vector<64x640xf32>, vector<640x256xf32>, vector<64x256xf32> -> vector<64x256xf32>
    %c0_27 = arith.constant 0 : index
    %c0_28 = arith.constant 0 : index
    %36 = vector.load %arg8[%c0_27, %c0_28] : memref<1x256xf32, #tpu.memory_space<vmem>>, vector<1x256xf32>
    %37 = vector.broadcast %36 : vector<1x256xf32> to vector<64x256xf32>
    %38 = arith.addf %35, %37 : vector<64x256xf32>
    %39 = vector.extract_strided_slice %38 {offsets = [0, 0], sizes = [64, 128], strides = [1, 1]} : vector<64x256xf32> to vector<64x128xf32>
    %40 = vector.extract_strided_slice %38 {offsets = [0, 128], sizes = [64, 128], strides = [1, 1]} : vector<64x256xf32> to vector<64x128xf32>
    %41 = arith.maximumf %39, %40 : vector<64x128xf32>
    %42 = vector.shape_cast %41 : vector<64x128xf32> to vector<8x8x128xf32>
    %c0_29 = arith.constant 0 : index
    %c0_30 = arith.constant 0 : index
    %c0_31 = arith.constant 0 : index
    %43 = vector.load %arg18[%c0_29, %c0_30, %c0_31] : memref<8x8x128xf32, #tpu.memory_space<vmem>>, vector<8x8x128xf32>
    tpu.vector_store %arg18[%c0_29, %c0_30, %c0_31], %42 {strides = array<i32>} : memref<8x8x128xf32, #tpu.memory_space<vmem>>, vector<8x8x128xf32>,
    %c0_32 = arith.constant 0 : index
    %c0_33 = arith.constant 0 : index
    %c0_34 = arith.constant 0 : index
    %44 = tpu.strided_load %arg18[%c0_32, %c0_33, %c0_34] {strides = array<i32: 1, 2, 1>} : memref<8x8x128xf32, #tpu.memory_space<vmem>>, vector<8x4x128xf32>
    %c0_35 = arith.constant 0 : index
    %c1_36 = arith.constant 1 : index
    %c0_37 = arith.constant 0 : index
    %45 = tpu.strided_load %arg18[%c0_35, %c1_36, %c0_37] {strides = array<i32: 1, 2, 1>} : memref<8x8x128xf32, #tpu.memory_space<vmem>>, vector<8x4x128xf32>
    %46 = arith.maximumf %44, %45 : vector<8x4x128xf32>
    %cst_38 = arith.constant 0.000000e+00 : f32
    %47 = vector.broadcast %cst_38 : f32 to vector<8x4x128xf32>
    %48 = arith.maximumf %46, %47 : vector<8x4x128xf32>
    %49 = vector.shape_cast %48 : vector<8x4x128xf32> to vector<4x2x4x128xf32>
    %50 = vector.extract_strided_slice %49 {offsets = [0, 0, 0, 0], sizes = [1, 2, 4, 128], strides = [1, 1, 1, 1]} : vector<4x2x4x128xf32> to vector<1x2x4x128xf32>
    %51 = vector.shape_cast %50 : vector<1x2x4x128xf32> to vector<2x4x128xf32>
    %52 = vector.shape_cast %51 : vector<2x4x128xf32> to vector<2x512xf32>
    %53 = vector.extract_strided_slice %49 {offsets = [1, 0, 0, 0], sizes = [1, 2, 4, 128], strides = [1, 1, 1, 1]} : vector<4x2x4x128xf32> to vector<1x2x4x128xf32>
    %54 = vector.shape_cast %53 : vector<1x2x4x128xf32> to vector<2x4x128xf32>
    %55 = vector.shape_cast %54 : vector<2x4x128xf32> to vector<2x512xf32>
    %56 = vector.extract_strided_slice %49 {offsets = [2, 0, 0, 0], sizes = [1, 2, 4, 128], strides = [1, 1, 1, 1]} : vector<4x2x4x128xf32> to vector<1x2x4x128xf32>
    %57 = vector.shape_cast %56 : vector<1x2x4x128xf32> to vector<2x4x128xf32>
    %58 = vector.shape_cast %57 : vector<2x4x128xf32> to vector<2x512xf32>
    %59 = vector.extract_strided_slice %49 {offsets = [3, 0, 0, 0], sizes = [1, 2, 4, 128], strides = [1, 1, 1, 1]} : vector<4x2x4x128xf32> to vector<1x2x4x128xf32>
    %60 = vector.shape_cast %59 : vector<1x2x4x128xf32> to vector<2x4x128xf32>
    %61 = vector.shape_cast %60 : vector<2x4x128xf32> to vector<2x512xf32>
    %62 = tpu.concatenate %52, %55 in 1 : vector<2x512xf32>, vector<2x512xf32> -> vector<2x1024xf32>
    %63 = tpu.concatenate %58, %61 in 1 : vector<2x512xf32>, vector<2x512xf32> -> vector<2x1024xf32>
    %c0_39 = arith.constant 0 : index
    %c0_40 = arith.constant 0 : index
    %64 = vector.load %arg9[%c0_39, %c0_40] : memref<1024x128xf32, #tpu.memory_space<vmem>>, vector<1024x128xf32>
    %cst_41 = arith.constant dense<0.000000e+00> : vector<2x128xf32>
    %65 = tpu.matmul %62, %64, %cst_41 {dimension_numbers = #tpu.dot_dimension_numbers<[1], [0], [0], [1], [0, 0, 1, 1], [], []>} : vector<2x1024xf32>, vector<1024x128xf32>, vector<2x128xf32> -> vector<2x128xf32>
    %c0_42 = arith.constant 0 : index
    %c0_43 = arith.constant 0 : index
    %66 = vector.load %arg10[%c0_42, %c0_43] : memref<1x128xf32, #tpu.memory_space<vmem>>, vector<1x128xf32>
    %67 = vector.broadcast %66 : vector<1x128xf32> to vector<2x128xf32>
    %68 = arith.addf %65, %67 : vector<2x128xf32>
    %cst_44 = arith.constant 0.000000e+00 : f32
    %69 = vector.broadcast %cst_44 : f32 to vector<2x128xf32>
    %70 = arith.maximumf %68, %69 : vector<2x128xf32>
    %c0_45 = arith.constant 0 : index
    %c0_46 = arith.constant 0 : index
    %71 = vector.load %arg9[%c0_45, %c0_46] : memref<1024x128xf32, #tpu.memory_space<vmem>>, vector<1024x128xf32>
    %cst_47 = arith.constant dense<0.000000e+00> : vector<2x128xf32>
    %72 = tpu.matmul %63, %71, %cst_47 {dimension_numbers = #tpu.dot_dimension_numbers<[1], [0], [0], [1], [0, 0, 1, 1], [], []>} : vector<2x1024xf32>, vector<1024x128xf32>, vector<2x128xf32> -> vector<2x128xf32>
    %c0_48 = arith.constant 0 : index
    %c0_49 = arith.constant 0 : index
    %73 = vector.load %arg10[%c0_48, %c0_49] : memref<1x128xf32, #tpu.memory_space<vmem>>, vector<1x128xf32>
    %74 = vector.broadcast %73 : vector<1x128xf32> to vector<2x128xf32>
    %75 = arith.addf %72, %74 : vector<2x128xf32>
    %cst_50 = arith.constant 0.000000e+00 : f32
    %76 = vector.broadcast %cst_50 : f32 to vector<2x128xf32>
    %77 = arith.maximumf %75, %76 : vector<2x128xf32>
    %c0_51 = arith.constant 0 : index
    %c0_52 = arith.constant 0 : index
    %78 = vector.load %arg11[%c0_51, %c0_52] : memref<128x128xf32, #tpu.memory_space<vmem>>, vector<128x128xf32>
    %cst_53 = arith.constant dense<0.000000e+00> : vector<2x128xf32>
    %79 = tpu.matmul %70, %78, %cst_53 {dimension_numbers = #tpu.dot_dimension_numbers<[1], [0], [0], [1], [0, 0, 1, 1], [], []>} : vector<2x128xf32>, vector<128x128xf32>, vector<2x128xf32> -> vector<2x128xf32>
    %c0_54 = arith.constant 0 : index
    %c0_55 = arith.constant 0 : index
    %80 = vector.load %arg12[%c0_54, %c0_55] : memref<128x128xf32, #tpu.memory_space<vmem>>, vector<128x128xf32>
    %cst_56 = arith.constant dense<0.000000e+00> : vector<2x128xf32>
    %81 = tpu.matmul %77, %80, %cst_56 {dimension_numbers = #tpu.dot_dimension_numbers<[1], [0], [0], [1], [0, 0, 1, 1], [], []>} : vector<2x128xf32>, vector<128x128xf32>, vector<2x128xf32> -> vector<2x128xf32>
    %82 = arith.addf %79, %81 : vector<2x128xf32>
    %c0_57 = arith.constant 0 : index
    %c0_58 = arith.constant 0 : index
    %83 = vector.load %arg13[%c0_57, %c0_58] : memref<1x128xf32, #tpu.memory_space<vmem>>, vector<1x128xf32>
    %84 = vector.broadcast %83 : vector<1x128xf32> to vector<2x128xf32>
    %85 = arith.addf %82, %84 : vector<2x128xf32>
    %cst_59 = arith.constant 0.000000e+00 : f32
    %86 = vector.broadcast %cst_59 : f32 to vector<2x128xf32>
    %87 = arith.maximumf %85, %86 : vector<2x128xf32>
    %c0_60 = arith.constant 0 : index
    %c0_61 = arith.constant 0 : index
    %88 = vector.load %arg14[%c0_60, %c0_61] : memref<128x256xf32, #tpu.memory_space<vmem>>, vector<128x256xf32>
    %cst_62 = arith.constant dense<0.000000e+00> : vector<2x256xf32>
    %89 = tpu.matmul %87, %88, %cst_62 {dimension_numbers = #tpu.dot_dimension_numbers<[1], [0], [0], [1], [0, 0, 1, 1], [], []>} : vector<2x128xf32>, vector<128x256xf32>, vector<2x256xf32> -> vector<2x256xf32>
    %c0_63 = arith.constant 0 : index
    %c0_64 = arith.constant 0 : index
    %90 = vector.load %arg15[%c0_63, %c0_64] : memref<1x256xf32, #tpu.memory_space<vmem>>, vector<1x256xf32>
    %91 = vector.broadcast %90 : vector<1x256xf32> to vector<2x256xf32>
    %92 = arith.addf %89, %91 : vector<2x256xf32>
    %c0_65 = arith.constant 0 : index
    %c0_66 = arith.constant 0 : index
    %93 = vector.load %arg16[%c0_65, %c0_66] : memref<2x256xf32, #tpu.memory_space<vmem>>, vector<2x256xf32>
    tpu.vector_store %arg16[%c0_65, %c0_66], %92 {strides = array<i32>} : memref<2x256xf32, #tpu.memory_space<vmem>>, vector<2x256xf32>,
    return
  }
  func.func @transform_0(%arg0: i32) -> (i32, i32, i32) {
    %c0_i32 = arith.constant 0 : i32
    %c0_i32_0 = arith.constant 0 : i32
    %c0_i32_1 = arith.constant 0 : i32
    return %arg0, %c0_i32, %c0_i32_0 : i32, i32, i32
  }
  func.func @transform_1(%arg0: i32) -> (i32, i32, i32) {
    %c0_i32 = arith.constant 0 : i32
    %c0_i32_0 = arith.constant 0 : i32
    %c0_i32_1 = arith.constant 0 : i32
    return %arg0, %c0_i32, %c0_i32_0 : i32, i32, i32
  }
  func.func @transform_2(%arg0: i32) -> (i32, i32, i32) {
    %c0_i32 = arith.constant 0 : i32
    %c0_i32_0 = arith.constant 0 : i32
    %c0_i32_1 = arith.constant 0 : i32
    return %arg0, %c0_i32, %c0_i32_0 : i32, i32, i32
  }
  func.func @transform_3(%arg0: i32) -> (i32, i32, i32) {
    %c0_i32 = arith.constant 0 : i32
    %c0_i32_0 = arith.constant 0 : i32
    %c0_i32_1 = arith.constant 0 : i32
    return %arg0, %c0_i32, %c0_i32_0 : i32, i32, i32
  }
  func.func @transform_4(%arg0: i32) -> (i32, i32) {
    %c0_i32 = arith.constant 0 : i32
    %c0_i32_0 = arith.constant 0 : i32
    %c0_i32_1 = arith.constant 0 : i32
    return %c0_i32, %c0_i32_0 : i32, i32
  }
  func.func @transform_5(%arg0: i32) -> (i32, i32) {
    %c0_i32 = arith.constant 0 : i32
    %c0_i32_0 = arith.constant 0 : i32
    %c0_i32_1 = arith.constant 0 : i32
    return %c0_i32, %c0_i32_0 : i32, i32
  }
  func.func @transform_6(%arg0: i32) -> (i32, i32) {
    %c0_i32 = arith.constant 0 : i32
    %c0_i32_0 = arith.constant 0 : i32
    %c0_i32_1 = arith.constant 0 : i32
    return %c0_i32, %c0_i32_0 : i32, i32
  }
  func.func @transform_7(%arg0: i32) -> (i32, i32) {
    %c0_i32 = arith.constant 0 : i32
    %c0_i32_0 = arith.constant 0 : i32
    %c0_i32_1 = arith.constant 0 : i32
    return %c0_i32, %c0_i32_0 : i32, i32
  }
  func.func @transform_8(%arg0: i32) -> (i32, i32) {
    %c0_i32 = arith.constant 0 : i32
    %c0_i32_0 = arith.constant 0 : i32
    %c0_i32_1 = arith.constant 0 : i32
    return %c0_i32, %c0_i32_0 : i32, i32
  }
  func.func @transform_9(%arg0: i32) -> (i32, i32) {
    %c0_i32 = arith.constant 0 : i32
    %c0_i32_0 = arith.constant 0 : i32
    %c0_i32_1 = arith.constant 0 : i32
    return %c0_i32, %c0_i32_0 : i32, i32
  }
  func.func @transform_10(%arg0: i32) -> (i32, i32) {
    %c0_i32 = arith.constant 0 : i32
    %c0_i32_0 = arith.constant 0 : i32
    %c0_i32_1 = arith.constant 0 : i32
    return %c0_i32, %c0_i32_0 : i32, i32
  }
  func.func @transform_11(%arg0: i32) -> (i32, i32) {
    %c0_i32 = arith.constant 0 : i32
    %c0_i32_0 = arith.constant 0 : i32
    %c0_i32_1 = arith.constant 0 : i32
    return %c0_i32, %c0_i32_0 : i32, i32
  }
  func.func @transform_12(%arg0: i32) -> (i32, i32) {
    %c0_i32 = arith.constant 0 : i32
    %c0_i32_0 = arith.constant 0 : i32
    %c0_i32_1 = arith.constant 0 : i32
    return %c0_i32, %c0_i32_0 : i32, i32
  }
  func.func @transform_13(%arg0: i32) -> (i32, i32) {
    %c0_i32 = arith.constant 0 : i32
    %c0_i32_0 = arith.constant 0 : i32
    %c0_i32_1 = arith.constant 0 : i32
    return %c0_i32, %c0_i32_0 : i32, i32
  }
  func.func @transform_14(%arg0: i32) -> (i32, i32) {
    %c0_i32 = arith.constant 0 : i32
    %c0_i32_0 = arith.constant 0 : i32
    %c0_i32_1 = arith.constant 0 : i32
    return %c0_i32, %c0_i32_0 : i32, i32
  }
  func.func @transform_15(%arg0: i32) -> (i32, i32) {
    %c0_i32 = arith.constant 0 : i32
    %c0_i32_0 = arith.constant 0 : i32
    return %arg0, %c0_i32 : i32, i32
  }
}

</mosaic_0001>

<bundles_post_ra>
// kernel: tpu_custom_call.1
= control target key start
LH: loop header
LB: loop body
LE: loop exit
PB: predicated region body
PF: predicated region fallthrough
CT: control target
= control target key end

     0   :  { %20 = vsyncpa [#allocation5], 0  ;;  %s5925_s0 = inlined_call_operand.vmem [shape: f32[2,28,28], index: 0, kind: input, shape index: {}]   ;;  %s5926_s1 = inlined_call_operand.vmem [shape: f32[2,28,28], index: 1, kind: input, shape index: {}]   ;;  %s5927_s2 = inlined_call_operand.vmem [shape: f32[2,28,28], index: 2, kind: input, shape index: {}]   ;;  %s5928_s3 = inlined_call_operand.vmem [shape: f32[2,28,28], index: 3, kind: input, shape index: {}]   ;;  %s5929_s4 = inlined_call_operand.vmem [shape: f32[140,256], index: 4, kind: input, shape index: {}]   ;;  %s5930_s5 = inlined_call_operand.vmem [shape: f32[1,256], index: 5, kind: input, shape index: {}]   ;;  %s5931_s6 = inlined_call_operand.hbm [shape: f32[640,256], index: 6, kind: input, shape index: {}]   ;;  %s5932_s7 = inlined_call_operand.vmem [shape: f32[1,256], index: 7, kind: input, shape index: {}]   ;;  %s5933_s8 = inlined_call_operand.hbm [shape: f32[1024,128], index: 8, kind: input, shape index: {}]   ;;  %s5934_s9 = inlined_call_operand.vmem [shape: f32[1,128], index: 9, kind: input, shape index: {}]   ;;  %s5935_s10 = inlined_call_operand.vmem [shape: f32[128,128], index: 10, kind: input, shape index: {}]   ;;  %s5936_s11 = inlined_call_operand.hbm [shape: f32[128,128], index: 11, kind: input, shape index: {}]   ;;  %s5937_s12 = inlined_call_operand.vmem [shape: f32[1,128], index: 12, kind: input, shape index: {}]   ;;  %s5938_s13 = inlined_call_operand.hbm [shape: f32[128,256], index: 13, kind: input, shape index: {}]   ;;  %s5939_s14 = inlined_call_operand.vmem [shape: f32[1,256], index: 14, kind: input, shape index: {}]   ;;  %s5940_s15 = inlined_call_operand.hbm [shape: f32[2,256], index: 15, kind: output, shape index: {}]  }
   0x1   :  { %21 = vsyncpa [#allocation8], 0 }
   0x2   :  { %22 = vsyncpa [#allocation11], 0 }
   0x3   :  { %23 = vsyncpa [#allocation6], 0  ;;  %s4415_s18 = smov [#allocation7]   ;;  %s4297_s22 = scalar_lea.hbm %s5933_s8, 16384 }
   0x4   :  { %s55_s19 = sshll.u32 %s4415_s18, 4  ;;  %p4298_p0 = scmp.ne.s32.totalorder %s5933_s8, %s4297_s22  ;;  %s56_s19 = int_to_ptr.vmem [resolvable:$true] %s55_s19 }
   0x5   :  { %p4301_p1 = scmp.lt.u32.totalorder %s4297_s22, %s5933_s8 }
   0x7   :  { %p4303_p2 = pnand %p4301_p1, %p4298_p0 }
   0x9   :  { %4306 = shalt.err (!%p4303_p2)
}
   0xa   :  { %s4307_s27 = scalar_lea.vmem %s56_s19, 16384  ;;  %p4312_p4 = scmp.lt.s32.totalorder %s56_s19, %s56_s19 }
   0xb   :  { %p4308_p3 = scmp.ne.s32.totalorder %s56_s19, %s4307_s27  ;;  %p4313_p5 = scmp.lt.s32.totalorder %s4307_s27, %s4307_s27 }
   0xd   :  { %p4314_p6 = por %p4313_p5, %p4312_p4 }
   0xf   :  { %p4315_p7 = pnand %p4314_p6, %p4308_p3 }
  0x11   :  { %4318 = shalt.err (!%p4315_p7)
}
  0x12   :  { %s5941_s28 = smov 128   ;;  %s5942_s29 = smov 8  }
  0x13   :  { %61 = dma.hbm_to_vmem [thread:$0]  %s5933_s8, 16384, %s56_s19, [#allocation8], %s5941_s28, %s5941_s28, %s5942_s29  }
  0x14   :  { %s4418_s17 = smov [#allocation4]   ;;  %s4319_s22 = scalar_lea.hbm %s5931_s6, 20480 }
  0x15   :  { %s41_s18 = sshll.u32 %s4418_s17, 4  ;;  %p4320_p8 = scmp.ne.s32.totalorder %s5931_s6, %s4319_s22  ;;  %s42_s18 = int_to_ptr.vmem [resolvable:$true] %s41_s18 }
  0x16   :  { %p4323_p9 = scmp.lt.u32.totalorder %s4319_s22, %s5931_s6 }
  0x18   :  { %p4325_p10 = pnand %p4323_p9, %p4320_p8 }
  0x1a   :  { %4328 = shalt.err (!%p4325_p10)
}
  0x1b   :  { %s4329_s27 = scalar_lea.vmem %s42_s18, 20480  ;;  %p4334_p12 = scmp.lt.s32.totalorder %s42_s18, %s42_s18 }
  0x1c   :  { %p4330_p11 = scmp.ne.s32.totalorder %s42_s18, %s4329_s27  ;;  %p4335_p13 = scmp.lt.s32.totalorder %s4329_s27, %s4329_s27 }
  0x1e   :  { %p4336_p0 = por %p4335_p13, %p4334_p12 }
  0x20   :  { %p4337_p1 = pnand %p4336_p0, %p4330_p11 }
  0x22   :  { %4340 = shalt.err (!%p4337_p1)
}
  0x23   :  { %s4419_s8 = smov 256   ;;  %s4420_s19 = smov 16  }
  0x24   :  { %47 = dma.hbm_to_vmem [thread:$0]  %s5931_s6, 20480, %s42_s18, [#allocation5], %s4419_s8, %s4419_s8, %s4420_s19  }
  0x25   :  { %s4421_s17 = smov [#allocation9]   ;;  %s4422_s21 = smov [#allocation10]  }
  0x26   :  { %s71_s20 = sshll.u32 %s4421_s17, 4  ;;  %s85_s22 = sshll.u32 %s4422_s21, 4  ;;  %s72_s20 = int_to_ptr.vmem [resolvable:$true] %s71_s20  ;;  %s4544_s22 = int_to_ptr.vmem [resolvable:$true] %s85_s22 }
  0x27   :  { %s4341_s25 = scalar_lea.hbm %s5936_s11, 2048 }
  0x28   :  { %p4342_p2 = scmp.ne.s32.totalorder %s5936_s11, %s4341_s25  ;;  %p4345_p3 = scmp.lt.u32.totalorder %s4341_s25, %s5936_s11 }
  0x2a   :  { %p4347_p4 = pnand %p4345_p3, %p4342_p2 }
  0x2c   :  { %4350 = shalt.err (!%p4347_p4)
}
  0x2d   :  { %s4351_s6 = scalar_lea.vmem %s72_s20, 2048  ;;  %p4356_p6 = scmp.lt.s32.totalorder %s72_s20, %s72_s20 }
  0x2e   :  { %p4352_p5 = scmp.ne.s32.totalorder %s72_s20, %s4351_s6  ;;  %p4357_p7 = scmp.lt.s32.totalorder %s4351_s6, %s4351_s6 }
  0x30   :  { %p4358_p8 = por %p4357_p7, %p4356_p6 }
  0x32   :  { %p4359_p9 = pnand %p4358_p8, %p4352_p5 }
  0x34   :  { %4362 = shalt.err (!%p4359_p9)
}
  0x35   :  { %s5945_s18 = smov 8   ;;  %s5946_s30 = smov 128  }
  0x36   :  { %77 = dma.hbm_to_vmem [thread:$0]  %s5936_s11, 2048, %s72_s20, [#allocation8], %s5946_s30, %s5946_s30, %s5945_s18  }
  0x37   :  { %s4363_s28 = scalar_lea.hbm %s5938_s13, 4096 }
  0x38   :  { %p4364_p10 = scmp.ne.s32.totalorder %s5938_s13, %s4363_s28  ;;  %p4367_p11 = scmp.lt.u32.totalorder %s4363_s28, %s5938_s13 }
  0x3a   :  { %p4369_p12 = pnand %p4367_p11, %p4364_p10 }
  0x3c   :  { %4372 = shalt.err (!%p4369_p12)
}
  0x3d   :  { %s4373_s27 = scalar_lea.vmem %s4544_s22, 4096  ;;  %p4378_p0 = scmp.lt.s32.totalorder %s4544_s22, %s4544_s22 }
  0x3e   :  { %p4374_p13 = scmp.ne.s32.totalorder %s4544_s22, %s4373_s27  ;;  %p4379_p1 = scmp.lt.s32.totalorder %s4373_s27, %s4373_s27 }
  0x40   :  { %p4380_p2 = por %p4379_p1, %p4378_p0 }
  0x42   :  { %p4381_p3 = pnand %p4380_p2, %p4374_p13 }
  0x44   :  { %4384 = shalt.err (!%p4381_p3)
}
  0x45   :  { %91 = dma.hbm_to_vmem [thread:$0]  %s5938_s13, 4096, %s4544_s22, [#allocation11], %s4419_s8, %s4419_s8, %s4420_s19  }
  0x46   :  { %4407 = dma.done.wait [#allocation5], 20480  }
  0x47   :  { %4408 = vsyncadd [#allocation5], 4294946816 }
  0x48   :  { %4409 = dma.done.wait [#allocation8], 18432  }
  0x49   :  { %4410 = vsyncadd [#allocation8], 4294948864 }
  0x4a   :  { %4411 = dma.done.wait [#allocation11], 4096  }
  0x4b   :  { %4412 = vsyncadd [#allocation11], 4294963200  ;;  %vm428_vm0 = vcmask 1044480   ;;  %v4584_v0 = vld [vmem:[%s5925_s0] sm:$0xff]  ;;  %v4589_v1 = vld [vmem:[%s5925_s0 + $0x8] sm:$0xff]  ;;  %vm170_vm1 = vcmask 1046528  }
  0x4c   :  { %v4594_v2 = vld [vmem:[%s5925_s0 + $0x10] sm:$0xff]  ;;  %vm557_vm2 = vcmask 1043456   ;;  %vm299_vm3 = vcmask 1045504   ;;  %v429_v3 = vrot.slane %v4584_v0, 3  ;;  %v430_v4 = vrot.slane %v4589_v1, 3  ;;  %v4614_v16 = vld [vmem:[%s5925_s0 + $0x20] sm:$0xff] }
  0x4d   :  { %v432_v5 = vrot.slane %v4594_v2, 3  ;;  %v171_v6 = vrot.slane %v4584_v0, 1  ;;  %v172_v7 = vrot.slane %v4589_v1, 1  ;;  %v174_v8 = vrot.slane %v4594_v2, 1  ;;  %v109_v11 = vld [vmem:[%s5925_s0 + $0x18] sm:$0xf] }
  0x4e   :  { %v558_v9 = vrot.slane %v4584_v0, 4  ;;  %v559_v10 = vrot.slane %v4589_v1, 4  ;;  %v431_v12 = vsel %vm428_vm0, %v429_v3, %v430_v4  ;;  %v300_v14 = vrot.slane %v4584_v0, 2  ;;  %v4619_v17 = vld [vmem:[%s5925_s0 + $0x28] sm:$0xff]  ;;  %s4423_s29 = smov 84   ;;  %s4424_s24 = smov 28  }
  0x4f   :  { %v433_v13 = vsel %vm428_vm0, %v430_v4, %v432_v5  ;;  %v301_v15 = vrot.slane %v4589_v1, 2  ;;  %v173_v19 = vsel %vm170_vm1, %v171_v6, %v172_v7  ;;  %v175_v20 = vsel %vm170_vm1, %v172_v7, %v174_v8  ;;  %s4425_s25 = smov 112   ;;  %s4426_s26 = smov 56   ;;  %v4648_v45 = vld [vmem:[%s5925_s0 + $0x30] sm:$0xff]  ;;  %v113_v46 = vld [vmem:[%s5925_s0 + $0x38] sm:$0xf] }
  0x50   :  { %v4133_v18 = vpack.i.bf16 %v433_v13, %v431_v12  ;;  %v4123_v21 = vpack.i.bf16 %v175_v20, %v173_v19  ;;  %v303_v23 = vrot.slane %v4594_v2, 2  ;;  %v176_v24 = vrot.slane %v109_v11, 1  ;;  %v4676_v3 = vld [vmem:[%s5926_s1 + $0x8] sm:$0xff]  ;;  %v4681_v4 = vld [vmem:[%s5926_s1 + $0x10] sm:$0xff]  ;;  %s4433_s22 = smov [#allocation12]  }
  0x51   :  { %v302_v22 = vsel %vm299_vm3, %v300_v14, %v301_v15  ;;  %v560_v25 = vsel %vm557_vm2, %v558_v9, %v559_v10  ;;  %v178_v26 = vrot.slane %v4614_v16, 1  ;;  %v179_v27 = vrot.slane %v4619_v17, 1  ;;  %s3098_s23 = sshll.u32 %s4433_s22, 4  ;;  %s3099_s23 = int_to_ptr.vmem [resolvable:$true] %s3098_s23 }
  0x52   :  { %4134 = vrot.lane.b32.xlu1 %v4133_v18, %s4423_s29  ;;  %v434_v28 = vrot.slane %v109_v11, 3  ;;  %4124 = vrot.lane.b32.xlu0 %v4123_v21, %s4424_s24  ;;  %v304_v29 = vsel %vm299_vm3, %v301_v15, %v303_v23  ;;  %v177_v30 = vsel %vm170_vm1, %v174_v8, %v176_v24  ;;  %v436_v31 = vrot.slane %v4614_v16, 3  ;;  %p4390_p5 = scmp.lt.s32.totalorder %s3099_s23, %s3099_s23 }
  0x53   :  { %v437_v32 = vrot.slane %v4619_v17, 3  ;;  %v4128_v33 = vpack.i.bf16 %v304_v29, %v302_v22  ;;  %v180_v34 = vsel %vm170_vm1, %v178_v26, %v179_v27  ;;  %v561_v35 = vrot.slane %v4594_v2, 4  ;;  %v4671_v2 = vld [vmem:[%s5926_s1] sm:$0xff] }
  0x54   :  { %v305_v36 = vrot.slane %v109_v11, 2  ;;  %v307_v37 = vrot.slane %v4614_v16, 2  ;;  %v4138_v38 = vpack.i.bf16 %v180_v34, %v177_v30  ;;  %v308_v39 = vrot.slane %v4619_v17, 2 }
  0x55   :  { %v435_v40 = vsel %vm428_vm0, %v432_v5, %v434_v28  ;;  %v438_v41 = vsel %vm428_vm0, %v436_v31, %v437_v32  ;;  %v562_v42 = vsel %vm557_vm2, %v559_v10, %v561_v35  ;;  %v565_v48 = vrot.slane %v4614_v16, 4  ;;  %v117_v31 = vld [vmem:[%s5926_s1 + $0x18] sm:$0xf] }
  0x56   :  { %614 = vrot.lane.b32.xlu1 %v560_v25, %s4425_s25  ;;  %4129 = vrot.lane.b32.xlu0 %v4128_v33, %s4426_s26  ;;  %v306_v43 = vsel %vm299_vm3, %v303_v23, %v305_v36  ;;  %v309_v44 = vsel %vm299_vm3, %v307_v37, %v308_v39  ;;  %v4148_v47 = vpack.i.bf16 %v438_v41, %v435_v40  ;;  %v566_v49 = vrot.slane %v4619_v17, 4  ;;  %v4720_v33 = vld [vmem:[%s5926_s1 + $0x28] sm:$0xff] }
  0x57   :  { %v4143_v50 = vpack.i.bf16 %v309_v44, %v306_v43  ;;  %v563_v51 = vrot.slane %v109_v11, 4  ;;  %v310_v52 = vrot.slane %v4648_v45, 2  ;;  %v312_v53 = vrot.slane %v113_v46, 2 }
  0x58   :  { %v181_v54 = vrot.slane %v4648_v45, 1  ;;  %v183_v55 = vrot.slane %v113_v46, 1  ;;  %v567_v56 = vsel %vm557_vm2, %v565_v48, %v566_v49  ;;  %v439_v62 = vrot.slane %v4648_v45, 3 }
  0x59   :  { %v564_v57 = vsel %vm557_vm2, %v561_v35, %v563_v51  ;;  %v311_v58 = vsel %vm299_vm3, %v308_v39, %v310_v52  ;;  %v313_v59 = vsel %vm299_vm3, %v310_v52, %v312_v53  ;;  %v441_v63 = vrot.slane %v113_v46, 3  ;;  %v4740_v51 = vld [vmem:[%s5926_s1 + $0x30] sm:$0xff]  ;;  %v4745_v52 = vld [vmem:[%s5926_s1 + $0x38] sm:$0xf] }
  0x5a   :  { %4139 = vrot.lane.b32.xlu1 %v4138_v38, %s4424_s24  ;;  %616 = vrot.lane.b32.xlu0 %v562_v42, %s4425_s25  ;;  %v182_v60 = vsel %vm170_vm1, %v179_v27, %v181_v54  ;;  %v184_v61 = vsel %vm170_vm1, %v181_v54, %v183_v55  ;;  %v4158_v5 = vpack.i.bf16 %v313_v59, %v311_v58  ;;  %v568_v6 = vrot.slane %v4648_v45, 4 }
  0x5b   :  { %v4153_v7 = vpack.i.bf16 %v184_v61, %v182_v60  ;;  %v185_v8 = vrot.slane %v4671_v2, 1  ;;  %v186_v9 = vrot.slane %v4676_v3, 1  ;;  %v188_v10 = vrot.slane %v4681_v4, 1 }
  0x5c   :  { %v440_v11 = vsel %vm428_vm0, %v437_v32, %v439_v62  ;;  %v442_v12 = vsel %vm428_vm0, %v439_v62, %v441_v63  ;;  %v569_v13 = vsel %vm557_vm2, %v566_v49, %v568_v6  ;;  %v443_v14 = vrot.slane %v4671_v2, 3  ;;  %v4715_v32 = vld [vmem:[%s5926_s1 + $0x20] sm:$0xff] }
  0x5d   :  { %v444_v15 = vrot.slane %v4676_v3, 3  ;;  %v4163_v17 = vpack.i.bf16 %v442_v12, %v440_v11  ;;  %v187_v18 = vsel %vm170_vm1, %v185_v8, %v186_v9  ;;  %v189_v19 = vsel %vm170_vm1, %v186_v9, %v188_v10  ;;  %v786_v11 = vld [vmem:[%s5929_s4] sm:$0xff] }
  0x5e   :  { %4149 = vrot.lane.b32.xlu1 %v4148_v47, %s4423_s29  ;;  %4144 = vrot.lane.b32.xlu0 %v4143_v50, %s4426_s26  ;;  %v446_v20 = vrot.slane %v4681_v4, 3  ;;  %v570_v21 = vrot.slane %v113_v46, 4  ;;  %v314_v22 = vrot.slane %v4671_v2, 2  ;;  %v315_v23 = vrot.slane %v4676_v3, 2 }
  0x5f   :  { %v317_v24 = vrot.slane %v4681_v4, 2  ;;  %v4168_v25 = vpack.i.bf16 %v189_v19, %v187_v18  ;;  %v445_v26 = vsel %vm428_vm0, %v443_v14, %v444_v15  ;;  %v573_v35 = vrot.slane %v4676_v3, 4  ;;  %v791_v18 = vld [vmem:[%s5929_s4 + $0x28] sm:$0xff]  ;;  %v793_v19 = vld [vmem:[%s5929_s4 + $0x38] sm:$0xff] }
  0x60   :  { %v447_v27 = vsel %vm428_vm0, %v444_v15, %v446_v20  ;;  %v571_v28 = vsel %vm557_vm2, %v568_v6, %v570_v21  ;;  %v316_v29 = vsel %vm299_vm3, %v314_v22, %v315_v23  ;;  %v575_v36 = vrot.slane %v4681_v4, 4  ;;  %v787_v4 = vld [vmem:[%s5929_s4 + $0x8] sm:$0xff] }
  0x61   :  { %v318_v30 = vsel %vm299_vm3, %v315_v23, %v317_v24  ;;  %v4178_v34 = vpack.i.bf16 %v447_v27, %v445_v26  ;;  %v572_v37 = vrot.slane %v4671_v2, 4  ;;  %v319_v39 = vrot.slane %v117_v31, 2 }
  0x62   :  { %620 = vrot.lane.b32.xlu1 %v567_v56, %s4425_s25  ;;  %618 = vrot.lane.b32.xlu0 %v564_v57, %s4425_s25  ;;  %v4173_v38 = vpack.i.bf16 %v318_v30, %v316_v29  ;;  %v321_v40 = vrot.slane %v4715_v32, 2  ;;  %v322_v41 = vrot.slane %v4720_v33, 2  ;;  %v190_v42 = vrot.slane %v117_v31, 1  ;;  %v792_v29 = vld [vmem:[%s5929_s4 + $0x30] sm:$0xff] }
  0x63   :  { %v192_v43 = vrot.slane %v4715_v32, 1  ;;  %v193_v44 = vrot.slane %v4720_v33, 1  ;;  %v576_v46 = vsel %vm557_vm2, %v573_v35, %v575_v36  ;;  %v574_v47 = vsel %vm557_vm2, %v572_v37, %v573_v35  ;;  %v797_v35 = vld [vmem:[%s5929_s4 + $0x58] sm:$0xff]  ;;  %v4818_v37 = vld [vmem:[%s5927_s2 + $0x10] sm:$0xff] }
  0x64   :  { %v320_v48 = vsel %vm299_vm3, %v317_v24, %v319_v39  ;;  %v323_v49 = vsel %vm299_vm3, %v321_v40, %v322_v41  ;;  %v448_v50 = vrot.slane %v117_v31, 3  ;;  %v191_v53 = vsel %vm170_vm1, %v188_v10, %v190_v42  ;;  %v794_v42 = vld [vmem:[%s5929_s4 + $0x40] sm:$0xff] }
  0x65   :  { %v194_v54 = vsel %vm170_vm1, %v192_v43, %v193_v44  ;;  %v450_v55 = vrot.slane %v4715_v32, 3  ;;  %v451_v56 = vrot.slane %v4720_v33, 3  ;;  %v577_v57 = vrot.slane %v117_v31, 4  ;;  %v796_v43 = vld [vmem:[%s5929_s4 + $0x50] sm:$0xff] }
  0x66   :  { %4159 = vrot.lane.b32.xlu1 %v4158_v5, %s4426_s26  ;;  %4154 = vrot.lane.b32.xlu0 %v4153_v7, %s4424_s24  ;;  %v4188_v58 = vpack.i.bf16 %v323_v49, %v320_v48  ;;  %v195_v59 = vrot.slane %v4740_v51, 1  ;;  %v197_v60 = vrot.slane %v4745_v52, 1  ;;  %v4183_v61 = vpack.i.bf16 %v194_v54, %v191_v53  ;;  %v789_v5 = vld [vmem:[%s5929_s4 + $0x18] sm:$0xff]  ;;  %v799_v49 = vld [vmem:[%s5929_s4 + $0x68] sm:$0xff] }
  0x67   :  { %v449_v62 = vsel %vm428_vm0, %v446_v20, %v448_v50  ;;  %v452_v63 = vsel %vm428_vm0, %v450_v55, %v451_v56  ;;  %v578_v6 = vsel %vm557_vm2, %v575_v36, %v577_v57  ;;  %v453_v9 = vrot.slane %v4740_v51, 3  ;;  %v801_v50 = vld [vmem:[%s5929_s4 + $0x78] sm:$0xff] }
  0x68   :  { %v196_v7 = vsel %vm170_vm1, %v193_v44, %v195_v59  ;;  %v198_v8 = vsel %vm170_vm1, %v195_v59, %v197_v60  ;;  %v455_v10 = vrot.slane %v4745_v52, 3  ;;  %v4193_v12 = vpack.i.bf16 %v452_v63, %v449_v62  ;;  %v800_v59 = vld [vmem:[%s5929_s4 + $0x70] sm:$0xff]  ;;  %v803_v62 = vld [vmem:[%s5929_s4 + $0x88] sm:$0xff]  ;;  %v805_v63 = vld [vmem:[%s5929_s4 + $0x98] sm:$0xff] }
  0x69   :  { %v326_v14 = vrot.slane %v4745_v52, 2  ;;  %v3522_v15 = vpack.c.bf16 %v789_v5, %v787_v4  ;;  %v579_v20 = vrot.slane %v4715_v32, 4  ;;  %v580_v21 = vrot.slane %v4720_v33, 4  ;;  %v4806_v33 = vld [vmem:[%s5927_s2 + $0x8] sm:$0xff] }
  0x6a   :  { %622 = vrot.lane.b32.xlu1 %v569_v13, %s4425_s25  ;;  %4164 = vrot.lane.b32.xlu0 %v4163_v17, %s4423_s29  ;;  %v324_v13 = vrot.slane %v4740_v51, 2  ;;  %v788_v17 = vld [vmem:[%s5929_s4 + $0x10] sm:$0xff]  ;;  %v4198_v22 = vpack.i.bf16 %v198_v8, %v196_v7  ;;  %v454_v23 = vsel %vm428_vm0, %v451_v56, %v453_v9  ;;  %v456_v24 = vsel %vm428_vm0, %v453_v9, %v455_v10  ;;  %v4867_v8 = vld [vmem:[%s5927_s2 + $0x18] sm:$0xf] }
  0x6b   :  { %3523 = vmatprep.subr.bf16.mxu0 %v3522_v15  ;;  %v3524_v26 = vpack.c.bf16 %v788_v17, %v786_v11  ;;  %v3526_v27 = vpack.c.bf16 %v793_v19, %v791_v18  ;;  %v581_v36 = vsel %vm557_vm2, %v579_v20, %v580_v21  ;;  %v582_v39 = vrot.slane %v4740_v51, 4  ;;  %v802_v17 = vld [vmem:[%s5929_s4 + $0x80] sm:$0xff]  ;;  %v804_v18 = vld [vmem:[%s5929_s4 + $0x90] sm:$0xff] }
  0x6c   :  { %v325_v30 = vsel %vm299_vm3, %v322_v41, %v324_v13  ;;  %v327_v31 = vsel %vm299_vm3, %v324_v13, %v326_v14  ;;  %v584_v40 = vrot.slane %v4745_v52, 4  ;;  %v331_v52 = vrot.slane %v4818_v37, 2  ;;  %v4880_v13 = vld [vmem:[%s5927_s2 + $0x28] sm:$0xff] }
  0x6d   :  { %3525 = vmatpush1.bf16.msra.mxu0 %v3524_v26  ;;  %v4203_v44 = vpack.i.bf16 %v327_v31, %v325_v30  ;;  %v200_v54 = vrot.slane %v4806_v33, 1  ;;  %v202_v55 = vrot.slane %v4818_v37, 1  ;;  %v3532_v56 = vpack.c.bf16 %v796_v43, %v794_v42  ;;  %v811_v42 = vld [vmem:[%s5929_s4 + $0xc8] sm:$0xff]  ;;  %v813_v43 = vld [vmem:[%s5929_s4 + $0xd8] sm:$0xff] }
  0x6e   :  { %4169 = vrot.lane.b32.xlu1 %v4168_v25, %s4424_s24  ;;  %624 = vrot.lane.b32.xlu0 %v571_v28, %s4425_s25  ;;  %v4792_v25 = vld [vmem:[%s5927_s2] sm:$0xff]  ;;  %v3534_v57 = vpack.c.bf16 %v801_v50, %v799_v49  ;;  %v585_v60 = vsel %vm557_vm2, %v582_v39, %v584_v40  ;;  %v458_v10 = vrot.slane %v4806_v33, 3  ;;  %v460_v11 = vrot.slane %v4818_v37, 3 }
  0x6f   :  { %v790_v28 = vld [vmem:[%s5929_s4 + $0x20] sm:$0xff]  ;;  %3527 = vmatprep.subr.bf16.mxu0 %v3526_v27  ;;  %v199_v53 = vrot.slane %v4792_v25, 1  ;;  %v203_v7 = vsel %vm170_vm1, %v200_v54, %v202_v55  ;;  %v457_v9 = vrot.slane %v4792_v25, 3  ;;  %v3538_v15 = vpack.c.bf16 %v805_v63, %v803_v62  ;;  %v4950_v63 = vld [vmem:[%s5927_s2 + $0x30] sm:$0xff] }
  0x70   :  { %v3528_v41 = vpack.c.bf16 %v792_v29, %v790_v28  ;;  %v586_v20 = vrot.slane %v4792_v25, 4  ;;  %v204_v26 = vrot.slane %v4867_v8, 1  ;;  %v207_v28 = vrot.slane %v4880_v13, 1 }
  0x71   :  { %v459_v29 = vsel %vm428_vm0, %v457_v9, %v458_v10  ;;  %v461_v30 = vsel %vm428_vm0, %v458_v10, %v460_v11  ;;  %v3540_v31 = vpack.c.bf16 %v804_v18, %v802_v17  ;;  %v462_v40 = vrot.slane %v4867_v8, 3  ;;  %v819_v18 = vld [vmem:[%s5929_s4 + $0x108] sm:$0xff] }
  0x72   :  { %4179 = vrot.lane.b32.xlu1 %v4178_v34, %s4423_s29  ;;  %4174 = vrot.lane.b32.xlu0 %v4173_v38, %s4426_s26  ;;  %v795_v34 = vld [vmem:[%s5929_s4 + $0x48] sm:$0xff]  ;;  %v4208_v38 = vpack.i.bf16 %v456_v24, %v454_v23  ;;  %v809_v23 = vld [vmem:[%s5929_s4 + $0xb8] sm:$0xff]  ;;  %v333_v49 = vrot.slane %v4867_v8, 2  ;;  %v338_v17 = vrot.slane %v4950_v63, 2  ;;  %vm4427_vm4 = vmmov 1  }
  0x73   :  { %v3530_v48 = vpack.c.bf16 %v797_v35, %v795_v34  ;;  %3529 = vmatpush1.bf16.msra.mxu0 %v3528_v41  ;;  %v806_v35 = vld [vmem:[%s5929_s4 + $0xa0] sm:$0xff]  ;;  %vm4997_vm5 = vmpackc.low %vm557_vm2, %vm4427_vm4  ;;  %vm834_vm6 = vcmask 97280   ;;  %vm686_vm7 = vcmask 228352   ;;  %vm711_vm8 = vcmask 457728  }
  0x74   :  { %vm736_vm9 = vcmask 687104   ;;  %vm761_vm10 = vcmask 916480   ;;  %vm4432_vm11 = vmmov 0  }
  0x75   :  { %3531 = vmatprep.subr.bf16.mxu0 %v3530_v48  ;;  %v465_v48 = vrot.slane %v4880_v13, 3 }
  0x76   :  { %628 = vrot.lane.b32.xlu1 %v576_v46, %s4425_s25  ;;  %626 = vrot.lane.b32.xlu0 %v574_v47, %s4425_s25  ;;  %v328_v46 = vrot.slane %v4792_v25, 2  ;;  %v329_v47 = vrot.slane %v4806_v33, 2 }
  0x77   :  { %3533 = vmatpush1.bf16.msra.mxu0 %v3532_v56  ;;  %v3546_v56 = vpack.c.bf16 %v813_v43, %v811_v42  ;;  %v5011_v42 = vld [vmem:[%s5928_s3 + $0x8] sm:$0xff]  ;;  %v5016_v43 = vld [vmem:[%s5928_s3 + $0x10] sm:$0xff] }
  0x78   :  { %v330_v4 = vsel %vm299_vm3, %v328_v46, %v329_v47  ;;  %v332_v5 = vsel %vm299_vm3, %v329_v47, %v331_v52  ;;  %3535 = vmatprep.subr.bf16.mxu0 %v3534_v57  ;;  %v205_v46 = vsel %vm170_vm1, %v202_v55, %v204_v26  ;;  %v810_v55 = vld [vmem:[%s5929_s4 + $0xc0] sm:$0xff]  ;;  %v812_v57 = vld [vmem:[%s5929_s4 + $0xd0] sm:$0xff] }
  0x79   :  { %v4218_v19 = vpack.i.bf16 %v332_v5, %v330_v4  ;;  %v4955_v4 = vld [vmem:[%s5927_s2 + $0x38] sm:$0xf]  ;;  %v3548_v9 = vpack.c.bf16 %v812_v57, %v810_v55  ;;  %v216_v55 = vrot.slane %v5016_v43, 1 }
  0x7a   :  { %4189 = vrot.lane.b32.xlu1 %v4188_v58, %s4426_s26  ;;  %4184 = vrot.lane.b32.xlu0 %v4183_v61, %s4424_s24  ;;  %v798_v58 = vld [vmem:[%s5929_s4 + $0x60] sm:$0xff]  ;;  %v583_v61 = vsel %vm557_vm2, %v580_v21, %v582_v39  ;;  %v587_v21 = vrot.slane %v4806_v33, 4  ;;  %v589_v39 = vrot.slane %v4818_v37, 4  ;;  %v211_v26 = vrot.slane %v4955_v4, 1 }
  0x7b   :  { %v3536_v14 = vpack.c.bf16 %v800_v59, %v798_v58  ;;  %v815_v59 = vld [vmem:[%s5929_s4 + $0xe8] sm:$0xff] }
  0x7c   :  { %v590_v5 = vsel %vm557_vm2, %v587_v21, %v589_v39 }
  0x7d   :  { %3537 = vmatpush1.bf16.msra.mxu0 %v3536_v14  ;;  %v816_v14 = vld [vmem:[%s5929_s4 + $0xf0] sm:$0xff] }
  0x7e   :  { %630 = vrot.lane.b32.xlu1 %v578_v6, %s4425_s25  ;;  %4194 = vrot.lane.b32.xlu0 %v4193_v12, %s4423_s29  ;;  %v201_v6 = vsel %vm170_vm1, %v199_v53, %v200_v54  ;;  %v4875_v12 = vld [vmem:[%s5927_s2 + $0x20] sm:$0xff]  ;;  %v336_v53 = vrot.slane %v4880_v13, 2 }
  0x7f   :  { %v4213_v24 = vpack.i.bf16 %v203_v7, %v201_v6  ;;  %v206_v27 = vrot.slane %v4875_v12, 1  ;;  %3539 = vmatprep.subr.bf16.mxu0 %v3538_v15  ;;  %v464_v41 = vrot.slane %v4875_v12, 3  ;;  %v335_v50 = vrot.slane %v4875_v12, 2 }
  0x80   :  { %v334_v6 = vsel %vm299_vm3, %v331_v52, %v333_v49  ;;  %v340_v52 = vrot.slane %v4955_v4, 2 }
  0x81   :  { %v208_v47 = vsel %vm170_vm1, %v206_v27, %v207_v28  ;;  %3541 = vmatpush1.bf16.msra.mxu0 %v3540_v31  ;;  %v466_v62 = vsel %vm428_vm0, %v464_v41, %v465_v48  ;;  %v337_v7 = vsel %vm299_vm3, %v335_v50, %v336_v53  ;;  %v818_v31 = vld [vmem:[%s5929_s4 + $0x100] sm:$0xff] }
  0x82   :  { %4199 = vrot.lane.b32.xlu1 %v4198_v22, %s4424_s24  ;;  %632 = vrot.lane.b32.xlu0 %v581_v36, %s4425_s25  ;;  %v807_v22 = vld [vmem:[%s5929_s4 + $0xa8] sm:$0xff]  ;;  %v808_v36 = vld [vmem:[%s5929_s4 + $0xb0] sm:$0xff]  ;;  %v4228_v58 = vpack.i.bf16 %v208_v47, %v205_v46 }
  0x83   :  { %v3542_v34 = vpack.c.bf16 %v809_v23, %v807_v22  ;;  %v3544_v54 = vpack.c.bf16 %v808_v36, %v806_v35  ;;  %v594_v22 = vrot.slane %v4880_v13, 4  ;;  %v591_v23 = vrot.slane %v4867_v8, 4  ;;  %v5006_v41 = vld [vmem:[%s5928_s3] sm:$0xff] }
  0x84   :  { %v339_v8 = vsel %vm299_vm3, %v336_v53, %v338_v17  ;;  %v341_v35 = vsel %vm299_vm3, %v338_v17, %v340_v52  ;;  %v469_v36 = vrot.slane %v4955_v4, 3  ;;  %v596_v53 = vrot.slane %v4950_v63, 4 }
  0x85   :  { %3543 = vmatprep.subr.bf16.mxu0 %v3542_v34  ;;  %v820_v34 = vld [vmem:[%s5929_s4 + $0x110] sm:$0xf]  ;;  %v4248_v50 = vpack.i.bf16 %v341_v35, %v339_v8 }
  0x86   :  { %4209 = vrot.lane.b32.xlu1 %v4208_v38, %s4423_s29  ;;  %4204 = vrot.lane.b32.xlu0 %v4203_v44, %s4426_s26  ;;  %v588_v38 = vsel %vm557_vm2, %v586_v20, %v587_v21  ;;  %v4223_v44 = vpack.i.bf16 %v461_v30, %v459_v29  ;;  %v4233_v20 = vpack.i.bf16 %v337_v7, %v334_v6  ;;  %v593_v21 = vrot.slane %v4875_v12, 4 }
  0x87   :  { %3545 = vmatpush1.bf16.msra.mxu0 %v3544_v54  ;;  %v467_v29 = vrot.slane %v4950_v63, 3  ;;  %v3557_v49 = vpack.c.bf16 %v820_v34, %v818_v31  ;;  %v342_v6 = vrot.slane %v5006_v41, 2  ;;  %v343_v7 = vrot.slane %v5011_v42, 2 }
  0x88   :  { %3547 = vmatprep.subr.bf16.mxu0 %v3546_v56  ;;  %v214_v56 = vrot.slane %v5011_v42, 1 }
  0x89   :  { %v468_v54 = vsel %vm428_vm0, %v465_v48, %v467_v29  ;;  %v597_v48 = vsel %vm557_vm2, %v594_v22, %v596_v53  ;;  %v344_v17 = vsel %vm299_vm3, %v342_v6, %v343_v7 }
  0x8a   :  { %636 = vrot.lane.b32.xlu1 %v585_v60, %s4425_s25  ;;  %634 = vrot.lane.b32.xlu0 %v583_v61, %s4425_s25  ;;  %v817_v60 = vld [vmem:[%s5929_s4 + $0xf8] sm:$0xff]  ;;  %v463_v61 = vsel %vm428_vm0, %v460_v11, %v462_v40  ;;  %v814_v11 = vld [vmem:[%s5929_s4 + $0xe0] sm:$0xff]  ;;  %v595_v40 = vsel %vm557_vm2, %v593_v21, %v594_v22  ;;  %v601_v21 = vrot.slane %v5011_v42, 4 }
  0x8b   :  { %v3550_v10 = vpack.c.bf16 %v817_v60, %v815_v59  ;;  %v4238_v15 = vpack.i.bf16 %v466_v62, %v463_v61  ;;  %3549 = vmatpush1.bf16.msra.mxu0 %v3548_v9  ;;  %v3552_v27 = vpack.c.bf16 %v816_v14, %v814_v11  ;;  %v217_v60 = vsel %vm170_vm1, %v214_v56, %v216_v55 }
  0x8c   :  { %v471_v61 = vrot.slane %v5006_v41, 3  ;;  %v472_v62 = vrot.slane %v5011_v42, 3  ;;  %v345_v9 = vrot.slane %v5016_v43, 2 }
  0x8d   :  { %3551 = vmatprep.subr.bf16.mxu0 %v3550_v10  ;;  %v598_v10 = vrot.slane %v4955_v4, 4  ;;  %v5064_v4 = vld [vmem:[%s5928_s3 + $0x20] sm:$0xff] }
  0x8e   :  { %4219 = vrot.lane.b32.xlu1 %v4218_v19, %s4426_s26  ;;  %4214 = vrot.lane.b32.xlu0 %v4213_v24, %s4424_s24  ;;  %v821_v19 = vld [vmem:[%s5929_s4 + $0x118] sm:$0xf]  ;;  %v209_v24 = vrot.slane %v4950_v63, 1  ;;  %v473_v14 = vsel %vm428_vm0, %v471_v61, %v472_v62  ;;  %v346_v52 = vsel %vm299_vm3, %v343_v7, %v345_v9  ;;  %v220_v34 = vrot.slane %v5064_v4, 1 }
  0x8f   :  { %v3554_v30 = vpack.c.bf16 %v821_v19, %v819_v18  ;;  %3553 = vmatpush1.bf16.msra.mxu0 %v3552_v27  ;;  %v599_v18 = vsel %vm557_vm2, %v596_v53, %v598_v10  ;;  %v133_v19 = vld [vmem:[%s5928_s3 + $0x18] sm:$0xf]  ;;  %v5093_v53 = vld [vmem:[%s5928_s3 + $0x30] sm:$0xff]  ;;  %v607_v6 = vrot.slane %v5064_v4, 4 }
  0x90   :  { %v210_v46 = vsel %vm170_vm1, %v207_v28, %v209_v24  ;;  %v212_v47 = vsel %vm170_vm1, %v209_v24, %v211_v26  ;;  %v213_v28 = vrot.slane %v5006_v41, 1  ;;  %v603_v24 = vrot.slane %v5016_v43, 4 }
  0x91   :  { %3556 = vmatprep.subr.msk.bf16.mxu0 %vm4997_vm5, %v3554_v30  ;;  %v4243_v57 = vpack.i.bf16 %v212_v47, %v210_v46  ;;  %v600_v26 = vrot.slane %v5006_v41, 4  ;;  %v347_v27 = vrot.slane %v133_v19, 2  ;;  %v218_v31 = vrot.slane %v133_v19, 1 }
  0x92   :  { %638 = vrot.lane.b32.xlu1 %v588_v38, %s4425_s25  ;;  %4224 = vrot.lane.b32.xlu0 %v4223_v44, %s4423_s29  ;;  %v592_v44 = vsel %vm557_vm2, %v589_v39, %v591_v23  ;;  %v470_v39 = vsel %vm428_vm0, %v467_v29, %v469_v36  ;;  %v215_v59 = vsel %vm170_vm1, %v213_v28, %v214_v56  ;;  %v349_v29 = vrot.slane %v5064_v4, 2 }
  0x93   :  { %3559 = vmatpush1.bf16.msk.msra.mxu0 %vm4997_vm5, %v3557_v49  ;;  %v4258_v11 = vpack.i.bf16 %v217_v60, %v215_v59  ;;  %v4263_v23 = vpack.i.bf16 %v346_v52, %v344_v17  ;;  %v604_v35 = vsel %vm557_vm2, %v601_v21, %v603_v24  ;;  %v602_v36 = vsel %vm557_vm2, %v600_v26, %v601_v21  ;;  %v1385_v21 = vld [vmem:[#allocation4] sm:$0xff]  ;;  %v1392_v26 = vld [vmem:[#allocation4 + $0x38] sm:$0xff] }
  0x94   :  { %v348_v38 = vsel %vm299_vm3, %v345_v9, %v347_v27  ;;  %v476_v47 = vrot.slane %v133_v19, 3  ;;  %v478_v49 = vrot.slane %v5064_v4, 3  ;;  %v605_v56 = vrot.slane %v133_v19, 4  ;;  %v1388_v19 = vld [vmem:[#allocation4 + $0x18] sm:$0xff] }
  0x95   :  { %v481_v9 = vrot.slane %v5093_v53, 3  ;;  %v610_v52 = vrot.slane %v5093_v53, 4 }
  0x96   :  { %4229 = vrot.lane.b32.xlu1 %v4228_v58, %s4424_s24  ;;  %640 = vrot.lane.b32.xlu0 %v590_v5, %s4425_s25  ;;  %v4253_v58 = vpack.i.bf16 %v470_v39, %v468_v54  ;;  %v474_v5 = vrot.slane %v5016_v43, 3  ;;  %v5098_v54 = vld [vmem:[%s5928_s3 + $0x38] sm:$0xf]  ;;  %v606_v59 = vsel %vm557_vm2, %v603_v24, %v605_v56  ;;  %v1390_v24 = vld [vmem:[#allocation4 + $0x28] sm:$0xff] }
  0x97   :  { %v1400_v56 = vld [vmem:[#allocation4 + $0x78] sm:$0xff] }
  0x9a   :  { %4239 = vrot.lane.b32.xlu1 %v4238_v15, %s4423_s29  ;;  %4234 = vrot.lane.b32.xlu0 %v4233_v20, %s4426_s26  ;;  %v475_v15 = vsel %vm428_vm0, %v472_v62, %v474_v5  ;;  %v5069_v20 = vld [vmem:[%s5928_s3 + $0x28] sm:$0xff] }
  0x9b   :  { %v4268_v22 = vpack.i.bf16 %v475_v15, %v473_v14  ;;  %v350_v30 = vrot.slane %v5069_v20, 2  ;;  %v221_v8 = vrot.slane %v5069_v20, 1  ;;  %v608_v7 = vrot.slane %v5069_v20, 4 }
  0x9c   :  { %v354_v15 = vrot.slane %v5098_v54, 2 }
  0x9d   :  { %v222_v46 = vsel %vm170_vm1, %v220_v34, %v221_v8  ;;  %v609_v10 = vsel %vm557_vm2, %v607_v6, %v608_v7  ;;  %v1391_v34 = vld [vmem:[#allocation4 + $0x30] sm:$0xff] }
  0x9e   :  { %644 = vrot.lane.b32.xlu1 %v595_v40, %s4425_s25  ;;  %642 = vrot.lane.b32.xlu0 %v592_v44, %s4425_s25  ;;  %v351_v40 = vsel %vm299_vm3, %v349_v29, %v350_v30  ;;  %v219_v44 = vsel %vm170_vm1, %v216_v55, %v218_v31  ;;  %v223_v55 = vrot.slane %v5093_v53, 1  ;;  %v3564_v29 = vpack.c.bf16 %v1392_v26, %v1390_v24  ;;  %v1389_v31 = vld [vmem:[#allocation4 + $0x20] sm:$0xff]  ;;  %v1399_v6 = vld [vmem:[#allocation4 + $0x70] sm:$0xff] }
  0x9f   :  { %v4278_v39 = vpack.i.bf16 %v351_v40, %v348_v38  ;;  %v4273_v28 = vpack.i.bf16 %v222_v46, %v219_v44  ;;  %v611_v40 = vsel %vm557_vm2, %v608_v7, %v610_v52  ;;  %v483_v44 = vrot.slane %v5098_v54, 3  ;;  %v1403_v26 = vld [vmem:[#allocation4 + $0x90] sm:$0xff] }
  0xa0   :  { %v224_v61 = vsel %vm170_vm1, %v221_v8, %v223_v55  ;;  %v1394_v8 = vld [vmem:[#allocation4 + $0x48] sm:$0xff]  ;;  %v3566_v46 = vpack.c.bf16 %v1391_v34, %v1389_v31 }
  0xa2   :  { %4249 = vrot.lane.b32.xlu1 %v4248_v50, %s4426_s26  ;;  %4244 = vrot.lane.b32.xlu0 %v4243_v57, %s4424_s24  ;;  %v479_v50 = vrot.slane %v5069_v20, 3  ;;  %v225_v57 = vrot.slane %v5098_v54, 1 }
  0xa4   :  { %v226_v62 = vsel %vm170_vm1, %v223_v55, %v225_v57  ;;  %v482_v14 = vsel %vm428_vm0, %v479_v50, %v481_v9 }
  0xa6   :  { %646 = vrot.lane.b32.xlu1 %v597_v48, %s4425_s25  ;;  %4254 = vrot.lane.b32.xlu0 %v4253_v58, %s4423_s29  ;;  %v477_v48 = vsel %vm428_vm0, %v474_v5, %v476_v47  ;;  %v480_v58 = vsel %vm428_vm0, %v478_v49, %v479_v50  ;;  %v4288_v5 = vpack.i.bf16 %v226_v62, %v224_v61  ;;  %v1393_v50 = vld [vmem:[#allocation4 + $0x40] sm:$0xff] }
  0xa7   :  { %v4283_v60 = vpack.i.bf16 %v480_v58, %v477_v48  ;;  %v484_v58 = vsel %vm428_vm0, %v481_v9, %v483_v44  ;;  %v1397_v62 = vld [vmem:[#allocation4 + $0x60] sm:$0xff] }
  0xa8   :  { %v1405_v44 = vld [vmem:[#allocation4 + $0xa0] sm:$0xff] }
  0xaa   :  { %4259 = vrot.lane.b32.xlu1 %v4258_v11, %s4424_s24  ;;  %648 = vrot.lane.b32.xlu0 %v599_v18, %s4425_s25  ;;  %v352_v11 = vrot.slane %v5093_v53, 2  ;;  %v1386_v18 = vld [vmem:[#allocation4 + $0x8] sm:$0xff] }
  0xac   :  { %v353_v17 = vsel %vm299_vm3, %v350_v30, %v352_v11  ;;  %v355_v30 = vsel %vm299_vm3, %v352_v11, %v354_v15  ;;  %v1404_v11 = vld [vmem:[#allocation4 + $0x98] sm:$0xff] }
  0xae   :  { %4269 = vrot.lane.b32.xlu1 %v4268_v22, %s4423_s29  ;;  %4264 = vrot.lane.b32.xlu0 %v4263_v23, %s4426_s26  ;;  %v3560_v22 = vpack.c.bf16 %v1388_v19, %v1386_v18  ;;  %v1387_v23 = vld [vmem:[#allocation4 + $0x10] sm:$0xff]  ;;  %v3574_v19 = vpack.c.bf16 %v1399_v6, %v1397_v62  ;;  %v1409_v6 = vld [vmem:[#allocation4 + $0xc0] sm:$0xff] }
  0xaf   :  { %v3562_v27 = vpack.c.bf16 %v1387_v23, %v1385_v21 }
  0xb0   :  { %3561 = vmatprep.subr.bf16.mxu1 %v3560_v22 }
  0xb1   :  { %3563 = vmatpush1.bf16.msra.mxu1 %v3562_v27  ;;  %v1406_v27 = vld [vmem:[#allocation4 + $0xa8] sm:$0xff] }
  0xb2   :  { %652 = vrot.lane.b32.xlu1 %v604_v35, %s4425_s25  ;;  %650 = vrot.lane.b32.xlu0 %v602_v36, %s4425_s25  ;;  %v612_v35 = vrot.slane %v5098_v54, 4  ;;  %v1396_v36 = vld [vmem:[#allocation4 + $0x58] sm:$0xff] }
  0xb3   :  { %3565 = vmatprep.subr.bf16.mxu1 %v3564_v29  ;;  %v3568_v49 = vpack.c.bf16 %v1396_v36, %v1394_v8  ;;  %v1408_v29 = vld [vmem:[#allocation4 + $0xb8] sm:$0xff] }
  0xb4   :  { %v613_v48 = vsel %vm557_vm2, %v610_v52, %v612_v35 }
  0xb5   :  { %3567 = vmatpush1.bf16.msra.mxu1 %v3566_v46  ;;  %v1407_v46 = vld [vmem:[#allocation4 + $0xb0] sm:$0xff] }
  0xb6   :  { %4279 = vrot.lane.b32.xlu1 %v4278_v39, %s4426_s26  ;;  %4274 = vrot.lane.b32.xlu0 %v4273_v28, %s4424_s24  ;;  %v1395_v39 = vld [vmem:[#allocation4 + $0x50] sm:$0xff]  ;;  %v1398_v28 = vld [vmem:[#allocation4 + $0x68] sm:$0xff] }
  0xb7   :  { %3569 = vmatprep.subr.bf16.mxu1 %v3568_v49  ;;  %v3572_v61 = vpack.c.bf16 %v1400_v56, %v1398_v28  ;;  %v1412_v28 = vld [vmem:[#allocation4 + $0xd8] sm:$0xff] }
  0xba   :  { %654 = vrot.lane.b32.xlu1 %v606_v59, %s4425_s25  ;;  %4284 = vrot.lane.b32.xlu0 %v4283_v60, %s4423_s29  ;;  %v3570_v59 = vpack.c.bf16 %v1395_v39, %v1393_v50  ;;  %v1410_v39 = vld [vmem:[#allocation4 + $0xc8] sm:$0xff] }
  0xbc   :  { %3571 = vmatpush1.bf16.msra.mxu1 %v3570_v59 }
  0xbd   :  { %3573 = vmatprep.subr.bf16.mxu1 %v3572_v61 }
  0xbe   :  { %4289 = vrot.lane.b32.xlu1 %v4288_v5, %s4424_s24  ;;  %656 = vrot.lane.b32.xlu0 %v609_v10, %s4425_s25  ;;  %v1402_v10 = vld [vmem:[#allocation4 + $0x88] sm:$0xff] }
  0xbf   :  { %v3576_v24 = vpack.c.bf16 %v1404_v11, %v1402_v10  ;;  %v1414_v10 = vld [vmem:[#allocation4 + $0xe8] sm:$0xff]  ;;  %v1416_v11 = vld [vmem:[#allocation4 + $0xf8] sm:$0xff] }
  0xc0   :  { %3575 = vmatpush1.bf16.msra.mxu1 %v3574_v19  ;;  %v1415_v19 = vld [vmem:[#allocation4 + $0xf0] sm:$0xff] }
  0xc1   :  { %3577 = vmatprep.subr.bf16.mxu1 %v3576_v24  ;;  %v1418_v24 = vld [vmem:[#allocation4 + $0x108] sm:$0xff] }
  0xc2   :  { %529 = vrot.lane.b32.xlu1 %v482_v14, %s4423_s29  ;;  %400 = vrot.lane.b32.xlu0 %v353_v17, %s4426_s26 }
  0xc4   :  { %v4135_v38 = vpop.permute.xlu1 %4134  ;;  %v4125_v47 = vpop.permute.xlu0 %4124 }
  0xc5   :  { %v4127_v55 = vunpack.i.h.bf16 %v4125_v47  ;;  %v4126_v57 = vunpack.i.l.bf16 %v4125_v47  ;;  %v4136_v14 = vunpack.i.l.bf16 %v4135_v38  ;;  %v4137_v21 = vunpack.i.h.bf16 %v4135_v38 }
  0xc6   :  { %402 = vrot.lane.b32.xlu1 %v355_v30, %s4426_s26  ;;  %658 = vrot.lane.b32.xlu0 %v611_v40, %s4425_s25  ;;  %v3580_v40 = vpack.c.bf16 %v1408_v29, %v1406_v27 }
  0xc7   :  { %v688_v9 = vsel %vm686_vm7, %v4589_v1, %v4127_v55  ;;  %v687_v15 = vsel %vm686_vm7, %v4584_v0, %v4126_v57  ;;  %v1401_v1 = vld [vmem:[#allocation4 + $0x80] sm:$0xff]  ;;  %v4293_v55 = vld [vmem:[%s5925_s0 + $0x10] sm:$0xff] }
  0xc8   :  { %v615_v54 = vpop.permute.xlu1 %614  ;;  %v4130_v60 = vpop.permute.xlu0 %4129  ;;  %v3578_v35 = vpack.c.bf16 %v1403_v26, %v1401_v1  ;;  %v1420_v1 = vld [vmem:[#allocation4 + $0x118] sm:$0xff] }
  0xc9   :  { %3111 = vmatprep.mubr.msk.f32.mxu0 %vm834_vm6, %v615_v54  ;;  %v4132_v7 = vunpack.i.h.bf16 %v4130_v60  ;;  %v4131_v5 = vunpack.i.l.bf16 %v4130_v60  ;;  %v3582_v60 = vpack.c.bf16 %v1407_v46, %v1405_v44 }
  0xca   :  { %660 = vrot.lane.b32.xlu1 %v613_v48, %s4425_s25  ;;  %531 = vrot.lane.b32.xlu0 %v484_v58, %s4423_s29 }
  0xcb   :  { %v712_v52 = vsel %vm711_vm8, %v687_v15, %v4131_v5  ;;  %v713_v18 = vsel %vm711_vm8, %v688_v9, %v4132_v7  ;;  %3579 = vmatpush1.bf16.msra.mxu1 %v3578_v35  ;;  %v1411_v7 = vld [vmem:[#allocation4 + $0xd0] sm:$0xff]  ;;  %v1417_v35 = vld [vmem:[#allocation4 + $0x100] sm:$0xff] }
  0xcc   :  { %v4140_v17 = vpop.permute.xlu1 %4139  ;;  %v617_v22 = vpop.permute.xlu0 %616  ;;  %v737_v23 = vsel %vm736_vm9, %v712_v52, %v4136_v14  ;;  %v738_v8 = vsel %vm736_vm9, %v713_v18, %v4137_v21  ;;  %3581 = vmatprep.subr.bf16.mxu1 %v3580_v40  ;;  %v3586_v15 = vpack.c.bf16 %v1411_v7, %v1409_v6  ;;  %v3588_v52 = vpack.c.bf16 %v1416_v11, %v1414_v10  ;;  %v1413_v18 = vld [vmem:[#allocation4 + $0xe0] sm:$0xff] }
  0xcd   :  { %v762_v0 = vsel %vm761_vm10, %v737_v23, %v615_v54  ;;  %v4142_v31 = vunpack.i.h.bf16 %v4140_v17  ;;  %v4141_v34 = vunpack.i.l.bf16 %v4140_v17  ;;  %v763_v50 = vsel %vm761_vm10, %v738_v8, %v617_v22 }
  0xce   :  { %954 = vmatmul.mubr.f32.vlgmr.msra.gmra.mrb[0].mxu0 %v762_v0  ;;  %v4294_v0 = vld [vmem:[%s5925_s0 + $0x28] sm:$0xff] }
  0xcf   :  { %3112 = vmatprep.mubr.msk.f32.mxu0 %vm834_vm6, %v617_v22  ;;  %v690_v56 = vsel %vm686_vm7, %v4614_v16, %v4142_v31  ;;  %v689_v57 = vsel %vm686_vm7, %v4293_v55, %v4141_v34  ;;  %v3584_v16 = vpack.c.bf16 %v1412_v28, %v1410_v39  ;;  %3583 = vmatpush1.bf16.msra.mxu1 %v3582_v60 }
  0xd0   :  { %v4150_v30 = vpop.permute.xlu1 %4149  ;;  %v4145_v38 = vpop.permute.xlu0 %4144  ;;  %v3590_v31 = vpack.c.bf16 %v1415_v19, %v1413_v18 }
  0xd1   :  { %v4151_v36 = vunpack.i.l.bf16 %v4150_v30  ;;  %v4147_v47 = vunpack.i.h.bf16 %v4145_v38  ;;  %v4146_v49 = vunpack.i.l.bf16 %v4145_v38  ;;  %v4152_v48 = vunpack.i.h.bf16 %v4150_v30  ;;  %3585 = vmatprep.subr.bf16.mxu1 %v3584_v16 }
  0xd2   :  { %960 = vmatmul.mubr.f32.gmra.mrb[2].mxu0 %v763_v50  ;;  %v3592_v30 = vpack.c.bf16 %v1420_v1, %v1418_v24 }
  0xd3   :  { %v714_v58 = vsel %vm711_vm8, %v689_v57, %v4146_v49  ;;  %v715_v59 = vsel %vm711_vm8, %v690_v56, %v4147_v47  ;;  %3587 = vmatpush1.bf16.msra.mxu1 %v3586_v15 }
  0xd4   :  { %v621_v54 = vpop.permute.xlu1 %620  ;;  %v619_v61 = vpop.permute.xlu0 %618  ;;  %v739_v62 = vsel %vm736_vm9, %v714_v58, %v4151_v36  ;;  %v740_v14 = vsel %vm736_vm9, %v715_v59, %v4152_v48  ;;  %3589 = vmatprep.subr.bf16.mxu1 %v3588_v52  ;;  %v1419_v36 = vld [vmem:[#allocation4 + $0x110] sm:$0xff] }
  0xd5   :  { %3113 = vmatprep.mubr.msk.f32.mxu0 %vm834_vm6, %v619_v61  ;;  %v764_v5 = vsel %vm761_vm10, %v739_v62, %v619_v61  ;;  %v765_v23 = vsel %vm761_vm10, %v740_v14, %v621_v54  ;;  %v3594_v50 = vpack.c.bf16 %v1419_v36, %v1417_v35 }
  0xd6   :  { %966 = vmatmul.mubr.f32.gmra.mrb[4].mxu0 %v764_v5 }
  0xd7   :  { %3114 = vmatprep.mubr.msk.f32.mxu0 %vm834_vm6, %v621_v54  ;;  %3591 = vmatpush1.bf16.msra.mxu1 %v3590_v31 }
  0xd8   :  { %v4160_v9 = vpop.permute.xlu1 %4159  ;;  %v4155_v17 = vpop.permute.xlu0 %4154  ;;  %3593 = vmatprep.subr.bf16.mxu1 %v3592_v30 }
  0xd9   :  { %v4157_v21 = vunpack.i.h.bf16 %v4155_v17  ;;  %v4156_v22 = vunpack.i.l.bf16 %v4155_v17  ;;  %v4161_v26 = vunpack.i.l.bf16 %v4160_v9  ;;  %v4162_v34 = vunpack.i.h.bf16 %v4160_v9 }
  0xda   :  { %972 = vmatmul.mubr.f32.gmra.mrb[6].mxu0 %v765_v23 }
  0xdb   :  { %v691_v27 = vsel %vm686_vm7, %v4294_v0, %v4156_v22  ;;  %v692_v38 = vsel %vm686_vm7, %v4648_v45, %v4157_v21  ;;  %3595 = vmatpush1.bf16.msra.mxu1 %v3594_v50  ;;  %v4295_v21 = vld [vmem:[%s5926_s1 + $0x10] sm:$0xff] }
  0xdc   :  { %v623_v29 = vpop.permute.xlu1 %622  ;;  %v4165_v8 = vpop.permute.xlu0 %4164  ;;  %v716_v46 = vsel %vm711_vm8, %v691_v27, %v4161_v26  ;;  %v717_v56 = vsel %vm711_vm8, %v692_v38, %v4162_v34 }
  0xdd   :  { %3115 = vmatprep.mubr.msk.f32.mxu0 %vm834_vm6, %v623_v29  ;;  %v4167_v40 = vunpack.i.h.bf16 %v4165_v8  ;;  %v4166_v44 = vunpack.i.l.bf16 %v4165_v8 }
  0xdf   :  { %v741_v49 = vsel %vm736_vm9, %v716_v46, %v4166_v44  ;;  %v742_v55 = vsel %vm736_vm9, %v717_v56, %v4167_v40 }
  0xe0   :  { %v4170_v47 = vpop.permute.xlu1 %4169  ;;  %v625_v39 = vpop.permute.xlu0 %624  ;;  %v766_v28 = vsel %vm761_vm10, %v741_v49, %v623_v29 }
  0xe1   :  { %978 = vmatmul.mubr.f32.gmra.mrb[8].mxu0 %v766_v28  ;;  %v4172_v57 = vunpack.i.h.bf16 %v4170_v47  ;;  %v4171_v45 = vunpack.i.l.bf16 %v4170_v47  ;;  %v767_v59 = vsel %vm761_vm10, %v742_v55, %v625_v39  ;;  %v4296_v28 = vld [vmem:[%s5926_s1 + $0x28] sm:$0xff] }
  0xe2   :  { %3116 = vmatprep.mubr.msk.f32.mxu0 %vm834_vm6, %v625_v39 }
  0xe3   :  { %v694_v62 = vsel %vm686_vm7, %v4676_v3, %v4172_v57  ;;  %v693_v16 = vsel %vm686_vm7, %v4671_v2, %v4171_v45 }
  0xe4   :  { %v4180_v48 = vpop.permute.xlu1 %4179  ;;  %v4175_v58 = vpop.permute.xlu0 %4174 }
  0xe5   :  { %v4181_v54 = vunpack.i.l.bf16 %v4180_v48  ;;  %v4177_v60 = vunpack.i.h.bf16 %v4175_v58  ;;  %v4176_v61 = vunpack.i.l.bf16 %v4175_v58  ;;  %984 = vmatmul.mubr.f32.gmra.mrb[10].mxu0 %v767_v59  ;;  %v4182_v6 = vunpack.i.h.bf16 %v4180_v48 }
  0xe7   :  { %v718_v5 = vsel %vm711_vm8, %v693_v16, %v4176_v61  ;;  %v719_v10 = vsel %vm711_vm8, %v694_v62, %v4177_v60 }
  0xe8   :  { %v629_v7 = vpop.permute.xlu1 %628  ;;  %v627_v11 = vpop.permute.xlu0 %626  ;;  %v743_v14 = vsel %vm736_vm9, %v718_v5, %v4181_v54  ;;  %v744_v15 = vsel %vm736_vm9, %v719_v10, %v4182_v6 }
  0xe9   :  { %3117 = vmatprep.mubr.msk.f32.mxu0 %vm834_vm6, %v627_v11  ;;  %v768_v9 = vsel %vm761_vm10, %v743_v14, %v627_v11  ;;  %v769_v18 = vsel %vm761_vm10, %v744_v15, %v629_v7 }
  0xea   :  { %990 = vmatmul.mubr.f32.gmra.mrb[12].mxu0 %v768_v9 }
  0xeb   :  { %3118 = vmatprep.mubr.msk.f32.mxu0 %vm834_vm6, %v629_v7 }
  0xec   :  { %v4190_v3 = vpop.permute.xlu1 %4189  ;;  %v4185_v2 = vpop.permute.xlu0 %4184 }
  0xed   :  { %v4187_v17 = vunpack.i.h.bf16 %v4185_v2  ;;  %v4186_v52 = vunpack.i.l.bf16 %v4185_v2  ;;  %v4191_v19 = vunpack.i.l.bf16 %v4190_v3  ;;  %v4192_v24 = vunpack.i.h.bf16 %v4190_v3 }
  0xee   :  { %996 = vmatmul.mubr.f32.gmra.mrb[14].mxu0 %v769_v18 }
  0xef   :  { %v695_v22 = vsel %vm686_vm7, %v4295_v21, %v4186_v52  ;;  %v696_v26 = vsel %vm686_vm7, %v4715_v32, %v4187_v17 }
  0xf0   :  { %v631_v23 = vpop.permute.xlu1 %630  ;;  %v4195_v1 = vpop.permute.xlu0 %4194  ;;  %v720_v29 = vsel %vm711_vm8, %v695_v22, %v4191_v19  ;;  %v721_v35 = vsel %vm711_vm8, %v696_v26, %v4192_v24 }
  0xf1   :  { %3119 = vmatprep.mubr.msk.f32.mxu0 %vm834_vm6, %v631_v23  ;;  %v4197_v0 = vunpack.i.h.bf16 %v4195_v1  ;;  %v4196_v27 = vunpack.i.l.bf16 %v4195_v1 }
  0xf3   :  { %v745_v34 = vsel %vm736_vm9, %v720_v29, %v4196_v27  ;;  %v746_v36 = vsel %vm736_vm9, %v721_v35, %v4197_v0 }
  0xf4   :  { %v4200_v31 = vpop.permute.xlu1 %4199  ;;  %v633_v8 = vpop.permute.xlu0 %632  ;;  %v770_v30 = vsel %vm761_vm10, %v745_v34, %v631_v23 }
  0xf5   :  { %1002 = vmatmul.mubr.f32.gmra.mrb[16].mxu0 %v770_v30  ;;  %v4202_v38 = vunpack.i.h.bf16 %v4200_v31  ;;  %v4201_v40 = vunpack.i.l.bf16 %v4200_v31  ;;  %v771_v47 = vsel %vm761_vm10, %v746_v36, %v633_v8 }
  0xf6   :  { %3120 = vmatprep.mubr.msk.f32.mxu0 %vm834_vm6, %v633_v8 }
  0xf7   :  { %v698_v39 = vsel %vm686_vm7, %v4740_v51, %v4202_v38  ;;  %v697_v56 = vsel %vm686_vm7, %v4296_v28, %v4201_v40 }
  0xf8   :  { %v4210_v32 = vpop.permute.xlu1 %4209  ;;  %v4205_v46 = vpop.permute.xlu0 %4204 }
  0xf9   :  { %v4211_v44 = vunpack.i.l.bf16 %v4210_v32  ;;  %v4207_v49 = vunpack.i.h.bf16 %v4205_v46  ;;  %v4206_v50 = vunpack.i.l.bf16 %v4205_v46  ;;  %1008 = vmatmul.mubr.f32.gmra.mrb[18].mxu0 %v771_v47  ;;  %v4212_v55 = vunpack.i.h.bf16 %v4210_v32 }
  0xfb   :  { %v722_v45 = vsel %vm711_vm8, %v697_v56, %v4206_v50  ;;  %v723_v48 = vsel %vm711_vm8, %v698_v39, %v4207_v49 }
  0xfc   :  { %v637_v57 = vpop.permute.xlu1 %636  ;;  %v635_v54 = vpop.permute.xlu0 %634  ;;  %v747_v58 = vsel %vm736_vm9, %v722_v45, %v4211_v44  ;;  %v748_v51 = vsel %vm736_vm9, %v723_v48, %v4212_v55 }
  0xfd   :  { %3121 = vmatprep.mubr.msk.f32.mxu0 %vm834_vm6, %v635_v54  ;;  %v772_v59 = vsel %vm761_vm10, %v747_v58, %v635_v54  ;;  %v773_v6 = vsel %vm761_vm10, %v748_v51, %v637_v57 }
  0xfe   :  { %1014 = vmatmul.mubr.f32.gmra.mrb[20].mxu0 %v772_v59 }
  0xff   :  { %3122 = vmatprep.mubr.msk.f32.mxu0 %vm834_vm6, %v637_v57 }
 0x100   :  { %v4220_v60 = vpop.permute.xlu1 %4219  ;;  %v4215_v61 = vpop.permute.xlu0 %4214 }
 0x101   :  { %v4217_v62 = vunpack.i.h.bf16 %v4215_v61  ;;  %v4216_v16 = vunpack.i.l.bf16 %v4215_v61  ;;  %v4221_v7 = vunpack.i.l.bf16 %v4220_v60  ;;  %v4222_v11 = vunpack.i.h.bf16 %v4220_v60 }
 0x102   :  { %1020 = vmatmul.mubr.f32.gmra.mrb[22].mxu0 %v773_v6 }
 0x103   :  { %v699_v5 = vsel %vm686_vm7, %v4792_v25, %v4216_v16  ;;  %v700_v9 = vsel %vm686_vm7, %v4806_v33, %v4217_v62 }
 0x104   :  { %v639_v10 = vpop.permute.xlu1 %638  ;;  %v4225_v14 = vpop.permute.xlu0 %4224  ;;  %v724_v2 = vsel %vm711_vm8, %v699_v5, %v4221_v7  ;;  %v725_v25 = vsel %vm711_vm8, %v700_v9, %v4222_v11  ;;  %v1422_v5 = vld [vmem:[#allocation4 + $0x128] sm:$0xff] }
 0x105   :  { %3123 = vmatprep.mubr.msk.f32.mxu0 %vm834_vm6, %v639_v10  ;;  %v4227_v15 = vunpack.i.h.bf16 %v4225_v14  ;;  %v4226_v3 = vunpack.i.l.bf16 %v4225_v14 }
 0x107   :  { %v749_v52 = vsel %vm736_vm9, %v724_v2, %v4226_v3  ;;  %v750_v21 = vsel %vm736_vm9, %v725_v25, %v4227_v15  ;;  %v1421_v15 = vld [vmem:[#allocation4 + $0x120] sm:$0xff]  ;;  %v1423_v3 = vld [vmem:[#allocation4 + $0x130] sm:$0xff] }
 0x108   :  { %v4230_v17 = vpop.permute.xlu1 %4229  ;;  %v641_v18 = vpop.permute.xlu0 %640  ;;  %v774_v19 = vsel %vm761_vm10, %v749_v52, %v639_v10  ;;  %v1424_v10 = vld [vmem:[#allocation4 + $0x138] sm:$0xff] }
 0x109   :  { %1026 = vmatmul.mubr.f32.gmra.mrb[24].mxu0 %v774_v19  ;;  %v4232_v22 = vunpack.i.h.bf16 %v4230_v17  ;;  %v4231_v23 = vunpack.i.l.bf16 %v4230_v17  ;;  %v775_v26 = vsel %vm761_vm10, %v750_v21, %v641_v18  ;;  %v3596_v9 = vpack.c.bf16 %v1424_v10, %v1422_v5 }
 0x10a   :  { %3124 = vmatprep.mubr.msk.f32.mxu0 %vm834_vm6, %v641_v18  ;;  %v3598_v18 = vpack.c.bf16 %v1423_v3, %v1421_v15  ;;  %v1442_v15 = vld [vmem:[#allocation4 + $0x1c8] sm:$0xff]  ;;  %v1444_v3 = vld [vmem:[#allocation4 + $0x1d8] sm:$0xff] }
 0x10b   :  { %v702_v29 = vsel %vm686_vm7, %v4875_v12, %v4232_v22  ;;  %v701_v31 = vsel %vm686_vm7, %v4818_v37, %v4231_v23  ;;  %3597 = vmatprep.subr.bf16.mxu1 %v3596_v9 }
 0x10c   :  { %v4240_v33 = vpop.permute.xlu1 %4239  ;;  %v4235_v1 = vpop.permute.xlu0 %4234  ;;  %3599 = vmatpush1.bf16.msra.mxu1 %v3598_v18  ;;  %v1443_v18 = vld [vmem:[#allocation4 + $0x1d0] sm:$0xff] }
 0x10d   :  { %v4241_v24 = vunpack.i.l.bf16 %v4240_v33  ;;  %v4237_v0 = vunpack.i.h.bf16 %v4235_v1  ;;  %v4236_v27 = vunpack.i.l.bf16 %v4235_v1  ;;  %1032 = vmatmul.mubr.f32.gmra.mrb[26].mxu0 %v775_v26  ;;  %v4242_v34 = vunpack.i.h.bf16 %v4240_v33  ;;  %v1426_v33 = vld [vmem:[#allocation4 + $0x148] sm:$0xff]  ;;  %v1427_v26 = vld [vmem:[#allocation4 + $0x150] sm:$0xff] }
 0x10f   :  { %v726_v30 = vsel %vm711_vm8, %v701_v31, %v4236_v27  ;;  %v727_v35 = vsel %vm711_vm8, %v702_v29, %v4237_v0 }
 0x110   :  { %v645_v8 = vpop.permute.xlu1 %644  ;;  %v643_v36 = vpop.permute.xlu0 %642  ;;  %v751_v38 = vsel %vm736_vm9, %v726_v30, %v4241_v24  ;;  %v752_v32 = vsel %vm736_vm9, %v727_v35, %v4242_v34  ;;  %v1428_v24 = vld [vmem:[#allocation4 + $0x158] sm:$0xff]  ;;  %v1430_v34 = vld [vmem:[#allocation4 + $0x168] sm:$0xff] }
 0x111   :  { %3125 = vmatprep.mubr.msk.f32.mxu0 %vm834_vm6, %v643_v36  ;;  %v776_v40 = vsel %vm761_vm10, %v751_v38, %v643_v36  ;;  %v777_v47 = vsel %vm761_vm10, %v752_v32, %v645_v8  ;;  %v3600_v1 = vpack.c.bf16 %v1428_v24, %v1426_v33  ;;  %v1431_v32 = vld [vmem:[#allocation4 + $0x170] sm:$0xff]  ;;  %v1448_v33 = vld [vmem:[#allocation4 + $0x1f8] sm:$0xff] }
 0x112   :  { %1038 = vmatmul.mubr.f32.gmra.mrb[28].mxu0 %v776_v40  ;;  %v1429_v40 = vld [vmem:[#allocation4 + $0x160] sm:$0xff] }
 0x113   :  { %3126 = vmatprep.mubr.msk.f32.mxu0 %vm834_vm6, %v645_v8  ;;  %3601 = vmatprep.subr.bf16.mxu1 %v3600_v1  ;;  %v1432_v8 = vld [vmem:[#allocation4 + $0x178] sm:$0xff]  ;;  %v1445_v1 = vld [vmem:[#allocation4 + $0x1e0] sm:$0xff] }
 0x114   :  { %v4250_v12 = vpop.permute.xlu1 %4249  ;;  %v4245_v37 = vpop.permute.xlu0 %4244  ;;  %v3604_v38 = vpack.c.bf16 %v1432_v8, %v1430_v34 }
 0x115   :  { %v4247_v44 = vunpack.i.h.bf16 %v4245_v37  ;;  %v4246_v46 = vunpack.i.l.bf16 %v4245_v37  ;;  %v4251_v49 = vunpack.i.l.bf16 %v4250_v12  ;;  %v4252_v28 = vunpack.i.h.bf16 %v4250_v12 }
 0x116   :  { %1044 = vmatmul.mubr.f32.gmra.mrb[30].mxu0 %v777_v47  ;;  %v3606_v37 = vpack.c.bf16 %v1431_v32, %v1429_v40  ;;  %v822_v32 = vld [vmem:[%s5930_s5] sm:$0x3] }
 0x117   :  { %v703_v50 = vsel %vm686_vm7, %v4880_v13, %v4246_v46  ;;  %v704_v55 = vsel %vm686_vm7, %v4950_v63, %v4247_v44 }
 0x118   :  { %v647_v39 = vpop.permute.xlu1 %646  ;;  %v4255_v56 = vpop.permute.xlu0 %4254  ;;  %v728_v48 = vsel %vm711_vm8, %v703_v50, %v4251_v49  ;;  %v729_v13 = vsel %vm711_vm8, %v704_v55, %v4252_v28  ;;  %v1434_v50 = vld [vmem:[#allocation4 + $0x188] sm:$0xff] }
 0x119   :  { %3127 = vmatprep.mubr.msk.f32.mxu0 %vm834_vm6, %v647_v39  ;;  %v4257_v57 = vunpack.i.h.bf16 %v4255_v56  ;;  %v4256_v45 = vunpack.i.l.bf16 %v4255_v56 }
 0x11b   :  { %v753_v58 = vsel %vm736_vm9, %v728_v48, %v4256_v45  ;;  %v754_v60 = vsel %vm736_vm9, %v729_v13, %v4257_v57  ;;  %v1433_v45 = vld [vmem:[#allocation4 + $0x180] sm:$0xff]  ;;  %v1435_v48 = vld [vmem:[#allocation4 + $0x190] sm:$0xff] }
 0x11c   :  { %v4260_v54 = vpop.permute.xlu1 %4259  ;;  %v649_v59 = vpop.permute.xlu0 %648  ;;  %v778_v51 = vsel %vm761_vm10, %v753_v58, %v647_v39  ;;  %v1436_v39 = vld [vmem:[#allocation4 + $0x198] sm:$0xff] }
 0x11d   :  { %1050 = vmatmul.mubr.f32.gmra.mrb[32].mxu0 %v778_v51  ;;  %v4262_v61 = vunpack.i.h.bf16 %v4260_v54  ;;  %v4261_v62 = vunpack.i.l.bf16 %v4260_v54  ;;  %v779_v7 = vsel %vm761_vm10, %v754_v60, %v649_v59  ;;  %v3608_v57 = vpack.c.bf16 %v1436_v39, %v1434_v50 }
 0x11e   :  { %3128 = vmatprep.mubr.msk.f32.mxu0 %vm834_vm6, %v649_v59 }
 0x11f   :  { %v706_v2 = vsel %vm686_vm7, %v5011_v42, %v4262_v61  ;;  %v705_v17 = vsel %vm686_vm7, %v5006_v41, %v4261_v62  ;;  %v1425_v41 = vld [vmem:[#allocation4 + $0x140] sm:$0xff]  ;;  %v1440_v62 = vld [vmem:[#allocation4 + $0x1b8] sm:$0xff] }
 0x120   :  { %v4270_v63 = vpop.permute.xlu1 %4269  ;;  %v4265_v6 = vpop.permute.xlu0 %4264  ;;  %v3602_v27 = vpack.c.bf16 %v1427_v26, %v1425_v41  ;;  %v1447_v41 = vld [vmem:[#allocation4 + $0x1f0] sm:$0xff] }
 0x121   :  { %v4271_v16 = vunpack.i.l.bf16 %v4270_v63  ;;  %v4267_v11 = vunpack.i.h.bf16 %v4265_v6  ;;  %v4266_v14 = vunpack.i.l.bf16 %v4265_v6  ;;  %1056 = vmatmul.mubr.f32.gmra.mrb[34].mxu0 %v779_v7  ;;  %v4272_v52 = vunpack.i.h.bf16 %v4270_v63  ;;  %v1437_v6 = vld [vmem:[#allocation4 + $0x1a0] sm:$0xff]  ;;  %v1439_v7 = vld [vmem:[#allocation4 + $0x1b0] sm:$0xff] }
 0x122   :  { %3603 = vmatpush1.bf16.msra.mxu1 %v3602_v27  ;;  %v3614_v10 = vpack.c.bf16 %v1439_v7, %v1437_v6  ;;  %v3622_v26 = vpack.c.bf16 %v1447_v41, %v1445_v1 }
 0x123   :  { %v730_v25 = vsel %vm711_vm8, %v705_v17, %v4266_v14  ;;  %v731_v21 = vsel %vm711_vm8, %v706_v2, %v4267_v11  ;;  %3605 = vmatprep.subr.bf16.mxu1 %v3604_v38  ;;  %v3616_v17 = vpack.c.bf16 %v1444_v3, %v1442_v15  ;;  %v824_v38 = vlaneseq }
 0x124   :  { %v653_v19 = vpop.permute.xlu1 %652  ;;  %v651_v22 = vpop.permute.xlu0 %650  ;;  %v755_v23 = vsel %vm736_vm9, %v730_v25, %v4271_v16  ;;  %v756_v0 = vsel %vm736_vm9, %v731_v21, %v4272_v52  ;;  %v1441_v52 = vld [vmem:[#allocation4 + $0x1c0] sm:$0xff] }
 0x125   :  { %3129 = vmatprep.mubr.msk.f32.mxu0 %vm834_vm6, %v651_v22  ;;  %v780_v42 = vsel %vm761_vm10, %v755_v23, %v651_v22  ;;  %v781_v36 = vsel %vm761_vm10, %v756_v0, %v653_v19  ;;  %v1446_v23 = vld [vmem:[#allocation4 + $0x1e8] sm:$0xff]  ;;  %v5288_v40 = vshrl.u32 %v824_v38, 7 }
 0x126   :  { %1062 = vmatmul.mubr.f32.gmra.mrb[36].mxu0 %v780_v42  ;;  %3607 = vmatpush1.bf16.msra.mxu1 %v3606_v37  ;;  %v3620_v42 = vpack.c.bf16 %v1448_v33, %v1446_v23 }
 0x127   :  { %3130 = vmatprep.mubr.msk.f32.mxu0 %vm834_vm6, %v653_v19  ;;  %3609 = vmatprep.subr.bf16.mxu1 %v3608_v57  ;;  %v3618_v19 = vpack.c.bf16 %v1443_v18, %v1441_v52 }
 0x128   :  { %v4280_v29 = vpop.permute.xlu1 %4279  ;;  %v4275_v31 = vpop.permute.xlu0 %4274 }
 0x129   :  { %v4277_v30 = vunpack.i.h.bf16 %v4275_v31  ;;  %v4276_v35 = vunpack.i.l.bf16 %v4275_v31  ;;  %v4281_v12 = vunpack.i.l.bf16 %v4280_v29  ;;  %v4282_v47 = vunpack.i.h.bf16 %v4280_v29 }
 0x12a   :  { %1068 = vmatmul.mubr.f32.gmra.mrb[38].mxu0 %v781_v36 }
 0x12b   :  { %v707_v44 = vsel %vm686_vm7, %v5016_v43, %v4276_v35  ;;  %v708_v28 = vsel %vm686_vm7, %v5064_v4, %v4277_v30  ;;  %v3610_v43 = vpack.c.bf16 %v1435_v48, %v1433_v45  ;;  %v1438_v4 = vld [vmem:[#allocation4 + $0x1a8] sm:$0xff]  ;;  %v1452_v35 = vld [vmem:[#allocation4 + $0x218] sm:$0xff] }
 0x12c   :  { %v655_v46 = vpop.permute.xlu1 %654  ;;  %v4285_v49 = vpop.permute.xlu0 %4284  ;;  %v732_v54 = vsel %vm711_vm8, %v707_v44, %v4281_v12  ;;  %v733_v61 = vsel %vm711_vm8, %v708_v28, %v4282_v47  ;;  %v3612_v16 = vpack.c.bf16 %v1440_v62, %v1438_v4  ;;  %v1450_v30 = vld [vmem:[#allocation4 + $0x208] sm:$0xff]  ;;  %v5297_v12 = vsub.s32 1, %v5288_v40 }
 0x12d   :  { %3131 = vmatprep.mubr.msk.f32.mxu0 %vm834_vm6, %v655_v46  ;;  %v4287_v56 = vunpack.i.h.bf16 %v4285_v49  ;;  %v4286_v55 = vunpack.i.l.bf16 %v4285_v49  ;;  %3611 = vmatpush1.bf16.msra.mxu1 %v3610_v43  ;;  %v3624_v36 = vpack.c.bf16 %v1452_v35, %v1450_v30  ;;  %v1453_v30 = vld [vmem:[#allocation4 + $0x220] sm:$0xff]  ;;  %v1455_v35 = vld [vmem:[#allocation4 + $0x230] sm:$0xff] }
 0x12e   :  { %3613 = vmatprep.subr.bf16.mxu1 %v3612_v16  ;;  %v5303_v44 = vrot.slane %v822_v32, %v5297_v12 }
 0x12f   :  { %v757_v59 = vsel %vm736_vm9, %v732_v54, %v4286_v55  ;;  %v758_v63 = vsel %vm736_vm9, %v733_v61, %v4287_v56 }
 0x130   :  { %v4290_v58 = vpop.permute.xlu1 %4289  ;;  %v657_v13 = vpop.permute.xlu0 %656  ;;  %v782_v60 = vsel %vm761_vm10, %v757_v59, %v655_v46 }
 0x131   :  { %v4291_v51 = vunpack.i.l.bf16 %v4290_v58  ;;  %1074 = vmatmul.mubr.f32.gmra.mrb[40].mxu0 %v782_v60  ;;  %v783_v9 = vsel %vm761_vm10, %v758_v63, %v657_v13  ;;  %3615 = vmatpush1.bf16.msra.mxu1 %v3614_v10  ;;  %v4292_v25 = vunpack.i.h.bf16 %v4290_v58 }
 0x132   :  { %3132 = vmatprep.mubr.msk.f32.mxu0 %vm834_vm6, %v657_v13  ;;  %3617 = vmatprep.subr.bf16.mxu1 %v3616_v17  ;;  %v1449_v17 = vld [vmem:[#allocation4 + $0x200] sm:$0xff] }
 0x133   :  { %v709_v5 = vsel %vm686_vm7, %v5069_v20, %v4291_v51  ;;  %v710_v0 = vsel %vm686_vm7, %v5093_v53, %v4292_v25  ;;  %v5291_v53 = vsub.s32 0, %v5288_v40 }
 0x134   :  { %v530_v11 = vpop.permute.xlu1 %529  ;;  %v401_v14 = vpop.permute.xlu0 %400 }
 0x135   :  { %v734_v2 = vsel %vm711_vm8, %v709_v5, %v401_v14  ;;  %1080 = vmatmul.mubr.f32.gmra.mrb[42].mxu0 %v783_v9  ;;  %3619 = vmatpush1.bf16.msra.mxu1 %v3618_v19  ;;  %v5300_v37 = vrot.slane %v822_v32, %v5291_v53 }
 0x136   :  { %v759_v22 = vsel %vm736_vm9, %v734_v2, %v530_v11  ;;  %3621 = vmatprep.subr.bf16.mxu1 %v3620_v42 }
 0x138   :  { %v403_v21 = vpop.permute.xlu1 %402  ;;  %v659_v20 = vpop.permute.xlu0 %658 }
 0x139   :  { %3133 = vmatprep.mubr.msk.f32.mxu0 %vm834_vm6, %v659_v20  ;;  %v784_v24 = vsel %vm761_vm10, %v759_v22, %v659_v20  ;;  %v735_v29 = vsel %vm711_vm8, %v710_v0, %v403_v21  ;;  %3623 = vmatpush1.bf16.msra.mxu1 %v3622_v26  ;;  %v1451_v21 = vld [vmem:[#allocation4 + $0x210] sm:$0xff]  ;;  %v1454_v20 = vld [vmem:[#allocation4 + $0x228] sm:$0xff]  ;;  %v1456_v22 = vld [vmem:[#allocation4 + $0x238] sm:$0xff] }
 0x13a   :  { %1086 = vmatmul.mubr.f32.gmra.mrb[44].mxu0 %v784_v24  ;;  %3625 = vmatprep.subr.bf16.mxu1 %v3624_v36 }
 0x13c   :  { %v661_v27 = vpop.permute.xlu1 %660  ;;  %v532_v31 = vpop.permute.xlu0 %531 }
 0x13d   :  { %3134 = vmatprep.mubr.msk.f32.mxu0 %vm834_vm6, %v661_v27  ;;  %v760_v34 = vsel %vm736_vm9, %v735_v29, %v532_v31  ;;  %v3626_v29 = vpack.c.bf16 %v1451_v21, %v1449_v17  ;;  %v3628_v31 = vpack.c.bf16 %v1456_v22, %v1454_v20 }
 0x13e   :  { %v785_v8 = vsel %vm761_vm10, %v760_v34, %v661_v27 }
 0x13f   :  { %1092 = vmatmul.mubr.f32.gmra.mrb[46].mxu0 %v785_v8 }
 0x1a1   :  { %v955_v46 = vpop.f32.mrb[0].mxu0 }
 0x1a2   :  { %v956_v47 = vadd.f32 %v955_v46, %v5300_v37  ;;  %v957_v49 = vpop.f32.mrb[1].mxu0 }
 0x1a3   :  { %v958_v50 = vadd.f32 %v957_v49, %v5303_v44  ;;  %v1458_v49 = vld [vmem:[#allocation4 + $0x248] sm:$0xff] }
 0x1a5   :  { %v1098_v39 = vmax.f32 %v956_v47, %v958_v50  ;;  %v961_v28 = vpop.f32.mrb[2].mxu0  ;;  %v1460_v50 = vld [vmem:[#allocation4 + $0x258] sm:$0xff] }
 0x1a6   :  { %v962_v56 = vadd.f32 %v961_v28, %v5300_v37  ;;  %v963_v55 = vpop.f32.mrb[3].mxu0  ;;  %v3630_v28 = vpack.c.bf16 %v1455_v35, %v1453_v30 }
 0x1a7   :  { %1122 = vst [vmem:[#allocation2] sm:$0xff] %v1098_v39  ;;  %v964_v57 = vadd.f32 %v963_v55, %v5303_v44 }
 0x1a9   :  { %v1099_v45 = vmax.f32 %v962_v56, %v964_v57  ;;  %v967_v48 = vpop.f32.mrb[4].mxu0  ;;  %v1457_v56 = vld [vmem:[#allocation4 + $0x240] sm:$0xff] }
 0x1aa   :  { %v968_v54 = vadd.f32 %v967_v48, %v5300_v37  ;;  %v969_v43 = vpop.f32.mrb[5].mxu0 }
 0x1ab   :  { %1123 = vst [vmem:[#allocation2 + $0x8] sm:$0xff] %v1099_v45  ;;  %v970_v58 = vadd.f32 %v969_v43, %v5303_v44  ;;  %v1459_v43 = vld [vmem:[#allocation4 + $0x250] sm:$0xff] }
 0x1ad   :  { %v1100_v59 = vmax.f32 %v968_v54, %v970_v58  ;;  %v973_v51 = vpop.f32.mrb[6].mxu0  ;;  %v3632_v54 = vpack.c.bf16 %v1460_v50, %v1458_v49  ;;  %v1469_v49 = vld [vmem:[#allocation4 + $0x2a0] sm:$0xff]  ;;  %v1471_v50 = vld [vmem:[#allocation4 + $0x2b0] sm:$0xff] }
 0x1ae   :  { %v974_v13 = vadd.f32 %v973_v51, %v5300_v37  ;;  %v975_v60 = vpop.f32.mrb[7].mxu0 }
 0x1af   :  { %1124 = vst [vmem:[#allocation2 + $0x10] sm:$0xff] %v1100_v59  ;;  %v976_v61 = vadd.f32 %v975_v60, %v5303_v44  ;;  %v1464_v60 = vld [vmem:[#allocation4 + $0x278] sm:$0xff] }
 0x1b1   :  { %v1101_v4 = vmax.f32 %v974_v13, %v976_v61  ;;  %v1462_v13 = vld [vmem:[#allocation4 + $0x268] sm:$0xff] }
 0x1b2   :  { %v1146_v62 = vld [vmem:[#allocation2] ss:$2 sm:$0xff]  ;;  %v1178_v63 = vld [vmem:[#allocation2 + $0x1] ss:$2 sm:$0xff] }
 0x1b3   :  { %1125 = vst [vmem:[#allocation2 + $0x18] sm:$0xff] %v1101_v4  ;;  %v1209_v16 = vmax.f32 %v1146_v62, %v1178_v63  ;;  %v1461_v4 = vld [vmem:[#allocation4 + $0x260] sm:$0xff]  ;;  %v3634_v63 = vpack.c.bf16 %v1459_v43, %v1457_v56  ;;  %v1474_v56 = vld [vmem:[#allocation4 + $0x2c8] sm:$0xff] }
 0x1b4   :  { %v979_v6 = vpop.f32.mrb[8].mxu0 }
 0x1b5   :  { %v980_v7 = vadd.f32 %v979_v6, %v5300_v37  ;;  %v981_v5 = vpop.f32.mrb[9].mxu0  ;;  %v1225_v10 = vmax.f32 %v1209_v16, 0.0  ;;  %v1463_v16 = vld [vmem:[#allocation4 + $0x270] sm:$0xff]  ;;  %v1466_v6 = vld [vmem:[#allocation4 + $0x288] sm:$0xff] }
 0x1b6   :  { %v982_v11 = vadd.f32 %v981_v5, %v5303_v44  ;;  %v1148_v14 = vld [vmem:[#allocation2 + $0x10] ss:$2 sm:$0xf]  ;;  %v1180_v9 = vld [vmem:[#allocation2 + $0x11] ss:$2 sm:$0xf] }
 0x1b7   :  { %v1210_v15 = vmax.f32 %v1148_v14, %v1180_v9  ;;  %v1257_v25 = vrot.slane %v1225_v10, 1  ;;  %v1321_v33 = vrot.slane %v1225_v10, 3  ;;  %v1289_v24 = vrot.slane %v1225_v10, 2 }
 0x1b8   :  { %v1102_v3 = vmax.f32 %v980_v7, %v982_v11  ;;  %v985_v2 = vpop.f32.mrb[10].mxu0  ;;  %v1353_v42 = vrot.slane %v1225_v10, 4  ;;  %v1468_v7 = vld [vmem:[#allocation4 + $0x298] sm:$0xff]  ;;  %v3636_v14 = vpack.c.bf16 %v1464_v60, %v1462_v13 }
 0x1b9   :  { %v986_v52 = vadd.f32 %v985_v2, %v5300_v37  ;;  %v987_v18 = vpop.f32.mrb[11].mxu0  ;;  %v1226_v19 = vmax.f32 %v1210_v15, 0.0  ;;  %v3638_v2 = vpack.c.bf16 %v1463_v16, %v1461_v4  ;;  %v3640_v17 = vpack.c.bf16 %v1468_v7, %v1466_v6  ;;  %v1478_v4 = vld [vmem:[#allocation4 + $0x2e8] sm:$0xff]  ;;  %v1477_v6 = vld [vmem:[#allocation4 + $0x2e0] sm:$0xff] }
 0x1ba   :  { %1126 = vst [vmem:[#allocation2 + $0x20] sm:$0xff] %v1102_v3  ;;  %v988_v23 = vadd.f32 %v987_v18, %v5303_v44  ;;  %v1467_v18 = vld [vmem:[#allocation4 + $0x290] sm:$0xff] }
 0x1bb   :  { %v1258_v1 = vrot.slane %v1226_v19, 1  ;;  %v1322_v41 = vrot.slane %v1226_v19, 3  ;;  %v1290_v26 = vrot.slane %v1226_v19, 2  ;;  %v1354_v0 = vrot.slane %v1226_v19, 4 }
 0x1bc   :  { %v1103_v27 = vmax.f32 %v986_v52, %v988_v23  ;;  %v1465_v52 = vld [vmem:[#allocation4 + $0x280] sm:$0xff] }
 0x1bd   :  { %v991_v34 = vpop.f32.mrb[12].mxu0  ;;  %v1259_v8 = vsel %vm170_vm1, %v1257_v25, %v1258_v1  ;;  %v5319_v36 = vsel %vm428_vm0, %v1321_v33, %v1322_v41  ;;  %v5322_v38 = vsel %vm299_vm3, %v1289_v24, %v1290_v26  ;;  %v5325_v32 = vsel %vm557_vm2, %v1353_v42, %v1354_v0  ;;  %v1470_v24 = vld [vmem:[#allocation4 + $0x2a8] sm:$0xff]  ;;  %v1472_v42 = vld [vmem:[#allocation4 + $0x2b8] sm:$0xff] }
 0x1be   :  { %1127 = vst [vmem:[#allocation2 + $0x28] sm:$0xff] %v1103_v27  ;;  %v992_v46 = vadd.f32 %v991_v34, %v5300_v37  ;;  %v993_v47 = vpop.f32.mrb[13].mxu0  ;;  %1621 = vmatprep.mubr.f32.mxu1 %v1259_v8  ;;  %v3642_v26 = vpack.c.bf16 %v1467_v18, %v1465_v52  ;;  %v1484_v52 = vld [vmem:[#allocation4 + $0x318] sm:$0xff] }
 0x1bf   :  { %v994_v39 = vadd.f32 %v993_v47, %v5303_v44  ;;  %1622 = vmatmul.mubr.f32.vlgmr.msra.gmra.mrb[0].mxu1 %v1225_v10  ;;  %v3644_v47 = vpack.c.bf16 %v1472_v42, %v1470_v24  ;;  %v1486_v24 = vld [vmem:[#allocation4 + $0x328] sm:$0xff]  ;;  %v1488_v42 = vld [vmem:[#allocation4 + $0x338] sm:$0xff] }
 0x1c0   :  { %3627 = vmatpush1.bf16.msra.mxu1 %v3626_v29 }
 0x1c1   :  { %v1104_v55 = vmax.f32 %v992_v46, %v994_v39  ;;  %v997_v57 = vpop.f32.mrb[14].mxu0  ;;  %v1150_v45 = vld [vmem:[#allocation2 + $0x18] ss:$2 sm:$0xff]  ;;  %v1182_v48 = vld [vmem:[#allocation2 + $0x19] ss:$2 sm:$0xff]  ;;  %3629 = vmatprep.subr.bf16.mxu1 %v3628_v31 }
 0x1c2   :  { %v998_v58 = vadd.f32 %v997_v57, %v5300_v37  ;;  %v999_v59 = vpop.f32.mrb[15].mxu0  ;;  %v1211_v51 = vmax.f32 %v1150_v45, %v1182_v48 }
 0x1c3   :  { %1128 = vst [vmem:[#allocation2 + $0x30] sm:$0xff] %v1104_v55  ;;  %v1000_v61 = vadd.f32 %v999_v59, %v5303_v44  ;;  %v1476_v55 = vld [vmem:[#allocation4 + $0x2d8] sm:$0xff]  ;;  %v1473_v59 = vld [vmem:[#allocation4 + $0x2c0] sm:$0xff] }
 0x1c4   :  { %v1227_v62 = vmax.f32 %v1211_v51, 0.0  ;;  %3631 = vmatpush1.bf16.msra.mxu1 %v3630_v28  ;;  %v1475_v51 = vld [vmem:[#allocation4 + $0x2d0] sm:$0xff] }
 0x1c5   :  { %v1105_v5 = vmax.f32 %v998_v58, %v1000_v61  ;;  %v1152_v10 = vld [vmem:[#allocation2 + $0x28] ss:$2 sm:$0xf]  ;;  %v1184_v11 = vld [vmem:[#allocation2 + $0x29] ss:$2 sm:$0xf]  ;;  %3633 = vmatprep.subr.bf16.mxu1 %v3632_v54  ;;  %v3646_v54 = vpack.c.bf16 %v1471_v50, %v1469_v49  ;;  %v3648_v58 = vpack.c.bf16 %v1476_v55, %v1474_v56  ;;  %v3650_v16 = vpack.c.bf16 %v1475_v51, %v1473_v59 }
 0x1c6   :  { %v1212_v9 = vmax.f32 %v1152_v10, %v1184_v11  ;;  %v1260_v21 = vrot.slane %v1227_v62, 1  ;;  %v1324_v20 = vrot.slane %v1227_v62, 3  ;;  %v1292_v22 = vrot.slane %v1227_v62, 2  ;;  %v1485_v56 = vld [vmem:[#allocation4 + $0x320] sm:$0xff]  ;;  %v1487_v55 = vld [vmem:[#allocation4 + $0x330] sm:$0xff]  ;;  %v1492_v59 = vld [vmem:[#allocation4 + $0x358] sm:$0xff] }
 0x1c7   :  { %1129 = vst [vmem:[#allocation2 + $0x38] sm:$0xff] %v1105_v5  ;;  %v1356_v0 = vrot.slane %v1227_v62, 4 }
 0x1c8   :  { %v1003_v15 = vpop.f32.mrb[16].mxu0  ;;  %v1228_v3 = vmax.f32 %v1212_v9, 0.0  ;;  %3635 = vmatpush1.bf16.msra.mxu1 %v3634_v63  ;;  %v1480_v63 = vld [vmem:[#allocation4 + $0x2f8] sm:$0xff]  ;;  %v1482_v9 = vld [vmem:[#allocation4 + $0x308] sm:$0xff] }
 0x1c9   :  { %v1004_v19 = vadd.f32 %v1003_v15, %v5300_v37  ;;  %v1005_v25 = vpop.f32.mrb[17].mxu0  ;;  %3637 = vmatprep.subr.bf16.mxu1 %v3636_v14  ;;  %v3652_v11 = vpack.c.bf16 %v1480_v63, %v1478_v4  ;;  %v1479_v14 = vld [vmem:[#allocation4 + $0x2f0] sm:$0xff]  ;;  %v3662_v4 = vpack.c.bf16 %v1487_v55, %v1485_v56  ;;  %v1489_v63 = vld [vmem:[#allocation4 + $0x340] sm:$0xff] }
 0x1ca   :  { %v1006_v23 = vadd.f32 %v1005_v25, %v5303_v44  ;;  %v1261_v33 = vrot.slane %v1228_v3, 1  ;;  %v1325_v1 = vrot.slane %v1228_v3, 3  ;;  %v1293_v41 = vrot.slane %v1228_v3, 2  ;;  %v2087_v56 = vld [vmem:[#allocation7] sm:$0xff] }
 0x1cb   :  { %v1357_v27 = vrot.slane %v1228_v3, 4  ;;  %v3654_v25 = vpack.c.bf16 %v1479_v14, %v1477_v6 }
 0x1cc   :  { %v1106_v29 = vmax.f32 %v1004_v19, %v1006_v23  ;;  %v1009_v31 = vpop.f32.mrb[18].mxu0  ;;  %v1262_v34 = vsel %vm170_vm1, %v1260_v21, %v1261_v33  ;;  %3639 = vmatpush1.bf16.msra.mxu1 %v3638_v2  ;;  %v5335_v8 = vsel %vm428_vm0, %v1324_v20, %v1325_v1  ;;  %v5338_v30 = vsel %vm299_vm3, %v1292_v22, %v1293_v41  ;;  %v1481_v21 = vld [vmem:[#allocation4 + $0x300] sm:$0xff]  ;;  %v1483_v33 = vld [vmem:[#allocation4 + $0x310] sm:$0xff] }
 0x1cd   :  { %v1010_v35 = vadd.f32 %v1009_v31, %v5300_v37  ;;  %v1011_v46 = vpop.f32.mrb[19].mxu0  ;;  %1627 = vmatprep.mubr.f32.mxu1 %v1262_v34  ;;  %3641 = vmatprep.subr.bf16.mxu1 %v3640_v17  ;;  %v5342_v39 = vsel %vm557_vm2, %v1356_v0, %v1357_v27  ;;  %v3656_v23 = vpack.c.bf16 %v1484_v52, %v1482_v9  ;;  %v1493_v52 = vld [vmem:[#allocation4 + $0x360] sm:$0xff] }
 0x1ce   :  { %1130 = vst [vmem:[#allocation2 + $0x40] sm:$0xff] %v1106_v29  ;;  %v1012_v28 = vadd.f32 %v1011_v46, %v5303_v44  ;;  %1628 = vmatmul.mubr.f32.gmra.mrb[2].mxu1 %v1227_v62  ;;  %v1154_v57 = vld [vmem:[#allocation2 + $0x30] ss:$2 sm:$0xff]  ;;  %v1186_v45 = vld [vmem:[#allocation2 + $0x31] ss:$2 sm:$0xff]  ;;  %v3660_v46 = vpack.c.bf16 %v1488_v42, %v1486_v24 }
 0x1cf   :  { %v1213_v61 = vmax.f32 %v1154_v57, %v1186_v45  ;;  %v1490_v57 = vld [vmem:[#allocation4 + $0x348] sm:$0xff] }
 0x1d0   :  { %v1107_v48 = vmax.f32 %v1010_v35, %v1012_v28  ;;  %3643 = vmatpush1.bf16.msra.mxu1 %v3642_v26  ;;  %v3658_v35 = vpack.c.bf16 %v1483_v33, %v1481_v21  ;;  %v1495_v21 = vld [vmem:[#allocation4 + $0x370] sm:$0xff] }
 0x1d1   :  { %v1015_v43 = vpop.f32.mrb[20].mxu0  ;;  %3645 = vmatprep.subr.bf16.mxu1 %v3644_v47  ;;  %v1229_v17 = vmax.f32 %v1213_v61, 0.0 }
 0x1d2   :  { %1131 = vst [vmem:[#allocation2 + $0x48] sm:$0xff] %v1107_v48  ;;  %v1016_v13 = vadd.f32 %v1015_v43, %v5300_v37  ;;  %v1017_v60 = vpop.f32.mrb[21].mxu0 }
 0x1d3   :  { %v1018_v62 = vadd.f32 %v1017_v60, %v5303_v44  ;;  %v1263_v1 = vrot.slane %v1229_v17, 1  ;;  %v1327_v41 = vrot.slane %v1229_v17, 3  ;;  %v1295_v26 = vrot.slane %v1229_v17, 2 }
 0x1d4   :  { %3647 = vmatpush1.bf16.msra.mxu1 %v3646_v54  ;;  %v1359_v47 = vrot.slane %v1229_v17, 4 }
 0x1d5   :  { %v1108_v7 = vmax.f32 %v1016_v13, %v1018_v62  ;;  %v1021_v5 = vpop.f32.mrb[22].mxu0  ;;  %v1156_v10 = vld [vmem:[#allocation2 + $0x40] ss:$2 sm:$0xf]  ;;  %3649 = vmatprep.subr.bf16.mxu1 %v3648_v58 }
 0x1d6   :  { %v1022_v15 = vadd.f32 %v1021_v5, %v5300_v37  ;;  %v1023_v3 = vpop.f32.mrb[23].mxu0  ;;  %v1188_v2 = vld [vmem:[#allocation2 + $0x41] ss:$2 sm:$0xf]  ;;  %v1491_v5 = vld [vmem:[#allocation4 + $0x350] sm:$0xff] }
 0x1d7   :  { %1132 = vst [vmem:[#allocation2 + $0x50] sm:$0xff] %v1108_v7  ;;  %v1024_v18 = vadd.f32 %v1023_v3, %v5303_v44  ;;  %v1214_v19 = vmax.f32 %v1156_v10, %v1188_v2  ;;  %v3664_v7 = vpack.c.bf16 %v1492_v59, %v1490_v57  ;;  %v1494_v10 = vld [vmem:[#allocation4 + $0x368] sm:$0xff] }
 0x1d8   :  { %3651 = vmatpush1.bf16.msra.mxu1 %v3650_v16  ;;  %v2088_v59 = vld [vmem:[#allocation7 + $0x8] sm:$0xff] }
 0x1d9   :  { %v1109_v20 = vmax.f32 %v1022_v15, %v1024_v18  ;;  %v1230_v22 = vmax.f32 %v1214_v19, 0.0  ;;  %3653 = vmatprep.subr.bf16.mxu1 %v3652_v11  ;;  %v1496_v11 = vld [vmem:[#allocation4 + $0x378] sm:$0xff] }
 0x1db   :  { %1133 = vst [vmem:[#allocation2 + $0x58] sm:$0xff] %v1109_v20  ;;  %v1264_v0 = vrot.slane %v1230_v22, 1  ;;  %v1328_v27 = vrot.slane %v1230_v22, 3  ;;  %v1296_v29 = vrot.slane %v1230_v22, 2  ;;  %v1360_v31 = vrot.slane %v1230_v22, 4  ;;  %v1498_v20 = vld [vmem:[#allocation4 + $0x388] sm:$0xff] }
 0x1dc   :  { %v1027_v34 = vpop.f32.mrb[24].mxu0  ;;  %3655 = vmatpush1.bf16.msra.mxu1 %v3654_v25  ;;  %v3668_v25 = vpack.c.bf16 %v1496_v11, %v1494_v10  ;;  %v1500_v22 = vld [vmem:[#allocation4 + $0x398] sm:$0xff] }
 0x1dd   :  { %v1028_v49 = vadd.f32 %v1027_v34, %v5300_v37  ;;  %v1029_v50 = vpop.f32.mrb[25].mxu0  ;;  %v1265_v28 = vsel %vm170_vm1, %v1263_v1, %v1264_v0  ;;  %3657 = vmatprep.subr.bf16.mxu1 %v3656_v23  ;;  %v5352_v45 = vsel %vm428_vm0, %v1327_v41, %v1328_v27  ;;  %v5355_v48 = vsel %vm299_vm3, %v1295_v26, %v1296_v29  ;;  %v1497_v0 = vld [vmem:[#allocation4 + $0x380] sm:$0xff]  ;;  %v1499_v27 = vld [vmem:[#allocation4 + $0x390] sm:$0xff]  ;;  %v2090_v10 = vld [vmem:[#allocation7 + $0x18] sm:$0xff] }
 0x1de   :  { %v1030_v54 = vadd.f32 %v1029_v50, %v5303_v44  ;;  %1633 = vmatprep.mubr.f32.mxu1 %v1265_v28  ;;  %v1158_v43 = vld [vmem:[#allocation2 + $0x48] ss:$2 sm:$0xff]  ;;  %v1190_v58 = vld [vmem:[#allocation2 + $0x49] ss:$2 sm:$0xff]  ;;  %v5359_v51 = vsel %vm557_vm2, %v1359_v47, %v1360_v31  ;;  %v3670_v34 = vpack.c.bf16 %v1495_v21, %v1493_v52  ;;  %v2103_v50 = vld [vmem:[#allocation7 + $0x80] sm:$0xff] }
 0x1df   :  { %1634 = vmatmul.mubr.f32.gmra.mrb[4].mxu1 %v1229_v17  ;;  %v1215_v13 = vmax.f32 %v1158_v43, %v1190_v58  ;;  %v3666_v17 = vpack.c.bf16 %v1491_v5, %v1489_v63  ;;  %v2104_v28 = vld [vmem:[#allocation7 + $0x88] sm:$0xff]  ;;  %v1504_v63 = vld [vmem:[#allocation4 + $0x3b8] sm:$0xff]  ;;  %v2089_v5 = vld [vmem:[#allocation7 + $0x10] sm:$0xff] }
 0x1e0   :  { %v1110_v60 = vmax.f32 %v1028_v49, %v1030_v54  ;;  %v1033_v61 = vpop.f32.mrb[26].mxu0  ;;  %3659 = vmatpush1.bf16.msra.mxu1 %v3658_v35  ;;  %v3672_v35 = vpack.c.bf16 %v1500_v22, %v1498_v20  ;;  %v1506_v21 = vld [vmem:[#allocation4 + $0x3c8] sm:$0xff]  ;;  %v1508_v22 = vld [vmem:[#allocation4 + $0x3d8] sm:$0xff] }
 0x1e1   :  { %v1034_v62 = vadd.f32 %v1033_v61, %v5300_v37  ;;  %v1035_v16 = vpop.f32.mrb[27].mxu0  ;;  %v5362_v6 = vmax.f32 %v1215_v13, 0.0  ;;  %3661 = vmatprep.subr.bf16.mxu1 %v3660_v46  ;;  %v5370_v46 = vld [vmem:[#allocation4 + $0x3a8] sm:$0xff]  ;;  %v2105_v13 = vld [vmem:[#allocation7 + $0x90] sm:$0xff] }
 0x1e2   :  { %1134 = vst [vmem:[#allocation2 + $0x60] sm:$0xff] %v1110_v60  ;;  %v1036_v14 = vadd.f32 %v1035_v16, %v5303_v44  ;;  %v1160_v9 = vld [vmem:[#allocation2 + $0x58] ss:$2 sm:$0xf]  ;;  %v5384_v16 = vpack.c.bf16 %v2104_v28, %v2103_v50 }
 0x1e3   :  { %v1192_v15 = vld [vmem:[#allocation2 + $0x59] ss:$2 sm:$0xf]  ;;  %v1266_v24 = vrot.slane %v5362_v6, 1  ;;  %v1330_v42 = vrot.slane %v5362_v6, 3  ;;  %v1298_v1 = vrot.slane %v5362_v6, 2 }
 0x1e4   :  { %v1216_v3 = vmax.f32 %v1160_v9, %v1192_v15  ;;  %v1111_v2 = vmax.f32 %v1034_v62, %v1036_v14  ;;  %3663 = vmatpush1.bf16.msra.mxu1 %v3662_v4  ;;  %v1362_v47 = vrot.slane %v5362_v6, 4  ;;  %v2106_v60 = vld [vmem:[#allocation7 + $0x98] sm:$0xff]  ;;  %v2107_v9 = vld [vmem:[#allocation7 + $0xa0] sm:$0xff]  ;;  %v2108_v15 = vld [vmem:[#allocation7 + $0xa8] sm:$0xff]  ;;  %3721 = vmatprep.subr.bf16.mxu0 %v5384_v16 }
 0x1e5   :  { %v1039_v18 = vpop.f32.mrb[28].mxu0  ;;  %3665 = vmatprep.subr.bf16.mxu1 %v3664_v7  ;;  %v5386_v7 = vpack.c.bf16 %v2088_v59, %v2087_v56  ;;  %v5390_v14 = vpack.c.bf16 %v2106_v60, %v2105_v13  ;;  %v2094_v28 = vld [vmem:[#allocation7 + $0x38] sm:$0xff]  ;;  %v2111_v56 = vld [vmem:[#allocation7 + $0xc0] sm:$0xff] }
 0x1e6   :  { %v1232_v19 = vmax.f32 %v1216_v3, 0.0  ;;  %1135 = vst [vmem:[#allocation2 + $0x68] sm:$0xff] %v1111_v2  ;;  %v1040_v23 = vadd.f32 %v1039_v18, %v5300_v37  ;;  %v1041_v33 = vpop.f32.mrb[29].mxu0  ;;  %v3674_v3 = vpack.c.bf16 %v1499_v27, %v1497_v0  ;;  %v1501_v2 = vld [vmem:[#allocation4 + $0x3a0] sm:$0xff] }
 0x1e7   :  { %v1042_v41 = vadd.f32 %v1041_v33, %v5303_v44  ;;  %3723 = vmatpush3.bf16.msra.mxu0 %v5386_v7  ;;  %v2091_v33 = vld [vmem:[#allocation7 + $0x20] sm:$0xff] }
 0x1e8   :  { %v1267_v26 = vrot.slane %v1232_v19, 1  ;;  %v1331_v29 = vrot.slane %v1232_v19, 3  ;;  %v1299_v31 = vrot.slane %v1232_v19, 2  ;;  %3667 = vmatpush1.bf16.msra.mxu1 %v3666_v17  ;;  %v1363_v49 = vrot.slane %v1232_v19, 4  ;;  %v1503_v17 = vld [vmem:[#allocation4 + $0x3b0] sm:$0xff]  ;;  %3725 = vmatprep.subr.bf16.mxu0 %v5390_v14 }
 0x1e9   :  { %v1112_v55 = vmax.f32 %v1040_v23, %v1042_v41  ;;  %v1045_v57 = vpop.f32.mrb[30].mxu0  ;;  %3669 = vmatprep.subr.bf16.mxu1 %v3668_v25  ;;  %v3676_v25 = vpack.c.bf16 %v1504_v63, %v5370_v46  ;;  %v5398_v23 = vpack.c.bf16 %v2108_v15, %v2107_v9  ;;  %v2109_v41 = vld [vmem:[#allocation7 + $0xb0] sm:$0xff]  ;;  %v3678_v27 = vpack.c.bf16 %v1503_v17, %v1501_v2 }
 0x1ea   :  { %v1268_v54 = vsel %vm170_vm1, %v1266_v24, %v1267_v26  ;;  %v5375_v43 = vsel %vm428_vm0, %v1330_v42, %v1331_v29  ;;  %v5378_v58 = vsel %vm299_vm3, %v1298_v1, %v1299_v31  ;;  %v1046_v61 = vadd.f32 %v1045_v57, %v5300_v37  ;;  %v1047_v4 = vpop.f32.mrb[31].mxu0  ;;  %v2092_v24 = vld [vmem:[#allocation7 + $0x28] sm:$0xff]  ;;  %v1505_v42 = vld [vmem:[#allocation4 + $0x3c0] sm:$0xff]  ;;  %v1507_v1 = vld [vmem:[#allocation4 + $0x3d0] sm:$0xff] }
 0x1eb   :  { %1639 = vmatprep.mubr.f32.mxu1 %v1268_v54  ;;  %v5382_v62 = vsel %vm557_vm2, %v1362_v47, %v1363_v49  ;;  %1136 = vst [vmem:[#allocation2 + $0x70] sm:$0xff] %v1112_v55  ;;  %v1048_v11 = vadd.f32 %v1047_v4, %v5303_v44  ;;  %v2110_v26 = vld [vmem:[#allocation7 + $0xb8] sm:$0xff]  ;;  %v1510_v29 = vld [vmem:[#allocation4 + $0x3e8] sm:$0xff]  ;;  %v3680_v49 = vpack.c.bf16 %v1508_v22, %v1506_v21  ;;  %v1511_v17 = vld [vmem:[#allocation4 + $0x3f0] sm:$0xff] }
 0x1ec   :  { %1640 = vmatmul.mubr.f32.gmra.mrb[6].mxu1 %v5362_v6  ;;  %v5395_v6 = vpack.c.bf16 %v2090_v10, %v2089_v5  ;;  %v1512_v31 = vld [vmem:[#allocation4 + $0x3f8] sm:$0xff]  ;;  %v5402_v50 = vpack.c.bf16 %v2092_v24, %v2091_v33  ;;  %v2112_v55 = vld [vmem:[#allocation7 + $0xc8] sm:$0xff]  ;;  %v5406_v13 = vpack.c.bf16 %v2110_v26, %v2109_v41  ;;  %v3682_v63 = vpack.c.bf16 %v1507_v1, %v1505_v42  ;;  %v1509_v10 = vld [vmem:[#allocation4 + $0x3e0] sm:$0xff] }
 0x1ed   :  { %3671 = vmatpush1.bf16.msra.mxu1 %v3670_v34  ;;  %v1113_v52 = vmax.f32 %v1046_v61, %v1048_v11  ;;  %v1162_v18 = vld [vmem:[#allocation2 + $0x60] ss:$2 sm:$0xff]  ;;  %v1194_v19 = vld [vmem:[#allocation2 + $0x61] ss:$2 sm:$0xff]  ;;  %v2093_v34 = vld [vmem:[#allocation7 + $0x30] sm:$0xff]  ;;  %v3684_v5 = vpack.c.bf16 %v1512_v31, %v1510_v29 }
 0x1ee   :  { %3673 = vmatprep.subr.bf16.mxu1 %v3672_v35  ;;  %v1217_v20 = vmax.f32 %v1162_v18, %v1194_v19  ;;  %3727 = vmatpush3.bf16.msra.mxu0 %v5395_v6  ;;  %v5408_v11 = vpack.c.bf16 %v2094_v28, %v2093_v34  ;;  %v1516_v18 = vld [vmem:[#allocation4 + $0x418] sm:$0xff]  ;;  %v5412_v19 = vpack.c.bf16 %v2112_v55, %v2111_v56  ;;  %v2095_v41 = vld [vmem:[#allocation7 + $0x40] sm:$0xff]  ;;  %v2096_v26 = vld [vmem:[#allocation7 + $0x48] sm:$0xff] }
 0x1ef   :  { %1137 = vst [vmem:[#allocation2 + $0x78] sm:$0xff] %v1113_v52  ;;  %3729 = vmatprep.subr.bf16.mxu0 %v5398_v23  ;;  %v1514_v52 = vld [vmem:[#allocation4 + $0x408] sm:$0xff]  ;;  %v2113_v31 = vld [vmem:[#allocation7 + $0xd0] sm:$0xff]  ;;  %v2114_v34 = vld [vmem:[#allocation7 + $0xd8] sm:$0xff] }
 0x1f0   :  { %v1051_v0 = vpop.f32.mrb[32].mxu0  ;;  %v1233_v47 = vmax.f32 %v1217_v20, 0.0  ;;  %v3688_v29 = vpack.c.bf16 %v1516_v18, %v1514_v52 }
 0x1f1   :  { %3675 = vmatpush1.bf16.msra.mxu1 %v3674_v3  ;;  %v1052_v35 = vadd.f32 %v1051_v0, %v5300_v37  ;;  %v1053_v46 = vpop.f32.mrb[33].mxu0 }
 0x1f2   :  { %3677 = vmatprep.subr.bf16.mxu1 %v3676_v25  ;;  %v1054_v57 = vadd.f32 %v1053_v46, %v5303_v44  ;;  %v1164_v54 = vld [vmem:[#allocation2 + $0x70] ss:$2 sm:$0xf]  ;;  %v1196_v59 = vld [vmem:[#allocation2 + $0x71] ss:$2 sm:$0xf]  ;;  %3731 = vmatpush3.bf16.msra.mxu0 %v5402_v50 }
 0x1f3   :  { %v1218_v60 = vmax.f32 %v1164_v54, %v1196_v59  ;;  %v1269_v2 = vrot.slane %v1233_v47, 1  ;;  %v1333_v21 = vrot.slane %v1233_v47, 3  ;;  %v1301_v20 = vrot.slane %v1233_v47, 2  ;;  %3733 = vmatprep.subr.bf16.mxu0 %v5406_v13 }
 0x1f4   :  { %v1114_v61 = vmax.f32 %v1052_v35, %v1054_v57  ;;  %v1057_v4 = vpop.f32.mrb[34].mxu0  ;;  %v1365_v22 = vrot.slane %v1233_v47, 4  ;;  %v5428_v54 = vpack.c.bf16 %v2096_v26, %v2095_v41 }
 0x1f5   :  { %3679 = vmatpush1.bf16.msra.mxu1 %v3678_v27  ;;  %v1058_v9 = vadd.f32 %v1057_v4, %v5300_v37  ;;  %v1059_v15 = vpop.f32.mrb[35].mxu0  ;;  %v1234_v3 = vmax.f32 %v1218_v60, 0.0  ;;  %v3686_v27 = vpack.c.bf16 %v1511_v17, %v1509_v10  ;;  %v5432_v60 = vpack.c.bf16 %v2114_v34, %v2113_v31  ;;  %v2098_v4 = vld [vmem:[#allocation7 + $0x58] sm:$0xff] }
 0x1f6   :  { %3681 = vmatprep.subr.bf16.mxu1 %v3680_v49  ;;  %1138 = vst [vmem:[#allocation2 + $0x80] sm:$0xff] %v1114_v61  ;;  %v1060_v25 = vadd.f32 %v1059_v15, %v5303_v44  ;;  %3735 = vmatpush3.bf16.msra.mxu0 %v5408_v11  ;;  %v2097_v61 = vld [vmem:[#allocation7 + $0x50] sm:$0xff] }
 0x1f7   :  { %v1270_v33 = vrot.slane %v1234_v3, 1  ;;  %v1334_v24 = vrot.slane %v1234_v3, 3  ;;  %v1302_v42 = vrot.slane %v1234_v3, 2  ;;  %v1366_v1 = vrot.slane %v1234_v3, 4  ;;  %3737 = vmatprep.subr.bf16.mxu0 %v5412_v19 }
 0x1f8   :  { %v1115_v0 = vmax.f32 %v1058_v9, %v1060_v25  ;;  %v5436_v17 = vpack.c.bf16 %v2098_v4, %v2097_v61 }
 0x1f9   :  { %3683 = vmatpush1.bf16.msra.mxu1 %v3682_v63  ;;  %v1063_v35 = vpop.f32.mrb[36].mxu0  ;;  %v1271_v46 = vsel %vm170_vm1, %v1269_v2, %v1270_v33  ;;  %v5418_v49 = vsel %vm428_vm0, %v1333_v21, %v1334_v24  ;;  %v5421_v28 = vsel %vm299_vm3, %v1301_v20, %v1302_v42  ;;  %v5424_v56 = vsel %vm557_vm2, %v1365_v22, %v1366_v1 }
 0x1fa   :  { %3685 = vmatprep.subr.bf16.mxu1 %v3684_v5  ;;  %1139 = vst [vmem:[#allocation2 + $0x88] sm:$0xff] %v1115_v0  ;;  %v1064_v55 = vadd.f32 %v1063_v35, %v5300_v37  ;;  %v1065_v57 = vpop.f32.mrb[37].mxu0  ;;  %1645 = vmatprep.mubr.f32.mxu1 %v1271_v46 }
 0x1fb   :  { %v1066_v59 = vadd.f32 %v1065_v57, %v5303_v44  ;;  %1646 = vmatmul.mubr.f32.gmra.mrb[8].mxu1 %v1233_v47  ;;  %3739 = vmatpush3.bf16.msra.mxu0 %v5428_v54 }
 0x1fc   :  { %3741 = vmatprep.subr.bf16.mxu0 %v5432_v60 }
 0x1fd   :  { %3687 = vmatpush1.bf16.msra.mxu1 %v3686_v27  ;;  %v1116_v63 = vmax.f32 %v1064_v55, %v1066_v59  ;;  %v1069_v5 = vpop.f32.mrb[38].mxu0  ;;  %v1166_v10 = vld [vmem:[#allocation2 + $0x78] ss:$2 sm:$0xff]  ;;  %v1198_v9 = vld [vmem:[#allocation2 + $0x79] ss:$2 sm:$0xff] }
 0x1fe   :  { %3689 = vmatprep.subr.bf16.mxu1 %v3688_v29  ;;  %v1070_v15 = vadd.f32 %v1069_v5, %v5300_v37  ;;  %v1071_v3 = vpop.f32.mrb[39].mxu0  ;;  %v1219_v2 = vmax.f32 %v1166_v10, %v1198_v9 }
 0x1ff   :  { %1140 = vst [vmem:[#allocation2 + $0x90] sm:$0xff] %v1116_v63  ;;  %v1072_v47 = vadd.f32 %v1071_v3, %v5303_v44  ;;  %3743 = vmatpush3.bf16.msra.mxu0 %v5436_v17 }
 0x200   :  { %v5440_v20 = vmax.f32 %v1219_v2, 0.0 }
 0x201   :  { %v1117_v52 = vmax.f32 %v1070_v15, %v1072_v47  ;;  %v1168_v18 = vld [vmem:[#allocation2 + $0x88] ss:$2 sm:$0xf]  ;;  %v1200_v25 = vld [vmem:[#allocation2 + $0x89] ss:$2 sm:$0xf] }
 0x202   :  { %v1220_v21 = vmax.f32 %v1168_v18, %v1200_v25  ;;  %v1272_v41 = vrot.slane %v5440_v20, 1  ;;  %v1368_v0 = vrot.slane %v5440_v20, 4 }
 0x203   :  { %1141 = vst [vmem:[#allocation2 + $0x98] sm:$0xff] %v1117_v52 }
 0x204   :  { %v1075_v22 = vpop.f32.mrb[40].mxu0  ;;  %v5443_v33 = vmax.f32 %v1220_v21, 0.0 }
 0x205   :  { %v1076_v24 = vadd.f32 %v1075_v22, %v5300_v37  ;;  %v1077_v42 = vpop.f32.mrb[41].mxu0 }
 0x206   :  { %v1078_v1 = vadd.f32 %v1077_v42, %v5303_v44  ;;  %v1273_v26 = vrot.slane %v5443_v33, 1  ;;  %v1369_v27 = vrot.slane %v5443_v33, 4 }
 0x208   :  { %v1118_v29 = vmax.f32 %v1076_v24, %v1078_v1  ;;  %v1081_v31 = vpop.f32.mrb[42].mxu0  ;;  %v1274_v34 = vsel %vm170_vm1, %v1272_v41, %v1273_v26  ;;  %v5454_v55 = vsel %vm557_vm2, %v1368_v0, %v1369_v27 }
 0x209   :  { %v1082_v35 = vadd.f32 %v1081_v31, %v5300_v37  ;;  %v1083_v46 = vpop.f32.mrb[43].mxu0  ;;  %1651 = vmatprep.mubr.f32.mxu1 %v1274_v34 }
 0x20a   :  { %1142 = vst [vmem:[#allocation2 + $0xa0] sm:$0xff] %v1118_v29  ;;  %v1084_v57 = vadd.f32 %v1083_v46, %v5303_v44  ;;  %1652 = vmatmul.mubr.f32.gmra.mrb[10].mxu1 %v5440_v20  ;;  %v1170_v59 = vld [vmem:[#allocation2 + $0x90] ss:$2 sm:$0xff]  ;;  %v1202_v61 = vld [vmem:[#allocation2 + $0x91] ss:$2 sm:$0xff] }
 0x20b   :  { %v1221_v9 = vmax.f32 %v1170_v59, %v1202_v61 }
 0x20c   :  { %v1119_v4 = vmax.f32 %v1082_v35, %v1084_v57 }
 0x20d   :  { %v1087_v63 = vpop.f32.mrb[44].mxu0  ;;  %v5460_v25 = vmax.f32 %v1221_v9, 0.0 }
 0x20e   :  { %1143 = vst [vmem:[#allocation2 + $0xa8] sm:$0xff] %v1119_v4  ;;  %v1088_v5 = vadd.f32 %v1087_v63, %v5300_v37  ;;  %v1089_v10 = vpop.f32.mrb[45].mxu0 }
 0x20f   :  { %v1090_v15 = vadd.f32 %v1089_v10, %v5303_v44  ;;  %v1275_v41 = vrot.slane %v5460_v25, 1  ;;  %v1371_v0 = vrot.slane %v5460_v25, 4 }
 0x211   :  { %v1120_v3 = vmax.f32 %v1088_v5, %v1090_v15  ;;  %v1172_v2 = vld [vmem:[#allocation2 + $0xa0] ss:$2 sm:$0xf]  ;;  %v1204_v47 = vld [vmem:[#allocation2 + $0xa1] ss:$2 sm:$0xf] }
 0x212   :  { %v1093_v52 = vpop.f32.mrb[46].mxu0  ;;  %v1222_v18 = vmax.f32 %v1172_v2, %v1204_v47  ;;  %v1513_v15 = vld [vmem:[#allocation4 + $0x400] sm:$0xff]  ;;  %v1518_v47 = vld [vmem:[#allocation4 + $0x428] sm:$0xff] }
 0x213   :  { %1144 = vst [vmem:[#allocation2 + $0xb0] sm:$0xff] %v1120_v3  ;;  %v1094_v21 = vadd.f32 %v1093_v52, %v5300_v37  ;;  %v1095_v22 = vpop.f32.mrb[47].mxu0  ;;  %v1515_v3 = vld [vmem:[#allocation4 + $0x410] sm:$0xff]  ;;  %v1520_v52 = vld [vmem:[#allocation4 + $0x438] sm:$0xff] }
 0x214   :  { %v1096_v24 = vadd.f32 %v1095_v22, %v5303_v44  ;;  %v5464_v42 = vmax.f32 %v1222_v18, 0.0  ;;  %v3690_v18 = vpack.c.bf16 %v1515_v3, %v1513_v15  ;;  %v1517_v22 = vld [vmem:[#allocation4 + $0x420] sm:$0xff]  ;;  %v1535_v3 = vld [vmem:[#allocation4 + $0x4b0] sm:$0xff] }
 0x216   :  { %v1121_v1 = vmax.f32 %v1094_v21, %v1096_v24  ;;  %v1276_v26 = vrot.slane %v5464_v42, 1  ;;  %v1372_v27 = vrot.slane %v5464_v42, 4  ;;  %v3692_v21 = vpack.c.bf16 %v1520_v52, %v1518_v47  ;;  %v1519_v24 = vld [vmem:[#allocation4 + $0x430] sm:$0xff]  ;;  %v1538_v52 = vld [vmem:[#allocation4 + $0x4c8] sm:$0xff] }
 0x217   :  { %v1305_v47 = vrot.slane %v5443_v33, 2 }
 0x218   :  { %1145 = vst [vmem:[#allocation2 + $0xb8] sm:$0xff] %v1121_v1  ;;  %v1277_v29 = vsel %vm170_vm1, %v1275_v41, %v1276_v26  ;;  %v5472_v37 = vsel %vm557_vm2, %v1371_v0, %v1372_v27  ;;  %v1522_v1 = vld [vmem:[#allocation4 + $0x448] sm:$0xff]  ;;  %v1524_v41 = vld [vmem:[#allocation4 + $0x458] sm:$0xff]  ;;  %v3694_v26 = vpack.c.bf16 %v1519_v24, %v1517_v22  ;;  %v1521_v27 = vld [vmem:[#allocation4 + $0x440] sm:$0xff]  ;;  %v1339_v24 = vrot.slane %v5460_v25, 3 }
 0x219   :  { %1657 = vmatprep.mubr.f32.mxu1 %v1277_v29  ;;  %v3696_v0 = vpack.c.bf16 %v1524_v41, %v1522_v1  ;;  %v1523_v29 = vld [vmem:[#allocation4 + $0x450] sm:$0xff]  ;;  %v1537_v41 = vld [vmem:[#allocation4 + $0x4c0] sm:$0xff] }
 0x21a   :  { %1658 = vmatmul.mubr.f32.gmra.mrb[12].mxu1 %v5460_v25  ;;  %v1174_v44 = vld [vmem:[#allocation2 + $0xa8] ss:$2 sm:$0xff]  ;;  %v1206_v31 = vld [vmem:[#allocation2 + $0xa9] ss:$2 sm:$0xff] }
 0x21b   :  { %v1223_v34 = vmax.f32 %v1174_v44, %v1206_v31  ;;  %v1526_v44 = vld [vmem:[#allocation4 + $0x468] sm:$0xff]  ;;  %v1528_v31 = vld [vmem:[#allocation4 + $0x478] sm:$0xff] }
 0x21d   :  { %v5475_v59 = vmax.f32 %v1223_v34, 0.0  ;;  %v3700_v34 = vpack.c.bf16 %v1528_v31, %v1526_v44 }
 0x21f   :  { %v1176_v35 = vld [vmem:[#allocation2 + $0xb8] ss:$2 sm:$0xf]  ;;  %v1208_v46 = vld [vmem:[#allocation2 + $0xb9] ss:$2 sm:$0xf] }
 0x220   :  { %v1224_v57 = vmax.f32 %v1176_v35, %v1208_v46  ;;  %v1278_v4 = vrot.slane %v5475_v59, 1  ;;  %v1374_v5 = vrot.slane %v5475_v59, 4  ;;  %v1525_v35 = vld [vmem:[#allocation4 + $0x460] sm:$0xff]  ;;  %v1530_v46 = vld [vmem:[#allocation4 + $0x488] sm:$0xff] }
 0x222   :  { %v5477_v61 = vmax.f32 %v1224_v57, 0.0  ;;  %v1532_v57 = vld [vmem:[#allocation4 + $0x498] sm:$0xff] }
 0x224   :  { %v1279_v63 = vrot.slane %v5477_v61, 1  ;;  %v1375_v10 = vrot.slane %v5477_v61, 4  ;;  %v1343_v44 = vrot.slane %v5477_v61, 3 }
 0x226   :  { %v1280_v9 = vsel %vm170_vm1, %v1278_v4, %v1279_v63  ;;  %v5485_v2 = vsel %vm557_vm2, %v1374_v5, %v1375_v10  ;;  %v3704_v4 = vpack.c.bf16 %v1532_v57, %v1530_v46  ;;  %v1529_v63 = vld [vmem:[#allocation4 + $0x480] sm:$0xff]  ;;  %v1534_v5 = vld [vmem:[#allocation4 + $0x4a8] sm:$0xff]  ;;  %v1536_v10 = vld [vmem:[#allocation4 + $0x4b8] sm:$0xff]  ;;  %v1311_v46 = vrot.slane %v5477_v61, 2 }
 0x227   :  { %1663 = vmatprep.mubr.f32.mxu1 %v1280_v9  ;;  %v3708_v15 = vpack.c.bf16 %v1536_v10, %v1534_v5  ;;  %v2099_v5 = vld [vmem:[#allocation7 + $0x60] sm:$0xff] }
 0x228   :  { %1664 = vmatmul.mubr.f32.gmra.mrb[14].mxu1 %v5475_v59 }
 0x229   :  { %1734 = vmatprep.mubr.f32.mxu1 %v5319_v36  ;;  %v3698_v36 = vpack.c.bf16 %v1523_v29, %v1521_v27  ;;  %v1544_v27 = vld [vmem:[#allocation4 + $0x4f8] sm:$0xff] }
 0x22c   :  { %1735 = vmatmul.mubr.f32.vlgmr.msra.gmra.mrb[0].mxu1 %v5322_v38  ;;  %v1527_v38 = vld [vmem:[#allocation4 + $0x470] sm:$0xff] }
 0x22d   :  { %3691 = vmatpush1.bf16.msra.mxu1 %v3690_v18  ;;  %1740 = vmatprep.mubr.f32.mxu1 %v5335_v8  ;;  %v3702_v8 = vpack.c.bf16 %v1527_v38, %v1525_v35  ;;  %v1540_v18 = vld [vmem:[#allocation4 + $0x4d8] sm:$0xff]  ;;  %v1541_v35 = vld [vmem:[#allocation4 + $0x4e0] sm:$0xff]  ;;  %v1543_v38 = vld [vmem:[#allocation4 + $0x4f0] sm:$0xff] }
 0x22e   :  { %3693 = vmatprep.subr.bf16.mxu1 %v3692_v21  ;;  %v1340_v21 = vrot.slane %v5464_v42, 3  ;;  %v3712_v1 = vpack.c.bf16 %v1540_v18, %v1538_v52  ;;  %v2155_v18 = vld [vmem:[#allocation7 + $0x220] sm:$0xff] }
 0x230   :  { %1741 = vmatmul.mubr.f32.gmra.mrb[2].mxu1 %v5338_v30  ;;  %v1531_v30 = vld [vmem:[#allocation4 + $0x490] sm:$0xff]  ;;  %v1341_v29 = vsel %vm428_vm0, %v1339_v24, %v1340_v21 }
 0x231   :  { %3695 = vmatpush1.bf16.msra.mxu1 %v3694_v26  ;;  %1746 = vmatprep.mubr.f32.mxu1 %v5352_v45  ;;  %v1337_v45 = vrot.slane %v5443_v33, 3  ;;  %v3706_v9 = vpack.c.bf16 %v1531_v30, %v1529_v63  ;;  %v1539_v26 = vld [vmem:[#allocation4 + $0x4d0] sm:$0xff]  ;;  %v5943_v63 = vmov 0.0   ;;  %v2115_v30 = vld [vmem:[#allocation7 + $0xe0] sm:$0xff] }
 0x232   :  { %3697 = vmatprep.subr.bf16.mxu1 %v3696_v0  ;;  %v1308_v0 = vrot.slane %v5464_v42, 2  ;;  %v3714_v31 = vpack.c.bf16 %v1539_v26, %v1537_v41  ;;  %v2158_v41 = vld [vmem:[#allocation7 + $0x238] sm:$0xff] }
 0x234   :  { %1747 = vmatmul.mubr.f32.gmra.mrb[4].mxu1 %v5355_v48  ;;  %v1336_v48 = vrot.slane %v5440_v20, 3 }
 0x235   :  { %3699 = vmatpush1.bf16.msra.mxu1 %v3698_v36  ;;  %1752 = vmatprep.mubr.f32.mxu1 %v5375_v43  ;;  %v1533_v43 = vld [vmem:[#allocation4 + $0x4a0] sm:$0xff]  ;;  %v1342_v36 = vrot.slane %v5475_v59, 3 }
 0x236   :  { %3701 = vmatprep.subr.bf16.mxu1 %v3700_v34  ;;  %v3710_v22 = vpack.c.bf16 %v1535_v3, %v1533_v43  ;;  %v2171_v3 = vld [vmem:[#allocation7 + $0x2a0] sm:$0xff] }
 0x237   :  { %v1344_v57 = vsel %vm428_vm0, %v1342_v36, %v1343_v44  ;;  %v2159_v36 = vld [vmem:[#allocation7 + $0x240] sm:$0xff] }
 0x238   :  { %1753 = vmatmul.mubr.f32.gmra.mrb[6].mxu1 %v5378_v58  ;;  %v1338_v58 = vsel %vm428_vm0, %v1336_v48, %v1337_v45  ;;  %v2100_v45 = vld [vmem:[#allocation7 + $0x68] sm:$0xff]  ;;  %v2154_v48 = vld [vmem:[#allocation7 + $0x218] sm:$0xff] }
 0x239   :  { %3703 = vmatpush1.bf16.msra.mxu1 %v3702_v8  ;;  %1758 = vmatprep.mubr.f32.mxu1 %v5418_v49  ;;  %v1304_v49 = vrot.slane %v5440_v20, 2  ;;  %v1307_v20 = vrot.slane %v5460_v25, 2  ;;  %v1310_v8 = vrot.slane %v5475_v59, 2  ;;  %v2152_v59 = vld [vmem:[#allocation7 + $0x208] sm:$0xff] }
 0x23a   :  { %3705 = vmatprep.subr.bf16.mxu1 %v3704_v4  ;;  %v3718_v4 = vpack.c.bf16 %v1543_v38, %v1541_v35 }
 0x23b   :  { %v1306_v33 = vsel %vm299_vm3, %v1304_v49, %v1305_v47  ;;  %v1309_v42 = vsel %vm299_vm3, %v1307_v20, %v1308_v0  ;;  %v1312_v25 = vsel %vm299_vm3, %v1310_v8, %v1311_v46  ;;  %v2172_v47 = vld [vmem:[#allocation7 + $0x2a8] sm:$0xff]  ;;  %v2173_v49 = vld [vmem:[#allocation7 + $0x2b0] sm:$0xff]  ;;  %v2178_v46 = vld [vmem:[#allocation7 + $0x2d8] sm:$0xff] }
 0x23c   :  { %1759 = vmatmul.mubr.f32.gmra.mrb[8].mxu1 %v5421_v28  ;;  %v1542_v28 = vld [vmem:[#allocation4 + $0x4e8] sm:$0xff]  ;;  %v5550_v52 = vpack.c.bf16 %v2172_v47, %v2171_v3  ;;  %v2161_v8 = vld [vmem:[#allocation7 + $0x250] sm:$0xff]  ;;  %v2166_v47 = vld [vmem:[#allocation7 + $0x278] sm:$0xff] }
 0x23d   :  { %3707 = vmatpush1.bf16.msra.mxu1 %v3706_v9  ;;  %1764 = vmatprep.mubr.f32.mxu1 %v1338_v58  ;;  %v3716_v34 = vpack.c.bf16 %v1544_v27, %v1542_v28  ;;  %v2153_v9 = vld [vmem:[#allocation7 + $0x210] sm:$0xff]  ;;  %v2156_v58 = vld [vmem:[#allocation7 + $0x228] sm:$0xff]  ;;  %v2118_v27 = vld [vmem:[#allocation7 + $0xf8] sm:$0xff] }
 0x23e   :  { %3709 = vmatprep.subr.bf16.mxu1 %v3708_v15  ;;  %v5542_v15 = vpack.c.bf16 %v2100_v45, %v2099_v5  ;;  %v5545_v43 = vpack.c.bf16 %v2154_v48, %v2153_v9  ;;  %v5552_v21 = vpack.c.bf16 %v2156_v58, %v2155_v18  ;;  %v2176_v0 = vld [vmem:[#allocation7 + $0x2c8] sm:$0xff]  ;;  %v2117_v28 = vld [vmem:[#allocation7 + $0xf0] sm:$0xff]  ;;  %v2182_v9 = vld [vmem:[#allocation7 + $0x2f8] sm:$0xff] }
 0x23f   :  { %v5564_v20 = vpack.c.bf16 %v2118_v27, %v2117_v28  ;;  %v2181_v45 = vld [vmem:[#allocation7 + $0x2f0] sm:$0xff]  ;;  %v1545_v58 = vld [vmem:[%s5932_s7] sm:$0x3] }
 0x240   :  { %1765 = vmatmul.mubr.f32.gmra.mrb[10].mxu1 %v1306_v33  ;;  %v2175_v33 = vld [vmem:[#allocation7 + $0x2c0] sm:$0xff]  ;;  %v5589_v48 = vpack.c.bf16 %v2182_v9, %v2181_v45  ;;  %v2165_v3 = vld [vmem:[#allocation7 + $0x270] sm:$0xff] }
 0x241   :  { %3711 = vmatpush1.bf16.msra.mxu1 %v3710_v22  ;;  %1770 = vmatprep.mubr.f32.mxu1 %v1341_v29  ;;  %v2174_v22 = vld [vmem:[#allocation7 + $0x2b8] sm:$0xff]  ;;  %v2101_v29 = vld [vmem:[#allocation7 + $0x70] sm:$0xff]  ;;  %v5562_v44 = vpack.c.bf16 %v2176_v0, %v2175_v33  ;;  %v5591_v18 = vpack.c.bf16 %v2166_v47, %v2165_v3 }
 0x242   :  { %3713 = vmatprep.subr.bf16.mxu1 %v3712_v1  ;;  %v5556_v24 = vpack.c.bf16 %v2174_v22, %v2173_v49  ;;  %v2157_v1 = vld [vmem:[#allocation7 + $0x230] sm:$0xff]  ;;  %v5600_v49 = vrot.slane %v1545_v58, %v5291_v53  ;;  %v5603_v22 = vrot.slane %v1545_v58, %v5297_v12  ;;  %v4430_v58 = vmov 1934713408  }
 0x243   :  { %v5558_v26 = vpack.c.bf16 %v2158_v41, %v2157_v1 }
 0x244   :  { %1771 = vmatmul.mubr.f32.gmra.mrb[12].mxu1 %v1309_v42  ;;  %v2177_v42 = vld [vmem:[#allocation7 + $0x2d0] sm:$0xff] }
 0x245   :  { %3715 = vmatpush1.bf16.msra.mxu1 %v3714_v31  ;;  %1776 = vmatprep.mubr.f32.mxu1 %v1344_v57  ;;  %v2102_v31 = vld [vmem:[#allocation7 + $0x78] sm:$0xff]  ;;  %v5574_v57 = vpack.c.bf16 %v2178_v46, %v2177_v42 }
 0x246   :  { %3717 = vmatprep.subr.bf16.mxu1 %v3716_v34  ;;  %v2160_v34 = vld [vmem:[#allocation7 + $0x248] sm:$0xff]  ;;  %v5566_v35 = vpack.c.bf16 %v2102_v31, %v2101_v29 }
 0x247   :  { %v5569_v38 = vpack.c.bf16 %v2160_v34, %v2159_v36 }
 0x248   :  { %1777 = vmatmul.mubr.f32.gmra.mrb[14].mxu1 %v1312_v25 }
 0x249   :  { %3719 = vmatpush1.bf16.msra.mxu1 %v3718_v4  ;;  %1847 = vmatprep.mubr.f32.mxu1 %v5943_v63  ;;  %v2162_v4 = vld [vmem:[#allocation7 + $0x258] sm:$0xff] }
 0x24a   :  { %v5576_v25 = vpack.c.bf16 %v2162_v4, %v2161_v8  ;;  %v4429_v4 = vmov 1983009808  }
 0x24c   :  { %1848 = vmatmul.mubr.f32.vlgmr.msra.gmra.mrb[0].mxu1 %v5325_v32  ;;  %v2167_v32 = vld [vmem:[#allocation7 + $0x280] sm:$0xff] }
 0x24d   :  { %1853 = vmatprep.mubr.f32.mxu1 %v5943_v63 }
 0x250   :  { %1854 = vmatmul.mubr.f32.gmra.mrb[2].mxu1 %v5342_v39  ;;  %v2168_v39 = vld [vmem:[#allocation7 + $0x288] sm:$0xff] }
 0x251   :  { %1859 = vmatprep.mubr.f32.mxu1 %v5943_v63 }
 0x254   :  { %1860 = vmatmul.mubr.f32.gmra.mrb[4].mxu1 %v5359_v51  ;;  %v5532_v51 = vpack.c.bf16 %v2168_v39, %v2167_v32  ;;  %v2135_v32 = vld [vmem:[#allocation7 + $0x180] sm:$0xff]  ;;  %v2136_v39 = vld [vmem:[#allocation7 + $0x188] sm:$0xff] }
 0x255   :  { %1865 = vmatprep.mubr.f32.mxu1 %v5943_v63 }
 0x256   :  { %3785 = vmatprep.subr.bf16.mxu1 %v5532_v51 }
 0x258   :  { %1866 = vmatmul.mubr.f32.gmra.mrb[6].mxu1 %v5382_v62  ;;  %v2151_v62 = vld [vmem:[#allocation7 + $0x200] sm:$0xff] }
 0x259   :  { %1871 = vmatprep.mubr.f32.mxu1 %v5943_v63  ;;  %v5534_v61 = vpack.c.bf16 %v2152_v59, %v2151_v62  ;;  %v2179_v62 = vld [vmem:[#allocation7 + $0x2e0] sm:$0xff]  ;;  %v5580_v59 = vpack.c.bf16 %v2136_v39, %v2135_v32  ;;  %v1953_v32 = vunpack.c.l.s4 %v4429_v4 }
 0x25b   :  { %3787 = vmatpush3.bf16.msra.mxu1 %v5534_v61  ;;  %v1954_v47 = vunpack.c.0.s8 %v1953_v32 }
 0x25c   :  { %1872 = vmatmul.mubr.f32.gmra.mrb[8].mxu1 %v5424_v56  ;;  %v2169_v56 = vld [vmem:[#allocation7 + $0x290] sm:$0xff] }
 0x25d   :  { %1877 = vmatprep.mubr.f32.mxu1 %v5943_v63 }
 0x260   :  { %1878 = vmatmul.mubr.f32.gmra.mrb[10].mxu1 %v5454_v55  ;;  %v2170_v55 = vld [vmem:[#allocation7 + $0x298] sm:$0xff] }
 0x261   :  { %1883 = vmatprep.mubr.f32.mxu1 %v5943_v63  ;;  %v5538_v10 = vpack.c.bf16 %v2170_v55, %v2169_v56  ;;  %v2180_v56 = vld [vmem:[#allocation7 + $0x2e8] sm:$0xff] }
 0x262   :  { %v5582_v55 = vpack.c.bf16 %v2180_v56, %v2179_v62 }
 0x263   :  { %3789 = vmatprep.subr.bf16.mxu1 %v5538_v10 }
 0x264   :  { %1884 = vmatmul.mubr.f32.gmra.mrb[12].mxu1 %v5472_v37  ;;  %v2116_v37 = vld [vmem:[#allocation7 + $0xe8] sm:$0xff] }
 0x265   :  { %1889 = vmatprep.mubr.f32.mxu1 %v5943_v63  ;;  %3791 = vmatpush3.bf16.msra.mxu1 %v5545_v43 }
 0x266   :  { %3793 = vmatprep.subr.bf16.mxu1 %v5550_v52 }
 0x268   :  { %1890 = vmatmul.mubr.f32.gmra.mrb[14].mxu1 %v5485_v2  ;;  %v5540_v2 = vpack.c.bf16 %v2116_v37, %v2115_v30  ;;  %v2163_v30 = vld [vmem:[#allocation7 + $0x260] sm:$0xff]  ;;  %v2164_v37 = vld [vmem:[#allocation7 + $0x268] sm:$0xff] }
 0x269   :  { %3795 = vmatpush3.bf16.msra.mxu1 %v5552_v21  ;;  %v5585_v5 = vpack.c.bf16 %v2164_v37, %v2163_v30 }
 0x26a   :  { %3745 = vmatprep.subr.bf16.mxu0 %v5540_v2  ;;  %3797 = vmatprep.subr.bf16.mxu1 %v5556_v24 }
 0x26b   :  { %3747 = vmatpush3.bf16.msra.mxu0 %v5542_v15 }
 0x26c   :  { %3749 = vmatprep.subr.bf16.mxu0 %v5564_v20 }
 0x26d   :  { %3799 = vmatpush3.bf16.msra.mxu1 %v5558_v26 }
 0x26e   :  { %3801 = vmatprep.subr.bf16.mxu1 %v5562_v44 }
 0x26f   :  { %3751 = vmatpush3.bf16.msra.mxu0 %v5566_v35 }
 0x270   :  { %3753 = vmatprep.subr.bf16.mxu0 %v5580_v59 }
 0x271   :  { %3803 = vmatpush3.bf16.msra.mxu1 %v5569_v38 }
 0x272   :  { %3805 = vmatprep.subr.bf16.mxu1 %v5574_v57 }
 0x275   :  { %3807 = vmatpush3.bf16.msra.mxu1 %v5576_v25 }
 0x276   :  { %3809 = vmatprep.subr.bf16.mxu1 %v5582_v55 }
 0x279   :  { %3811 = vmatpush3.bf16.msra.mxu1 %v5585_v5 }
 0x27a   :  { %3813 = vmatprep.subr.bf16.mxu1 %v5589_v48 }
 0x27d   :  { %3815 = vmatpush3.bf16.msra.mxu1 %v5591_v18 }
 0x27e   :  { %3849 = vmatprep.subr.bf16.mxu1 %v5384_v16 }
 0x31f   :  { %v1849_v1 = vpop.f32.mrb[0].mxu1 }
 0x320   :  { %v4056_v41 = vadd.f32 %v1849_v1, %v5600_v49  ;;  %v1851_v33 = vpop.f32.mrb[1].mxu1  ;;  %v1970_v1 = vunpack.c.l.s4 %v4430_v58 }
 0x321   :  { %v4057_v0 = vadd.f32 %v1851_v33, %v5603_v22 }
 0x323   :  { %v1896_v28 = vmax.f32 %v4056_v41, %v4057_v0  ;;  %v1855_v27 = vpop.f32.mrb[2].mxu1 }
 0x324   :  { %v4058_v16 = vadd.f32 %v1855_v27, %v5600_v49  ;;  %v1857_v29 = vpop.f32.mrb[3].mxu1 }
 0x325   :  { %1904 = vst [vmem:[#allocation3] sm:$0xff] %v1896_v28  ;;  %v4059_v31 = vadd.f32 %v1857_v29, %v5603_v22 }
 0x327   :  { %v1897_v36 = vmax.f32 %v4058_v16, %v4059_v31  ;;  %v1861_v34 = vpop.f32.mrb[4].mxu1 }
 0x328   :  { %v4060_v42 = vadd.f32 %v1861_v34, %v5600_v49  ;;  %v1863_v46 = vpop.f32.mrb[5].mxu1  ;;  %v5616_v34 = vsub.s32 %v1954_v47, %v5288_v40 }
 0x329   :  { %1905 = vst [vmem:[#allocation3 + $0x8] sm:$0xff] %v1897_v36  ;;  %v4061_v8 = vadd.f32 %v1863_v46, %v5603_v22 }
 0x32b   :  { %v1898_v39 = vmax.f32 %v4060_v42, %v4061_v8  ;;  %v1867_v62 = vpop.f32.mrb[6].mxu1  ;;  %v1971_v42 = vunpack.c.0.s8 %v1970_v1 }
 0x32c   :  { %v4062_v56 = vadd.f32 %v1867_v62, %v5600_v49  ;;  %v1869_v30 = vpop.f32.mrb[7].mxu1  ;;  %v1912_v37 = vld [vmem:[#allocation3] ss:$2 sm:$0xf] }
 0x32d   :  { %1906 = vst [vmem:[#allocation3 + $0x10] sm:$0xff] %v1898_v39  ;;  %v4063_v45 = vadd.f32 %v1869_v30, %v5603_v22  ;;  %v1928_v9 = vld [vmem:[#allocation3 + $0x1] ss:$2 sm:$0xf] }
 0x32e   :  { %v1943_v3 = vmax.f32 %v1912_v37, %v1928_v9  ;;  %v5623_v9 = vsub.s32 %v1971_v42, %v5288_v40  ;;  %v2137_v42 = vld [vmem:[#allocation7 + $0x190] sm:$0xff] }
 0x32f   :  { %v1899_v41 = vmax.f32 %v4062_v56, %v4063_v45  ;;  %v1873_v33 = vpop.f32.mrb[8].mxu1 }
 0x330   :  { %v4064_v0 = vadd.f32 %v1873_v33, %v5600_v49  ;;  %v1875_v28 = vpop.f32.mrb[9].mxu1  ;;  %v1914_v27 = vld [vmem:[#allocation3 + $0x8] ss:$2 sm:$0xf]  ;;  %v1951_v36 = vmax.f32 %v1943_v3, 0.0 }
 0x331   :  { %1907 = vst [vmem:[#allocation3 + $0x18] sm:$0xff] %v1899_v41  ;;  %v4065_v16 = vadd.f32 %v1875_v28, %v5603_v22  ;;  %v1930_v29 = vld [vmem:[#allocation3 + $0x9] ss:$2 sm:$0xf] }
 0x332   :  { %v1944_v31 = vmax.f32 %v1914_v27, %v1930_v29  ;;  %v1958_v37 = vrot.slane %v1951_v36, %v5616_v34  ;;  %v2120_v29 = vld [vmem:[#allocation7 + $0x108] sm:$0xff] }
 0x333   :  { %v1900_v46 = vmax.f32 %v4064_v0, %v4065_v16  ;;  %v1879_v8 = vpop.f32.mrb[10].mxu1  ;;  %v2119_v16 = vld [vmem:[#allocation7 + $0x100] sm:$0xff] }
 0x334   :  { %v4066_v4 = vadd.f32 %v1879_v8, %v5600_v49  ;;  %v1881_v32 = vpop.f32.mrb[11].mxu1  ;;  %v1959_v39 = vmax.f32 %v1944_v31, 0.0  ;;  %v1916_v62 = vld [vmem:[#allocation3 + $0x10] ss:$2 sm:$0xf] }
 0x335   :  { %1908 = vst [vmem:[#allocation3 + $0x20] sm:$0xff] %v1900_v46  ;;  %v4067_v56 = vadd.f32 %v1881_v32, %v5603_v22  ;;  %v1932_v30 = vld [vmem:[#allocation3 + $0x11] ss:$2 sm:$0xf]  ;;  %v2138_v46 = vld [vmem:[#allocation7 + $0x198] sm:$0xff] }
 0x336   :  { %v1966_v45 = vrot.slane %v1959_v39, %v5616_v34  ;;  %v1945_v3 = vmax.f32 %v1916_v62, %v1932_v30 }
 0x337   :  { %v1901_v47 = vmax.f32 %v4066_v4, %v4067_v56  ;;  %v1885_v58 = vpop.f32.mrb[12].mxu1 }
 0x338   :  { %v4068_v1 = vadd.f32 %v1885_v58, %v5600_v49  ;;  %v1887_v41 = vpop.f32.mrb[13].mxu1  ;;  %v1967_v33 = vcombine.low %v1958_v37, %v1966_v45  ;;  %v1968_v0 = vcombine.high %v1958_v37, %v1966_v45  ;;  %v1918_v28 = vld [vmem:[#allocation3 + $0x18] ss:$2 sm:$0xf]  ;;  %v1985_v4 = vmax.f32 %v1945_v3, 0.0 }
 0x339   :  { %1909 = vst [vmem:[#allocation3 + $0x28] sm:$0xff] %v1901_v47  ;;  %v4069_v27 = vadd.f32 %v1887_v41, %v5603_v22  ;;  %v1934_v31 = vld [vmem:[#allocation3 + $0x19] ss:$2 sm:$0xf]  ;;  %v5633_v37 = vpack.c.bf16 %v2120_v29, %v2119_v16  ;;  %v5636_v41 = vpack.c.bf16 %v2138_v46, %v2137_v42 }
 0x33a   :  { %v1975_v36 = vrot.slane %v1967_v33, %v5623_v9  ;;  %v5629_v40 = vrot.slane %v1968_v0, %v5623_v9  ;;  %v1946_v8 = vmax.f32 %v1918_v28, %v1934_v31  ;;  %v2121_v33 = vld [vmem:[#allocation7 + $0x110] sm:$0xff]  ;;  %v2122_v0 = vld [vmem:[#allocation7 + $0x118] sm:$0xff] }
 0x33b   :  { %v1902_v32 = vmax.f32 %v4068_v1, %v4069_v27  ;;  %v1891_v39 = vpop.f32.mrb[14].mxu1  ;;  %v2140_v1 = vld [vmem:[#allocation7 + $0x1a8] sm:$0xff]  ;;  %v5641_v27 = vrot.slane %v1985_v4, %v5616_v34 }
 0x33c   :  { %v4070_v62 = vadd.f32 %v1891_v39, %v5600_v49  ;;  %v1893_v56 = vpop.f32.mrb[15].mxu1  ;;  %v1983_v30 = vcombine.high %v1975_v36, %v5943_v63  ;;  %v1993_v45 = vmax.f32 %v1946_v8, 0.0  ;;  %v1920_v47 = vld [vmem:[#allocation3 + $0x20] ss:$2 sm:$0xf]  ;;  %v1984_v3 = vcombine.high %v5629_v40, %v5943_v63  ;;  %v2124_v39 = vld [vmem:[#allocation7 + $0x128] sm:$0xff] }
 0x33d   :  { %1910 = vst [vmem:[#allocation3 + $0x30] sm:$0xff] %v1902_v32  ;;  %v4071_v58 = vadd.f32 %v1893_v56, %v5603_v22  ;;  %v1936_v28 = vld [vmem:[#allocation3 + $0x21] ss:$2 sm:$0xf]  ;;  %v5647_v22 = vpack.c.bf16 %v2122_v0, %v2121_v33 }
 0x33e   :  { %2286 = vmatprep.mubr.f32.mxu0 %v1983_v30  ;;  %v2139_v49 = vld [vmem:[#allocation7 + $0x1a0] sm:$0xff]  ;;  %v5644_v16 = vrot.slane %v1993_v45, %v5616_v34  ;;  %v1947_v29 = vmax.f32 %v1920_v47, %v1936_v28  ;;  %v2141_v30 = vld [vmem:[#allocation7 + $0x1b0] sm:$0xff]  ;;  %v2142_v45 = vld [vmem:[#allocation7 + $0x1b8] sm:$0xff] }
 0x33f   :  { %v1903_v31 = vmax.f32 %v4070_v62, %v4071_v58  ;;  %2287 = vmatmul.mubr.f32.vlgmr.msra.gmra.mrb[48].mxu0 %v1975_v36  ;;  %v5652_v4 = vpack.c.bf16 %v2140_v1, %v2139_v49  ;;  %v2123_v32 = vld [vmem:[#allocation7 + $0x120] sm:$0xff]  ;;  %v5660_v0 = vpack.c.bf16 %v2142_v45, %v2141_v30  ;;  %v2125_v28 = vld [vmem:[#allocation7 + $0x130] sm:$0xff] }
 0x340   :  { %3755 = vmatpush3.bf16.msra.mxu0 %v5633_v37  ;;  %2356 = vmatprep.mubr.f32.mxu0 %v1984_v3  ;;  %v2001_v42 = vcombine.low %v5641_v27, %v5644_v16  ;;  %v1922_v46 = vld [vmem:[#allocation3 + $0x28] ss:$2 sm:$0xf]  ;;  %v1938_v8 = vld [vmem:[#allocation3 + $0x29] ss:$2 sm:$0xf]  ;;  %v5657_v33 = vpack.c.bf16 %v2124_v39, %v2123_v32 }
 0x341   :  { %1911 = vst [vmem:[#allocation3 + $0x38] sm:$0xff] %v1903_v31  ;;  %3757 = vmatprep.subr.bf16.mxu0 %v5636_v41  ;;  %v1948_v56 = vmax.f32 %v1922_v46, %v1938_v8  ;;  %v2019_v62 = vmax.f32 %v1947_v29, 0.0  ;;  %v2126_v3 = vld [vmem:[#allocation7 + $0x138] sm:$0xff]  ;;  %v2143_v29 = vld [vmem:[#allocation7 + $0x1c0] sm:$0xff]  ;;  %v2144_v31 = vld [vmem:[#allocation7 + $0x1c8] sm:$0xff] }
 0x342   :  { %v2009_v36 = vrot.slane %v2001_v42, %v5623_v9  ;;  %v5672_v46 = vpack.c.bf16 %v2126_v3, %v2125_v28  ;;  %v5676_v8 = vpack.c.bf16 %v2144_v31, %v2143_v29  ;;  %v2127_v39 = vld [vmem:[#allocation7 + $0x140] sm:$0xff]  ;;  %v2129_v45 = vld [vmem:[#allocation7 + $0x150] sm:$0xff]  ;;  %v2148_v28 = vld [vmem:[#allocation7 + $0x1e8] sm:$0xff] }
 0x343   :  { %v2027_v47 = vmax.f32 %v1948_v56, 0.0  ;;  %v5663_v49 = vrot.slane %v2019_v62, %v5616_v34  ;;  %v2128_v56 = vld [vmem:[#allocation7 + $0x148] sm:$0xff]  ;;  %v2145_v62 = vld [vmem:[#allocation7 + $0x1d0] sm:$0xff]  ;;  %v2131_v3 = vld [vmem:[#allocation7 + $0x160] sm:$0xff] }
 0x344   :  { %3759 = vmatpush3.bf16.msra.mxu0 %v5647_v22  ;;  %v2017_v58 = vcombine.high %v2009_v36, %v5943_v63 }
 0x345   :  { %3761 = vmatprep.subr.bf16.mxu0 %v5652_v4  ;;  %v5666_v1 = vrot.slane %v2027_v47, %v5616_v34  ;;  %v2130_v47 = vld [vmem:[#allocation7 + $0x158] sm:$0xff] }
 0x346   :  { %2426 = vmatprep.mubr.f32.mxu1 %v2017_v58  ;;  %v2147_v58 = vld [vmem:[#allocation7 + $0x1e0] sm:$0xff]  ;;  %v5693_v29 = vpack.c.bf16 %v2130_v47, %v2129_v45  ;;  %v2134_v47 = vld [vmem:[#allocation7 + $0x178] sm:$0xff] }
 0x347   :  { %2427 = vmatmul.mubr.f32.vlgmr.msra.gmra.mrb[16].mxu1 %v2009_v36  ;;  %v2035_v42 = vcombine.low %v5663_v49, %v5666_v1  ;;  %v2146_v36 = vld [vmem:[#allocation7 + $0x1d8] sm:$0xff] }
 0x348   :  { %3763 = vmatpush3.bf16.msra.mxu0 %v5657_v33  ;;  %3851 = vmatpush3.bf16.msra.mxu1 %v5386_v7  ;;  %v5685_v7 = vpack.c.bf16 %v2128_v56, %v2127_v39  ;;  %v1942_v31 = vld [vmem:[#allocation3 + $0x39] ss:$2 sm:$0xf]  ;;  %v2149_v39 = vld [vmem:[#allocation7 + $0x1f0] sm:$0xff] }
 0x349   :  { %3765 = vmatprep.subr.bf16.mxu0 %v5660_v0  ;;  %3853 = vmatprep.subr.bf16.mxu1 %v5390_v14  ;;  %v5679_v32 = vrot.slane %v2035_v42, %v5623_v9  ;;  %v5689_v14 = vpack.c.bf16 %v2146_v36, %v2145_v62  ;;  %v2132_v42 = vld [vmem:[#allocation7 + $0x168] sm:$0xff]  ;;  %v2150_v56 = vld [vmem:[#allocation7 + $0x1f8] sm:$0xff]  ;;  %v1924_v62 = vld [vmem:[#allocation3 + $0x30] ss:$2 sm:$0xf] }
 0x34a   :  { %v1940_v36 = vld [vmem:[#allocation3 + $0x31] ss:$2 sm:$0xf]  ;;  %v5705_v45 = vpack.c.bf16 %v2150_v56, %v2149_v39 }
 0x34b   :  { %v2051_v30 = vcombine.high %v5679_v32, %v5943_v63  ;;  %v2200_v63 = vld [vmem:[#allocation7 + $0x388] sm:$0xff] }
 0x34c   :  { %3767 = vmatpush3.bf16.msra.mxu0 %v5672_v46  ;;  %3855 = vmatpush3.bf16.msra.mxu1 %v5395_v6  ;;  %v1926_v6 = vld [vmem:[#allocation3 + $0x38] ss:$2 sm:$0xf] }
 0x34d   :  { %3769 = vmatprep.subr.bf16.mxu0 %v5676_v8  ;;  %3857 = vmatprep.subr.bf16.mxu1 %v5398_v23  ;;  %v5697_v23 = vpack.c.bf16 %v2148_v28, %v2147_v58  ;;  %v1949_v58 = vmax.f32 %v1924_v62, %v1940_v36  ;;  %v2199_v28 = vld [vmem:[#allocation7 + $0x380] sm:$0xff]  ;;  %v2186_v36 = vld [vmem:[#allocation7 + $0x318] sm:$0xff] }
 0x34e   :  { %2567 = vmatprep.mubr.f32.mxu1 %v2051_v30  ;;  %v1950_v30 = vmax.f32 %v1926_v6, %v1942_v31  ;;  %v2002_v6 = vcombine.high %v5641_v27, %v5644_v16  ;;  %v2201_v27 = vld [vmem:[#allocation7 + $0x390] sm:$0xff]  ;;  %v2202_v16 = vld [vmem:[#allocation7 + $0x398] sm:$0xff] }
 0x34f   :  { %v2053_v39 = vmax.f32 %v1949_v58, 0.0  ;;  %v2203_v58 = vld [vmem:[#allocation7 + $0x3a0] sm:$0xff] }
 0x350   :  { %3771 = vmatpush3.bf16.msra.mxu0 %v5685_v7  ;;  %3859 = vmatpush3.bf16.msra.mxu1 %v5402_v50  ;;  %v5701_v50 = vpack.c.bf16 %v2132_v42, %v2131_v3  ;;  %v2061_v31 = vmax.f32 %v1950_v30, 0.0  ;;  %v2183_v3 = vld [vmem:[#allocation7 + $0x300] sm:$0xff]  ;;  %v2184_v42 = vld [vmem:[#allocation7 + $0x308] sm:$0xff]  ;;  %v5718_v56 = vrot.slane %v2002_v6, %v5623_v9 }
 0x351   :  { %3773 = vmatprep.subr.bf16.mxu0 %v5689_v14  ;;  %3861 = vmatprep.subr.bf16.mxu1 %v5406_v13  ;;  %v2133_v13 = vld [vmem:[#allocation7 + $0x170] sm:$0xff]  ;;  %v5732_v30 = vrot.slane %v2053_v39, %v5616_v34  ;;  %v2187_v6 = vld [vmem:[#allocation7 + $0x320] sm:$0xff] }
 0x352   :  { %v5721_v62 = vrot.slane %v2061_v31, %v5616_v34  ;;  %v2188_v31 = vld [vmem:[#allocation7 + $0x328] sm:$0xff] }
 0x353   :  { %v5751_v39 = vpack.c.bf16 %v2188_v31, %v2187_v6  ;;  %v2193_v6 = vld [vmem:[#allocation7 + $0x350] sm:$0xff]  ;;  %v2194_v31 = vld [vmem:[#allocation7 + $0x358] sm:$0xff] }
 0x354   :  { %3775 = vmatpush3.bf16.msra.mxu0 %v5693_v29  ;;  %3863 = vmatpush3.bf16.msra.mxu1 %v5408_v11  ;;  %v5711_v11 = vpack.c.bf16 %v2134_v47, %v2133_v13  ;;  %v5949_v13 = vmov 0.0  }
 0x355   :  { %3777 = vmatprep.subr.bf16.mxu0 %v5697_v23  ;;  %3865 = vmatprep.subr.bf16.mxu1 %v5412_v19  ;;  %v5715_v19 = vpack.c.bf16 %v2200_v63, %v2199_v28  ;;  %v2185_v63 = vld [vmem:[#allocation7 + $0x310] sm:$0xff]  ;;  %v2018_v47 = vcombine.high %v5718_v56, %v5949_v13  ;;  %v2204_v28 = vld [vmem:[#allocation7 + $0x3a8] sm:$0xff] }
 0x356   :  { %v5744_v34 = vpack.c.bf16 %v2204_v28, %v2203_v58  ;;  %v2191_v58 = vld [vmem:[#allocation7 + $0x340] sm:$0xff]  ;;  %v2209_v28 = vld [vmem:[#allocation7 + $0x3d0] sm:$0xff] }
 0x358   :  { %3779 = vmatpush3.bf16.msra.mxu0 %v5701_v50  ;;  %3867 = vmatpush3.bf16.msra.mxu1 %v5428_v54  ;;  %v5725_v54 = vpack.c.bf16 %v2184_v42, %v2183_v3  ;;  %v2205_v3 = vld [vmem:[#allocation7 + $0x3b0] sm:$0xff]  ;;  %v2206_v42 = vld [vmem:[#allocation7 + $0x3b8] sm:$0xff] }
 0x359   :  { %3781 = vmatprep.subr.bf16.mxu0 %v5705_v45  ;;  %3869 = vmatprep.subr.bf16.mxu1 %v5432_v60  ;;  %v5729_v60 = vpack.c.bf16 %v2202_v16, %v2201_v27  ;;  %v2190_v27 = vld [vmem:[#allocation7 + $0x338] sm:$0xff]  ;;  %v5756_v16 = vpack.c.bf16 %v2206_v42, %v2205_v3  ;;  %v2211_v3 = vld [vmem:[#allocation7 + $0x3e0] sm:$0xff]  ;;  %v2212_v42 = vld [vmem:[#allocation7 + $0x3e8] sm:$0xff] }
 0x35c   :  { %3783 = vmatpush3.bf16.msra.mxu0 %v5711_v11  ;;  %3871 = vmatpush3.bf16.msra.mxu1 %v5436_v17  ;;  %v2069_v17 = vcombine.low %v5732_v30, %v5721_v62 }
 0x35d   :  { %3817 = vmatprep.subr.bf16.mxu0 %v5715_v19  ;;  %3873 = vmatprep.subr.bf16.mxu1 %v5540_v2  ;;  %v5740_v2 = vpack.c.bf16 %v2186_v36, %v2185_v63  ;;  %v2208_v63 = vld [vmem:[#allocation7 + $0x3c8] sm:$0xff] }
 0x35f   :  { %2357 = vmatmul.mubr.f32.vlgmr.msra.gmra.mrb[50].mxu0 %v5629_v40  ;;  %v5748_v40 = vrot.slane %v2069_v17, %v5623_v9  ;;  %v2210_v17 = vld [vmem:[#allocation7 + $0x3d8] sm:$0xff] }
 0x360   :  { %3819 = vmatpush3.bf16.msra.mxu0 %v5725_v54  ;;  %2496 = vmatprep.mubr.f32.mxu0 %v2018_v47 }
 0x361   :  { %3875 = vmatpush3.bf16.msra.mxu1 %v5542_v15  ;;  %3821 = vmatprep.subr.bf16.mxu0 %v5729_v60  ;;  %v2189_v15 = vld [vmem:[#allocation7 + $0x330] sm:$0xff]  ;;  %v2085_v36 = vcombine.high %v5748_v40, %v5949_v13 }
 0x362   :  { %3877 = vmatprep.subr.bf16.mxu1 %v5564_v20  ;;  %v2207_v20 = vld [vmem:[#allocation7 + $0x3c0] sm:$0xff]  ;;  %v5762_v47 = vpack.c.bf16 %v2190_v27, %v2189_v15  ;;  %v5782_v15 = vpack.c.bf16 %v2212_v42, %v2211_v3  ;;  %v2196_v27 = vld [vmem:[#allocation7 + $0x368] sm:$0xff] }
 0x363   :  { %v2812_v42 = vld [vmem:[#allocation9 + $0x60] sm:$0xff] }
 0x364   :  { %3823 = vmatpush3.bf16.msra.mxu0 %v5740_v2 }
 0x365   :  { %3879 = vmatpush3.bf16.msra.mxu1 %v5566_v35  ;;  %3825 = vmatprep.subr.bf16.mxu0 %v5744_v34  ;;  %v5765_v35 = vpack.c.bf16 %v2208_v63, %v2207_v20  ;;  %v2213_v20 = vld [vmem:[#allocation7 + $0x3f0] sm:$0xff]  ;;  %v2214_v63 = vld [vmem:[#allocation7 + $0x3f8] sm:$0xff] }
 0x366   :  { %3913 = vmatprep.subr.bf16.mxu1 %v5532_v51  ;;  %v2192_v51 = vld [vmem:[#allocation7 + $0x348] sm:$0xff] }
 0x368   :  { %2568 = vmatmul.mubr.f32.vlgmr.msra.gmra.mrb[18].mxu1 %v5679_v32  ;;  %3827 = vmatpush3.bf16.msra.mxu0 %v5751_v39  ;;  %v5770_v32 = vpack.c.bf16 %v2192_v51, %v2191_v58  ;;  %v2197_v58 = vld [vmem:[#allocation7 + $0x370] sm:$0xff]  ;;  %v2036_v51 = vcombine.high %v5663_v49, %v5666_v1  ;;  %v2792_v49 = vld [vmem:[%s5935_s10 + $0x40] sm:$0xff]  ;;  %v2793_v1 = vld [vmem:[%s5935_s10 + $0x48] sm:$0xff] }
 0x369   :  { %3915 = vmatpush3.bf16.msra.mxu1 %v5534_v61  ;;  %2707 = vmatprep.mubr.f32.mxu1 %v2085_v36  ;;  %v5774_v61 = vpack.c.bf16 %v2210_v17, %v2209_v28  ;;  %v3844_v36 = vpack.c.bf16 %v2214_v63, %v2213_v20  ;;  %v2808_v17 = vld [vmem:[#allocation9 + $0x40] sm:$0xff]  ;;  %v2814_v63 = vld [vmem:[#allocation9 + $0x70] sm:$0xff] }
 0x36a   :  { %3829 = vmatprep.subr.bf16.mxu0 %v5756_v16  ;;  %3917 = vmatprep.subr.bf16.mxu1 %v5538_v10  ;;  %v5778_v10 = vpack.c.bf16 %v2194_v31, %v2193_v6  ;;  %v2810_v6 = vld [vmem:[#allocation9 + $0x50] sm:$0xff]  ;;  %v2811_v31 = vld [vmem:[#allocation9 + $0x58] sm:$0xff] }
 0x36b   :  { %v3992_v3 = vpack.c.bf16 %v2811_v31, %v2810_v6  ;;  %v2980_v6 = vld [vmem:[#allocation10 + $0x78] sm:$0xff] }
 0x36c   :  { %3831 = vmatpush3.bf16.msra.mxu0 %v5762_v47 }
 0x36d   :  { %3919 = vmatpush3.bf16.msra.mxu1 %v5545_v43  ;;  %3833 = vmatprep.subr.bf16.mxu0 %v5765_v35  ;;  %v2195_v43 = vld [vmem:[#allocation7 + $0x360] sm:$0xff] }
 0x36e   :  { %3921 = vmatprep.subr.bf16.mxu1 %v5550_v52  ;;  %v3842_v52 = vpack.c.bf16 %v2196_v27, %v2195_v43 }
 0x370   :  { %3835 = vmatpush3.bf16.msra.mxu0 %v5770_v32 }
 0x371   :  { %3923 = vmatpush3.bf16.msra.mxu1 %v5552_v21  ;;  %3837 = vmatprep.subr.bf16.mxu0 %v5774_v61  ;;  %v2198_v21 = vld [vmem:[#allocation7 + $0x378] sm:$0xff] }
 0x372   :  { %3925 = vmatprep.subr.bf16.mxu1 %v5556_v24  ;;  %v3846_v28 = vpack.c.bf16 %v2198_v21, %v2197_v58  ;;  %v2050_v24 = vrot.slane %v2036_v51, %v5623_v9 }
 0x374   :  { %3839 = vmatpush3.bf16.msra.mxu0 %v5778_v10 }
 0x375   :  { %3927 = vmatpush3.bf16.msra.mxu1 %v5558_v26  ;;  %3841 = vmatprep.subr.bf16.mxu0 %v5782_v15  ;;  %v2052_v26 = vcombine.high %v2050_v24, %v5949_v13 }
 0x376   :  { %3929 = vmatprep.subr.bf16.mxu1 %v5562_v44  ;;  %v2070_v44 = vcombine.high %v5732_v30, %v5721_v62  ;;  %v2801_v62 = vld [vmem:[#allocation9 + $0x8] sm:$0xff]  ;;  %v2803_v30 = vld [vmem:[#allocation9 + $0x18] sm:$0xff] }
 0x378   :  { %3843 = vmatpush3.bf16.msra.mxu0 %v3842_v52 }
 0x379   :  { %3931 = vmatpush3.bf16.msra.mxu1 %v5569_v38  ;;  %3845 = vmatprep.subr.bf16.mxu0 %v3844_v36  ;;  %v2084_v38 = vrot.slane %v2070_v44, %v5623_v9 }
 0x37a   :  { %3933 = vmatprep.subr.bf16.mxu1 %v5574_v57 }
 0x37b   :  { %v2086_v57 = vcombine.high %v2084_v38, %v5949_v13 }
 0x37c   :  { %3847 = vmatpush3.bf16.msra.mxu0 %v3846_v28 }
 0x37d   :  { %3935 = vmatpush3.bf16.msra.mxu1 %v5576_v25  ;;  %3881 = vmatprep.subr.bf16.mxu0 %v5580_v59  ;;  %v2784_v25 = vld [vmem:[%s5935_s10] sm:$0xff]  ;;  %v2785_v59 = vld [vmem:[%s5935_s10 + $0x8] sm:$0xff] }
 0x37e   :  { %3937 = vmatprep.subr.bf16.mxu1 %v5582_v55  ;;  %v4431_v55 = vmov 0.0|0.0  }
 0x37f   :  { %2497 = vmatmul.mubr.f32.vlgmr.msra.gmra.mrb[52].mxu0 %v5718_v56  ;;  %v2800_v56 = vld [vmem:[#allocation9] sm:$0xff] }
 0x380   :  { %3883 = vmatpush3.bf16.msra.mxu0 %v5633_v37  ;;  %2637 = vmatprep.mubr.f32.mxu0 %v2052_v26  ;;  %v2788_v37 = vld [vmem:[%s5935_s10 + $0x20] sm:$0xff] }
 0x381   :  { %3939 = vmatpush3.bf16.msra.mxu1 %v5585_v5  ;;  %3885 = vmatprep.subr.bf16.mxu0 %v5636_v41  ;;  %v4001_v5 = vpack.c.bf16 %v2785_v59, %v2784_v25  ;;  %v2789_v41 = vld [vmem:[%s5935_s10 + $0x28] sm:$0xff] }
 0x382   :  { %3941 = vmatprep.subr.bf16.mxu1 %v5589_v48  ;;  %v2786_v48 = vld [vmem:[%s5935_s10 + $0x10] sm:$0xff] }
 0x384   :  { %3887 = vmatpush3.bf16.msra.mxu0 %v5647_v22  ;;  %v4007_v22 = vpack.c.bf16 %v2789_v41, %v2788_v37 }
 0x385   :  { %3943 = vmatpush3.bf16.msra.mxu1 %v5591_v18  ;;  %3889 = vmatprep.subr.bf16.mxu0 %v5652_v4  ;;  %v2787_v18 = vld [vmem:[%s5935_s10 + $0x18] sm:$0xff]  ;;  %v2790_v4 = vld [vmem:[%s5935_s10 + $0x30] sm:$0xff] }
 0x386   :  { %3976 = vmatprep.subr.bf16.mxu1 %v4431_v55  ;;  %v4004_v9 = vpack.c.bf16 %v2787_v18, %v2786_v48 }
 0x388   :  { %2708 = vmatmul.mubr.f32.vlgmr.msra.gmra.mrb[20].mxu1 %v5748_v40  ;;  %3891 = vmatpush3.bf16.msra.mxu0 %v5657_v33  ;;  %v2791_v33 = vld [vmem:[%s5935_s10 + $0x38] sm:$0xff]  ;;  %v2805_v40 = vld [vmem:[#allocation9 + $0x28] sm:$0xff] }
 0x389   :  { %3893 = vmatprep.subr.bf16.mxu0 %v5660_v0  ;;  %v4010_v0 = vpack.c.bf16 %v2791_v33, %v2790_v4  ;;  %3484 = vmatprep.mubr.msk.f32.mxu1 %vm4432_vm11, %v5949_v13 }
 0x38c   :  { %3895 = vmatpush3.bf16.msra.mxu0 %v5672_v46  ;;  %v4013_v46 = vpack.c.bf16 %v2793_v1, %v2792_v49 }
 0x38d   :  { %3897 = vmatprep.subr.bf16.mxu0 %v5676_v8  ;;  %v2794_v8 = vld [vmem:[%s5935_s10 + $0x50] sm:$0xff] }
 0x390   :  { %3899 = vmatpush3.bf16.msra.mxu0 %v5685_v7  ;;  %v2795_v7 = vld [vmem:[%s5935_s10 + $0x58] sm:$0xff] }
 0x391   :  { %3901 = vmatprep.subr.bf16.mxu0 %v5689_v14  ;;  %v4016_v14 = vpack.c.bf16 %v2795_v7, %v2794_v8 }
 0x394   :  { %3903 = vmatpush3.bf16.msra.mxu0 %v5693_v29  ;;  %v2796_v29 = vld [vmem:[%s5935_s10 + $0x60] sm:$0xff] }
 0x395   :  { %3905 = vmatprep.subr.bf16.mxu0 %v5697_v23  ;;  %v2797_v23 = vld [vmem:[%s5935_s10 + $0x68] sm:$0xff] }
 0x398   :  { %3907 = vmatpush3.bf16.msra.mxu0 %v5701_v50  ;;  %v4019_v50 = vpack.c.bf16 %v2797_v23, %v2796_v29 }
 0x399   :  { %3909 = vmatprep.subr.bf16.mxu0 %v5705_v45  ;;  %v2798_v45 = vld [vmem:[%s5935_s10 + $0x70] sm:$0xff] }
 0x39c   :  { %3911 = vmatpush3.bf16.msra.mxu0 %v5711_v11  ;;  %v2799_v11 = vld [vmem:[%s5935_s10 + $0x78] sm:$0xff] }
 0x39d   :  { %3945 = vmatprep.subr.bf16.mxu0 %v5715_v19  ;;  %v4022_v19 = vpack.c.bf16 %v2799_v11, %v2798_v45  ;;  %v2966_v11 = vld [vmem:[#allocation10 + $0x8] sm:$0xff] }
 0x39f   :  { %2638 = vmatmul.mubr.f32.vlgmr.msra.gmra.mrb[54].mxu0 %v2050_v24 }
 0x3a0   :  { %3947 = vmatpush3.bf16.msra.mxu0 %v5725_v54  ;;  %2777 = vmatprep.mubr.f32.mxu0 %v2086_v57  ;;  %v2802_v54 = vld [vmem:[#allocation9 + $0x10] sm:$0xff] }
 0x3a1   :  { %3949 = vmatprep.subr.bf16.mxu0 %v5729_v60  ;;  %v3977_v60 = vpack.c.bf16 %v2801_v62, %v2800_v56  ;;  %v2965_v56 = vld [vmem:[#allocation10] sm:$0xff] }
 0x3a3   :  { %3978 = vmatpush3.bf16.msra.mxu1 %v3977_v60  ;;  %v2970_v60 = vld [vmem:[#allocation10 + $0x28] sm:$0xff] }
 0x3a4   :  { %3951 = vmatpush3.bf16.msra.mxu0 %v5740_v2  ;;  %v3980_v2 = vpack.c.bf16 %v2803_v30, %v2802_v54  ;;  %3979 = vmatprep.subr.bf16.mxu1 %v4431_v55  ;;  %v2967_v54 = vld [vmem:[#allocation10 + $0x10] sm:$0xff]  ;;  %v2972_v30 = vld [vmem:[#allocation10 + $0x38] sm:$0xff] }
 0x3a5   :  { %3953 = vmatprep.subr.bf16.mxu0 %v5744_v34  ;;  %v2804_v34 = vld [vmem:[#allocation9 + $0x20] sm:$0xff] }
 0x3a7   :  { %3981 = vmatpush3.bf16.msra.mxu1 %v3980_v2  ;;  %v4026_v2 = vpack.c.bf16 %v2967_v54, %v2965_v56 }
 0x3a8   :  { %3955 = vmatpush3.bf16.msra.mxu0 %v5751_v39  ;;  %v3983_v39 = vpack.c.bf16 %v2805_v40, %v2804_v34  ;;  %3982 = vmatprep.subr.bf16.mxu1 %v4431_v55  ;;  %v4028_v34 = vpack.c.bf16 %v2972_v30, %v2970_v60  ;;  %v2969_v40 = vld [vmem:[#allocation10 + $0x20] sm:$0xff] }
 0x3a9   :  { %3957 = vmatprep.subr.bf16.mxu0 %v5756_v16  ;;  %v2806_v16 = vld [vmem:[#allocation9 + $0x30] sm:$0xff] }
 0x3ab   :  { %3984 = vmatpush3.bf16.msra.mxu1 %v3983_v39  ;;  %v2971_v39 = vld [vmem:[#allocation10 + $0x30] sm:$0xff] }
 0x3ac   :  { %3959 = vmatpush3.bf16.msra.mxu0 %v5762_v47  ;;  %v2807_v47 = vld [vmem:[#allocation9 + $0x38] sm:$0xff]  ;;  %3985 = vmatprep.subr.bf16.mxu1 %v4431_v55 }
 0x3ad   :  { %3961 = vmatprep.subr.bf16.mxu0 %v5765_v35  ;;  %v3986_v35 = vpack.c.bf16 %v2807_v47, %v2806_v16  ;;  %v2974_v16 = vld [vmem:[#allocation10 + $0x48] sm:$0xff]  ;;  %v2976_v47 = vld [vmem:[#allocation10 + $0x58] sm:$0xff] }
 0x3af   :  { %3987 = vmatpush3.bf16.msra.mxu1 %v3986_v35  ;;  %v4030_v35 = vpack.c.bf16 %v2971_v39, %v2969_v40 }
 0x3b0   :  { %3963 = vmatpush3.bf16.msra.mxu0 %v5770_v32  ;;  %v2809_v32 = vld [vmem:[#allocation9 + $0x48] sm:$0xff]  ;;  %3988 = vmatprep.subr.bf16.mxu1 %v4431_v55 }
 0x3b1   :  { %3965 = vmatprep.subr.bf16.mxu0 %v5774_v61  ;;  %v3989_v61 = vpack.c.bf16 %v2809_v32, %v2808_v17  ;;  %v4032_v17 = vpack.c.bf16 %v2976_v47, %v2974_v16  ;;  %v2973_v32 = vld [vmem:[#allocation10 + $0x40] sm:$0xff] }
 0x3b3   :  { %3990 = vmatpush3.bf16.msra.mxu1 %v3989_v61  ;;  %v2978_v61 = vld [vmem:[#allocation10 + $0x68] sm:$0xff] }
 0x3b4   :  { %3967 = vmatpush3.bf16.msra.mxu0 %v5778_v10  ;;  %3991 = vmatprep.subr.bf16.mxu1 %v4431_v55  ;;  %v2813_v10 = vld [vmem:[#allocation9 + $0x68] sm:$0xff] }
 0x3b5   :  { %3969 = vmatprep.subr.bf16.mxu0 %v5782_v15  ;;  %v3995_v43 = vpack.c.bf16 %v2813_v10, %v2812_v42  ;;  %v2977_v42 = vld [vmem:[#allocation10 + $0x60] sm:$0xff]  ;;  %v2979_v10 = vld [vmem:[#allocation10 + $0x70] sm:$0xff] }
 0x3b7   :  { %3993 = vmatpush3.bf16.msra.mxu1 %v3992_v3  ;;  %v4036_v3 = vpack.c.bf16 %v2980_v6, %v2978_v61 }
 0x3b8   :  { %3971 = vmatpush3.bf16.msra.mxu0 %v3842_v52  ;;  %3994 = vmatprep.subr.bf16.mxu1 %v4431_v55  ;;  %v2815_v52 = vld [vmem:[#allocation9 + $0x78] sm:$0xff] }
 0x3b9   :  { %3973 = vmatprep.subr.bf16.mxu0 %v3844_v36  ;;  %v3998_v36 = vpack.c.bf16 %v2815_v52, %v2814_v63  ;;  %v2981_v63 = vld [vmem:[#allocation10 + $0x80] sm:$0xff]  ;;  %v2983_v52 = vld [vmem:[#allocation10 + $0x90] sm:$0xff] }
 0x3bb   :  { %3996 = vmatpush3.bf16.msra.mxu1 %v3995_v43  ;;  %v2984_v43 = vld [vmem:[#allocation10 + $0x98] sm:$0xff] }
 0x3bc   :  { %3975 = vmatpush3.bf16.msra.mxu0 %v3846_v28  ;;  %3997 = vmatprep.subr.bf16.mxu1 %v4431_v55  ;;  %v3135_v28 = vld [vmem:[%s5934_s9] ss:$0 sm:$0xff] }
 0x3bd   :  { %4000 = vmatprep.subr.bf16.mxu0 %v4431_v55 }
 0x3bf   :  { %2778 = vmatmul.mubr.f32.vlgmr.msra.gmra.mrb[56].mxu0 %v2084_v38  ;;  %3999 = vmatpush3.bf16.msra.mxu1 %v3998_v36  ;;  %v2986_v36 = vld [vmem:[#allocation10 + $0xa8] sm:$0xff] }
 0x3c0   :  { %4002 = vmatpush3.bf16.msra.mxu0 %v4001_v5  ;;  %3519 = vmatprep.mubr.msk.f32.mxu0 %vm4432_vm11, %v5949_v13 }
 0x3c1   :  { %4003 = vmatprep.subr.bf16.mxu0 %v4431_v55 }
 0x3c4   :  { %4005 = vmatpush3.bf16.msra.mxu0 %v4004_v9 }
 0x3c5   :  { %4006 = vmatprep.subr.bf16.mxu0 %v4431_v55 }
 0x3c8   :  { %4008 = vmatpush3.bf16.msra.mxu0 %v4007_v22 }
 0x3c9   :  { %4009 = vmatprep.subr.bf16.mxu0 %v4431_v55 }
 0x3cc   :  { %4011 = vmatpush3.bf16.msra.mxu0 %v4010_v0 }
 0x3cd   :  { %4012 = vmatprep.subr.bf16.mxu0 %v4431_v55 }
 0x3d0   :  { %4014 = vmatpush3.bf16.msra.mxu0 %v4013_v46 }
 0x3d1   :  { %4015 = vmatprep.subr.bf16.mxu0 %v4431_v55 }
 0x3d4   :  { %4017 = vmatpush3.bf16.msra.mxu0 %v4016_v14 }
 0x3d5   :  { %4018 = vmatprep.subr.bf16.mxu0 %v4431_v55 }
 0x3d8   :  { %4020 = vmatpush3.bf16.msra.mxu0 %v4019_v50 }
 0x3d9   :  { %4021 = vmatprep.subr.bf16.mxu0 %v4431_v55 }
 0x3dc   :  { %4023 = vmatpush3.bf16.msra.mxu0 %v4022_v19  ;;  %v2968_v19 = vld [vmem:[#allocation10 + $0x18] sm:$0xff] }
 0x3dd   :  { %v4024_v62 = vpack.c.bf16 %v2968_v19, %v2966_v11 }
 0x3df   :  { %4025 = vmatprep.subr.bf16.mxu1 %v4024_v62 }
 0x412   :  { %v3170_v15 = vpop.f32.mrb[48].mxu0 }
 0x413   :  { %v3171_v27 = vpop.f32.mrb[49].mxu0 }
 0x414   :  { %v3172_v20 = vadd.f32 %v3171_v27, %v3170_v15  ;;  %v2982_v15 = vld [vmem:[#allocation10 + $0x88] sm:$0xff]  ;;  %v4038_v27 = vpack.c.bf16 %v2979_v10, %v2977_v42 }
 0x416   :  { %v2289_v44 = vadd.f32 %v3172_v20, %v3135_v28  ;;  %v4040_v20 = vpack.c.bf16 %v2984_v43, %v2982_v15 }
 0x41a   :  { %v3240_v58 = vpop.f32.mrb[16].mxu1 }
 0x41b   :  { %v3241_v21 = vpop.f32.mrb[17].mxu1 }
 0x41c   :  { %v3242_v51 = vadd.f32 %v3241_v21, %v3240_v58  ;;  %v2988_v58 = vld [vmem:[#allocation10 + $0xb8] sm:$0xff]  ;;  %v4042_v21 = vpack.c.bf16 %v2983_v52, %v2981_v63 }
 0x432   :  { %v3205_v24 = vpop.f32.mrb[50].mxu0 }
 0x433   :  { %v3206_v26 = vpop.f32.mrb[51].mxu0 }
 0x434   :  { %v3207_v38 = vadd.f32 %v3206_v26, %v3205_v24  ;;  %v2987_v24 = vld [vmem:[#allocation10 + $0xb0] sm:$0xff]  ;;  %v2990_v26 = vld [vmem:[#allocation10 + $0xc8] sm:$0xff] }
 0x436   :  { %v2359_v57 = vadd.f32 %v3207_v38, %v2289_v44  ;;  %v2992_v44 = vld [vmem:[#allocation10 + $0xd8] sm:$0xff] }
 0x438   :  { %v2429_v25 = vadd.f32 %v3242_v51, %v2359_v57  ;;  %v4044_v51 = vpack.c.bf16 %v2988_v58, %v2986_v36  ;;  %v4048_v57 = vpack.c.bf16 %v2992_v44, %v2990_v26 }
 0x43b   :  { %v3310_v59 = vpop.f32.mrb[18].mxu1 }
 0x43c   :  { %v3311_v5 = vpop.f32.mrb[19].mxu1 }
 0x43d   :  { %v3312_v55 = vadd.f32 %v3311_v5, %v3310_v59  ;;  %v2991_v59 = vld [vmem:[#allocation10 + $0xd0] sm:$0xff] }
 0x43f   :  { %v2570_v48 = vadd.f32 %v3312_v55, %v3135_v28  ;;  %v2985_v28 = vld [vmem:[#allocation10 + $0xa0] sm:$0xff]  ;;  %v2994_v55 = vld [vmem:[#allocation10 + $0xe8] sm:$0xff] }
 0x440   :  { %v4046_v38 = vpack.c.bf16 %v2987_v24, %v2985_v28 }
 0x452   :  { %v3275_v18 = vpop.f32.mrb[52].mxu0 }
 0x453   :  { %v3276_v9 = vpop.f32.mrb[53].mxu0 }
 0x454   :  { %v3277_v37 = vadd.f32 %v3276_v9, %v3275_v18  ;;  %v2993_v9 = vld [vmem:[#allocation10 + $0xe0] sm:$0xff] }
 0x456   :  { %v2499_v41 = vadd.f32 %v3277_v37, %v2429_v25  ;;  %v2989_v25 = vld [vmem:[#allocation10 + $0xc0] sm:$0xff]  ;;  %v2995_v37 = vld [vmem:[#allocation10 + $0xf0] sm:$0xff] }
 0x457   :  { %v4050_v5 = vpack.c.bf16 %v2991_v59, %v2989_v25 }
 0x458   :  { %v2502_v22 = vmax.f32 %v2499_v41, 0.0  ;;  %v4054_v41 = vpack.c.bf16 %v2995_v37, %v2993_v9 }
 0x45a   :  { %3520 = vmatmul.mubr.f32.vlgmr.msra.gmra.mrb[58].mxu0 %v2502_v22 }
 0x45b   :  { %v3380_v4 = vpop.f32.mrb[20].mxu1 }
 0x45c   :  { %v3381_v33 = vpop.f32.mrb[21].mxu1 }
 0x45d   :  { %v3382_v0 = vadd.f32 %v3381_v33, %v3380_v4 }
 0x472   :  { %v3345_v49 = vpop.f32.mrb[54].mxu0 }
 0x473   :  { %v3346_v1 = vpop.f32.mrb[55].mxu0 }
 0x474   :  { %v3347_v46 = vadd.f32 %v3346_v1, %v3345_v49 }
 0x476   :  { %v2640_v8 = vadd.f32 %v3347_v46, %v2570_v48  ;;  %v2996_v48 = vld [vmem:[#allocation10 + $0xf8] sm:$0xff] }
 0x477   :  { %v4052_v18 = vpack.c.bf16 %v2996_v48, %v2994_v55 }
 0x478   :  { %v2710_v7 = vadd.f32 %v3382_v0, %v2640_v8  ;;  %v3136_v0 = vld [vmem:[%s5937_s12] ss:$0 sm:$0xff]  ;;  %s4385_s12 = scalar_lea.vmem %s3099_s23, 64 }
 0x479   :  { %p4386_p4 = scmp.ne.s32.totalorder %s3099_s23, %s4385_s12  ;;  %p4391_p6 = scmp.lt.s32.totalorder %s4385_s12, %s4385_s12 }
 0x47b   :  { %p4392_p7 = por %p4391_p6, %p4390_p5 }
 0x47d   :  { %p4393_p8 = pnand %p4392_p7, %p4386_p4 }
 0x492   :  { %v3415_v14 = vpop.f32.mrb[56].mxu0 }
 0x493   :  { %v3416_v29 = vpop.f32.mrb[57].mxu0 }
 0x494   :  { %v3417_v23 = vadd.f32 %v3416_v29, %v3415_v14 }
 0x496   :  { %v2780_v50 = vadd.f32 %v3417_v23, %v2710_v7  ;;  %v2997_v7 = vld [vmem:[%s5939_s14] sm:$0x3] }
 0x497   :  { %v3002_v14 = vrot.slane %v2997_v7, %v5291_v53  ;;  %v3006_v29 = vrot.slane %v2997_v7, %v5297_v12 }
 0x498   :  { %v2783_v45 = vmax.f32 %v2780_v50, 0.0 }
 0x49a   :  { %3485 = vmatmul.mubr.f32.vlgmr.msra.gmra.mrb[22].mxu1 %v2783_v45 }
 0x49b   :  { %3073 = vmatprep.mubr.f32.mxu1 %v5949_v13  ;;  %4027 = vmatpush1.bf16.msra.mxu1 %v4026_v2  ;;  %v2975_v13 = vld [vmem:[#allocation10 + $0x50] sm:$0xff] }
 0x49c   :  { %4029 = vmatprep.subr.bf16.mxu1 %v4028_v34  ;;  %v4034_v31 = vpack.c.bf16 %v2975_v13, %v2973_v32 }
 0x49f   :  { %4031 = vmatpush1.bf16.msra.mxu1 %v4030_v35 }
 0x4a0   :  { %4033 = vmatprep.subr.bf16.mxu1 %v4032_v17 }
 0x4a3   :  { %4035 = vmatpush1.bf16.msra.mxu1 %v4034_v31 }
 0x4a4   :  { %4037 = vmatprep.subr.bf16.mxu1 %v4036_v3 }
 0x4a7   :  { %4039 = vmatpush1.bf16.msra.mxu1 %v4038_v27 }
 0x4a8   :  { %4041 = vmatprep.subr.bf16.mxu1 %v4040_v20 }
 0x4ab   :  { %4043 = vmatpush1.bf16.msra.mxu1 %v4042_v21 }
 0x4ac   :  { %4045 = vmatprep.subr.bf16.mxu1 %v4044_v51 }
 0x4af   :  { %4047 = vmatpush1.bf16.msra.mxu1 %v4046_v38 }
 0x4b0   :  { %4049 = vmatprep.subr.bf16.mxu1 %v4048_v57 }
 0x4b3   :  { %4051 = vmatpush1.bf16.msra.mxu1 %v4050_v5 }
 0x4b4   :  { %4053 = vmatprep.subr.bf16.mxu1 %v4052_v18 }
 0x4b7   :  { %4055 = vmatpush1.bf16.msra.mxu1 %v4054_v41 }
 0x52d   :  { %v2952_v22 = vpop.f32.mrb[58].mxu0 }
 0x52e   :  { %v3521_v4 = vpop.f32.mrb[59].mxu0 }
 0x56d   :  { %v2882_v33 = vpop.f32.mrb[22].mxu1 }
 0x56e   :  { %v2953_v49 = vadd.f32 %v2952_v22, %v2882_v33  ;;  %v3486_v1 = vpop.f32.mrb[23].mxu1 }
 0x570   :  { %v2963_v46 = vadd.f32 %v3136_v0, %v2953_v49 }
 0x572   :  { %v2964_v8 = vmax.f32 %v2963_v46, 0.0 }
 0x574   :  { %3074 = vmatmul.mubr.f32.vlgmr.msra.gmra.mrb[24].mxu1 %v2964_v8 }
 0x647   :  { %v3075_v23 = vpop.f32.mrb[24].mxu1 }
 0x648   :  { %v3076_v50 = vadd.f32 %v3075_v23, %v3002_v14  ;;  %v3077_v45 = vpop.f32.mrb[25].mxu1 }
 0x649   :  { %v3078_v11 = vadd.f32 %v3077_v45, %v3006_v29 }
 0x64b   :  { %v3082_v19 = vcombine.low %v3076_v50, %v3078_v11 }
 0x64d   :  { %3137 = vst.sshfl [vmem:[#allocation12] sm:$0x33 pattern:$0x76325410] %v3082_v19 }
 0x64e   :  { %4396 = shalt.err (!%p4393_p8)
}
 0x64f   :  { %s4397_s27 = scalar_lea.hbm %s5940_s15, 64 }
 0x650   :  { %p4398_p9 = scmp.ne.s32.totalorder %s5940_s15, %s4397_s27  ;;  %p4401_p10 = scmp.lt.u32.totalorder %s4397_s27, %s5940_s15 }
 0x652   :  { %p4403_p11 = pnand %p4401_p10, %p4398_p9 }
 0x654   :  { %4406 = shalt.err (!%p4403_p11)
}
 0x655   :  { %3101 = dma.vmem_to_hbm [thread:$0]  %s3099_s23, 64, %s5940_s15, [#allocation6]  }
 0x656   :  { %4413 = dma.done.wait [#allocation6], 64  }
 0x657   :  { %4414 = vsyncadd [#allocation6], 4294967232 }
 0x658   :  { %3105 = vsyncpa [#allocation5], 1 }
 0x659   :  { %3106 = vsyncpa [#allocation8], 1 }
 0x65a   :  { %3107 = vsyncpa [#allocation11], 1 }
 0x65b   :  { %3108 = vsyncpa [#allocation6], 1 }

</bundles_post_ra>
